<compile_context>
chip_gen: v7x
topology: tpu7x:2x2x1
jax: 0.10.0
libtpu: 0.0.40
codegen_flags: <defaults>
</compile_context>

<pallas_src>
import math

import jax
import jax.numpy as jnp
from jax import lax
from jax.experimental import pallas as pl
from jax.experimental.pallas import tpu as pltpu

# ---- Small synthetic-BERT configuration -------------------------------------
B = 2          # batch
S = 8          # sequence length
H = 64         # hidden size
NH = 4         # attention heads
HD = H // NH   # head dim
F = 128        # FFN intermediate size
L = 2          # number of encoder layers
O = 32         # output_dim of the final fc
O_PAD = 128    # lane-dense padded fc output width (sliced back to O outside)
VOCAB = 100
MAXPOS = 16
EPS = 1e-12    # BERT layernorm epsilon
BS = B * S     # folded-batch row count


def _layernorm(x, g, b):
    mu = jnp.mean(x, axis=-1, keepdims=True)
    var = jnp.mean(jnp.square(x - mu), axis=-1, keepdims=True)
    return (x - mu) * lax.rsqrt(var + EPS) * g + b


def bert_encoder_kernel(
    x_ref, mask_ref, embln_ref,
    wqkv_ref, bqkv_ref, wo_ref, w1_ref, b1_ref, w2_ref, lvec_ref,
    fcw_ref, fcb_ref,
    out_ref,
    ctx_ref,
):
    # Single grid step: whole folded batch resident.
    x = x_ref[...]                        # (B*S, H) f32 summed embeddings
    mask = mask_ref[...]                  # (B, S) 1.0 = keep, 0.0 = pad
    neg = (1.0 - mask) * -1e9             # (B, S) additive attention mask

    # Hoisted per-batch (S, S) additive masks — broadcast once, reused over L*NH.
    negs = [jnp.broadcast_to(neg[b:b + 1, :], (S, S)) for b in range(B)]

    eln = embln_ref[...]                  # (2, H): [gamma, beta]
    h = _layernorm(x, eln[0:1], eln[1:2])     # (B*S, H)

    for l in range(L):                    # static unroll over layers
        lv = lvec_ref[l]                  # (6, H): bo, ln1g, ln1b, b2, ln2g, ln2b

        # Fused QKV projection over the folded batch: one bf16 MXU push.
        qkv = jnp.dot(h.astype(jnp.bfloat16), wqkv_ref[l],
                      preferred_element_type=jnp.float32) + bqkv_ref[l]  # (B*S, 3H)
        qkv_b = qkv.astype(jnp.bfloat16)

        # Attention: per-batch, per-head score/softmax/value; head contexts land
        # in a (B*S, H) f32 scratch at static lane offsets, then one wo matmul.
        for b in range(B):                # static per-batch loop
            r0 = b * S
            rows = qkv_b[r0:r0 + S, :]    # (S, 3H) sublane-aligned row slice
            neg_b = negs[b]
            for hi in range(NH):          # static per-head loop
                q_sl = slice(hi * HD, (hi + 1) * HD)
                k_sl = slice(H + hi * HD, H + (hi + 1) * HD)
                v_sl = slice(2 * H + hi * HD, 2 * H + (hi + 1) * HD)
                qh = rows[:, q_sl]        # (S, HD)  (1/sqrt(HD) folded into wqkv)
                kh = rows[:, k_sl]
                vh = rows[:, v_sl]

                # Contract last dims directly (no transpose materialization).
                scores = lax.dot_general(
                    qh, kh, (((1,), (1,)), ((), ())),
                    preferred_element_type=jnp.float32)                  # (S, S)
                scores = scores + neg_b
                m = jnp.max(scores, axis=-1, keepdims=True)
                p = jnp.exp(scores - m)
                p = p * pl.reciprocal(jnp.sum(p, axis=-1, keepdims=True),
                                      approx=True)
                hout = jnp.dot(p.astype(jnp.bfloat16), vh,
                               preferred_element_type=jnp.float32)       # (S, HD)
                ctx_ref[r0:r0 + S, q_sl] = hout

        # Single output-projection matmul over all batches/heads.
        attn = jnp.dot(ctx_ref[...].astype(jnp.bfloat16), wo_ref[l],
                       preferred_element_type=jnp.float32) + lv[0:1]     # + bo
        h = _layernorm(h + attn, lv[1:2], lv[2:3])           # ln1

        ff = jnp.dot(h.astype(jnp.bfloat16), w1_ref[l],
                     preferred_element_type=jnp.float32) + b1_ref[l]     # (B*S, F)
        # TODO(synk): HuggingFace BERT uses exact (erf) GELU; tanh-approx GELU used here.
        ff = jax.nn.gelu(ff)
        ff = jnp.dot(ff.astype(jnp.bfloat16), w2_ref[l],
                     preferred_element_type=jnp.float32) + lv[3:4]       # b2
        h = _layernorm(h + ff, lv[4:5], lv[5:6])             # ln2

    # CLS rows (row 0 of each batch element) -> final fc, one lane-dense store.
    cls = jnp.concatenate([h[b * S:b * S + 1, :] for b in range(B)], axis=0)  # (B, H)
    out_ref[...] = (jnp.dot(cls.astype(jnp.bfloat16), fcw_ref[...],
                            preferred_element_type=jnp.float32)
                    + fcb_ref[...])                          # (B, O_PAD)


def init_params(key):
    def nrm(k, shape, s=0.02):
        return (jax.random.normal(k, shape) * s).astype(jnp.float32)

    ks = jax.random.split(key, 12)
    scale = 1.0 / math.sqrt(HD)

    # Fused QKV weight, attention scale folded into the Q columns.
    # NOTE: if pretrained weights are ever loaded, the Q bias must also be
    # scaled by 1/sqrt(HD); biases are zero here so it is a no-op.
    wq = nrm(ks[3], (L, H, H)) * scale
    wk = nrm(ks[4], (L, H, H))
    wv = nrm(ks[5], (L, H, H))
    wqkv = jnp.concatenate([wq, wk, wv], axis=-1)            # (L, H, 3H)

    # Packed per-layer vectors: [bo, ln1g, ln1b, b2, ln2g, ln2b]
    lvec = jnp.stack(
        [jnp.zeros((L, H)), jnp.ones((L, H)), jnp.zeros((L, H)),
         jnp.zeros((L, H)), jnp.ones((L, H)), jnp.zeros((L, H))],
        axis=1).astype(jnp.float32)                          # (L, 6, H)

    fcw = jnp.zeros((H, O_PAD), jnp.float32).at[:, :O].set(nrm(ks[9], (H, O)))

    return {
        # embedding tables (lookup done in JAX glue)
        'word_emb': nrm(ks[0], (VOCAB, H)),
        'pos_emb':  nrm(ks[1], (MAXPOS, H)),
        'type_emb': nrm(ks[2], (2, H)),
        'emb_ln': jnp.stack([jnp.ones((H,)), jnp.zeros((H,))]).astype(jnp.float32),
        # matmul weights stored bf16 (MXU-native); biases/gains f32
        'wqkv': wqkv.astype(jnp.bfloat16),
        'bqkv': jnp.zeros((L, 1, 3 * H), jnp.float32),
        'wo': nrm(ks[6], (L, H, H)).astype(jnp.bfloat16),
        'w1': nrm(ks[7], (L, H, F)).astype(jnp.bfloat16),
        'b1': jnp.zeros((L, 1, F), jnp.float32),
        'w2': nrm(ks[8], (L, F, H)).astype(jnp.bfloat16),
        'lvec': lvec,
        'fcw': fcw.astype(jnp.bfloat16),
        'fcb': jnp.zeros((1, O_PAD), jnp.float32),
    }


def text_transformer_forward(input_ids, attention_mask, p):
    # Embedding lookup + position + token-type (all-zero type ids) — JAX glue.
    x = (p['word_emb'][input_ids]
         + p['pos_emb'][None, :S, :]
         + p['type_emb'][0][None, None, :]).astype(jnp.float32)          # (B, S, H)
    x2d = x.reshape(BS, H)                                               # folded batch
    mask2d = attention_mask.astype(jnp.float32).reshape(B, S)

    def full(a):
        # Grid-invariant full-array block (single grid step, no re-DMA).
        return pl.BlockSpec(a.shape, lambda i, _nd=a.ndim: (0,) * _nd)

    in_specs = [
        full(x2d), full(mask2d),
        full(p['emb_ln']), full(p['wqkv']), full(p['bqkv']), full(p['wo']),
        full(p['w1']), full(p['b1']), full(p['w2']), full(p['lvec']),
        full(p['fcw']), full(p['fcb']),
    ]

    out = pl.pallas_call(
        bert_encoder_kernel,
        out_shape=jax.ShapeDtypeStruct((B, O_PAD), jnp.float32),
        grid=(1,),
        in_specs=in_specs,
        out_specs=pl.BlockSpec((B, O_PAD), lambda i: (0, 0)),
        scratch_shapes=[pltpu.VMEM((BS, H), jnp.float32)],   # per-layer head contexts
        compiler_params=pltpu.CompilerParams(
            dimension_semantics=("arbitrary",)),
    )(x2d, mask2d, p['emb_ln'], p['wqkv'], p['bqkv'], p['wo'],
      p['w1'], p['b1'], p['w2'], p['lvec'], p['fcw'], p['fcb'])

    return out[:, :O]                                        # (B, O)


if __name__ == "__main__":
    key = jax.random.PRNGKey(0)
    k_ids, k_params = jax.random.split(key)

    input_ids = jax.random.randint(k_ids, (B, S), 0, VOCAB, dtype=jnp.int32)
    # simple padding mask: first sequence full length, second padded after 5 tokens
    lengths = jnp.array([[S], [5]], dtype=jnp.int32)
    attention_mask = (jnp.arange(S)[None, :] < lengths).astype(jnp.float32)

    params = init_params(k_params)

    out = text_transformer_forward(input_ids, attention_mask, params)
    out = jax.block_until_ready(out)
    assert out.shape == (B, O)
    assert bool(jnp.all(jnp.isfinite(out)))
    print("KERNEL_OK")
</pallas_src>

<mosaic_0001>
module attributes {stable_mosaic.version = 11 : i64} {
  func.func @bert_encoder_kernel(%arg0: i32, %arg1: memref<16x64xf32, #tpu.memory_space<vmem>>, %arg2: memref<2x8xf32, #tpu.memory_space<vmem>>, %arg3: memref<2x64xf32, #tpu.memory_space<vmem>>, %arg4: memref<2x64x192xbf16, #tpu.memory_space<vmem>>, %arg5: memref<2x1x192xf32, #tpu.memory_space<vmem>>, %arg6: memref<2x64x64xbf16, #tpu.memory_space<vmem>>, %arg7: memref<2x64x128xbf16, #tpu.memory_space<vmem>>, %arg8: memref<2x1x128xf32, #tpu.memory_space<vmem>>, %arg9: memref<2x128x64xbf16, #tpu.memory_space<vmem>>, %arg10: memref<2x6x64xf32, #tpu.memory_space<vmem>>, %arg11: memref<64x128xbf16, #tpu.memory_space<vmem>>, %arg12: memref<1x128xf32, #tpu.memory_space<vmem>>, %arg13: memref<2x128xf32, #tpu.memory_space<vmem>>, %arg14: memref<16x64xf32, #tpu.memory_space<vmem>>) attributes {dimension_semantics = [#tpu.dimension_semantics<arbitrary>], iteration_bounds = array<i64: 1>, scalar_prefetch = 0 : i64, scratch_operands = 1 : i64, tpu.core_type = #tpu.core_type<tc>, window_params = [{pipeline_mode = #tpu.pipeline_mode<synchronous>, transform_indices = @transform_0, window_bounds = array<i64: 16, 64>}, {pipeline_mode = #tpu.pipeline_mode<synchronous>, transform_indices = @transform_1, window_bounds = array<i64: 2, 8>}, {pipeline_mode = #tpu.pipeline_mode<synchronous>, transform_indices = @transform_2, window_bounds = array<i64: 2, 64>}, {pipeline_mode = #tpu.pipeline_mode<synchronous>, transform_indices = @transform_3, window_bounds = array<i64: 2, 64, 192>}, {pipeline_mode = #tpu.pipeline_mode<synchronous>, transform_indices = @transform_4, window_bounds = array<i64: 2, 1, 192>}, {pipeline_mode = #tpu.pipeline_mode<synchronous>, transform_indices = @transform_5, window_bounds = array<i64: 2, 64, 64>}, {pipeline_mode = #tpu.pipeline_mode<synchronous>, transform_indices = @transform_6, window_bounds = array<i64: 2, 64, 128>}, {pipeline_mode = #tpu.pipeline_mode<synchronous>, transform_indices = @transform_7, window_bounds = array<i64: 2, 1, 128>}, {pipeline_mode = #tpu.pipeline_mode<synchronous>, transform_indices = @transform_8, window_bounds = array<i64: 2, 128, 64>}, {pipeline_mode = #tpu.pipeline_mode<synchronous>, transform_indices = @transform_9, window_bounds = array<i64: 2, 6, 64>}, {pipeline_mode = #tpu.pipeline_mode<synchronous>, transform_indices = @transform_10, window_bounds = array<i64: 64, 128>}, {pipeline_mode = #tpu.pipeline_mode<synchronous>, transform_indices = @transform_11, window_bounds = array<i64: 1, 128>}, {pipeline_mode = #tpu.pipeline_mode<synchronous>, transform_indices = @transform_12, window_bounds = array<i64: 2, 128>}]} {
    %c0 = arith.constant 0 : index
    %c0_0 = arith.constant 0 : index
    %0 = vector.load %arg1[%c0, %c0_0] : memref<16x64xf32, #tpu.memory_space<vmem>>, vector<16x64xf32>
    %c0_1 = arith.constant 0 : index
    %c0_2 = arith.constant 0 : index
    %1 = vector.load %arg2[%c0_1, %c0_2] : memref<2x8xf32, #tpu.memory_space<vmem>>, vector<2x8xf32>
    %cst = arith.constant 1.000000e+00 : f32
    %2 = vector.broadcast %cst : f32 to vector<2x8xf32>
    %3 = arith.subf %2, %1 : vector<2x8xf32>
    %cst_3 = arith.constant -1.000000e+09 : f32
    %4 = vector.broadcast %cst_3 : f32 to vector<2x8xf32>
    %5 = arith.mulf %3, %4 : vector<2x8xf32>
    %6 = vector.extract_strided_slice %5 {offsets = [0, 0], sizes = [1, 8], strides = [1, 1]} : vector<2x8xf32> to vector<1x8xf32>
    %7 = vector.shape_cast %6 : vector<1x8xf32> to vector<1x8xf32>
    %8 = vector.broadcast %7 : vector<1x8xf32> to vector<8x8xf32>
    %9 = vector.extract_strided_slice %5 {offsets = [1, 0], sizes = [1, 8], strides = [1, 1]} : vector<2x8xf32> to vector<1x8xf32>
    %10 = vector.shape_cast %9 : vector<1x8xf32> to vector<1x8xf32>
    %11 = vector.broadcast %10 : vector<1x8xf32> to vector<8x8xf32>
    %c0_4 = arith.constant 0 : index
    %c0_5 = arith.constant 0 : index
    %12 = vector.load %arg3[%c0_4, %c0_5] : memref<2x64xf32, #tpu.memory_space<vmem>>, vector<2x64xf32>
    %13 = vector.extract_strided_slice %12 {offsets = [0, 0], sizes = [1, 64], strides = [1, 1]} : vector<2x64xf32> to vector<1x64xf32>
    %14 = vector.extract_strided_slice %12 {offsets = [1, 0], sizes = [1, 64], strides = [1, 1]} : vector<2x64xf32> to vector<1x64xf32>
    %cst_6 = arith.constant dense<0.000000e+00> : vector<16xf32>
    %15 = vector.multi_reduction <add>, %0, %cst_6 [1] : vector<16x64xf32> to vector<16xf32>
    %16 = vector.shape_cast %15 : vector<16xf32> to vector<16x1xf32>
    %cst_7 = arith.constant 6.400000e+01 : f32
    %17 = vector.broadcast %cst_7 : f32 to vector<16x1xf32>
    %18 = arith.divf %16, %17 : vector<16x1xf32>
    %19 = vector.broadcast %18 : vector<16x1xf32> to vector<16x64xf32>
    %20 = arith.subf %0, %19 : vector<16x64xf32>
    %21 = arith.mulf %20, %20 : vector<16x64xf32>
    %cst_8 = arith.constant dense<0.000000e+00> : vector<16xf32>
    %22 = vector.multi_reduction <add>, %21, %cst_8 [1] : vector<16x64xf32> to vector<16xf32>
    %23 = vector.shape_cast %22 : vector<16xf32> to vector<16x1xf32>
    %cst_9 = arith.constant 6.400000e+01 : f32
    %24 = vector.broadcast %cst_9 : f32 to vector<16x1xf32>
    %25 = arith.divf %23, %24 : vector<16x1xf32>
    %26 = vector.broadcast %18 : vector<16x1xf32> to vector<16x64xf32>
    %27 = arith.subf %0, %26 : vector<16x64xf32>
    %cst_10 = arith.constant 9.99999996E-13 : f32
    %28 = vector.broadcast %cst_10 : f32 to vector<16x1xf32>
    %29 = arith.addf %25, %28 : vector<16x1xf32>
    %30 = math.rsqrt %29 : vector<16x1xf32>
    %31 = vector.broadcast %30 : vector<16x1xf32> to vector<16x64xf32>
    %32 = arith.mulf %27, %31 : vector<16x64xf32>
    %33 = vector.broadcast %13 : vector<1x64xf32> to vector<16x64xf32>
    %34 = arith.mulf %32, %33 : vector<16x64xf32>
    %35 = vector.broadcast %14 : vector<1x64xf32> to vector<16x64xf32>
    %36 = arith.addf %34, %35 : vector<16x64xf32>
    %c0_11 = arith.constant 0 : index
    %c0_12 = arith.constant 0 : index
    %c0_13 = arith.constant 0 : index
    %37 = vector.load %arg10[%c0_11, %c0_12, %c0_13] : memref<2x6x64xf32, #tpu.memory_space<vmem>>, vector<1x6x64xf32>
    %38 = vector.shape_cast %37 : vector<1x6x64xf32> to vector<6x64xf32>
    %39 = arith.truncf %36 : vector<16x64xf32> to vector<16x64xbf16>
    %c0_14 = arith.constant 0 : index
    %c0_15 = arith.constant 0 : index
    %c0_16 = arith.constant 0 : index
    %40 = vector.load %arg4[%c0_14, %c0_15, %c0_16] : memref<2x64x192xbf16, #tpu.memory_space<vmem>>, vector<1x64x192xbf16>
    %41 = vector.shape_cast %40 : vector<1x64x192xbf16> to vector<64x192xbf16>
    %cst_17 = arith.constant dense<0.000000e+00> : vector<16x192xf32>
    %42 = tpu.matmul %39, %41, %cst_17 {dimension_numbers = #tpu.dot_dimension_numbers<[1], [0], [0], [1], [0, 0, 1, 1], [], []>} : vector<16x64xbf16>, vector<64x192xbf16>, vector<16x192xf32> -> vector<16x192xf32>
    %c0_18 = arith.constant 0 : index
    %c0_19 = arith.constant 0 : index
    %c0_20 = arith.constant 0 : index
    %43 = vector.load %arg5[%c0_18, %c0_19, %c0_20] : memref<2x1x192xf32, #tpu.memory_space<vmem>>, vector<1x1x192xf32>
    %44 = vector.shape_cast %43 : vector<1x1x192xf32> to vector<1x192xf32>
    %45 = vector.broadcast %44 : vector<1x192xf32> to vector<16x192xf32>
    %46 = arith.addf %42, %45 : vector<16x192xf32>
    %47 = arith.truncf %46 : vector<16x192xf32> to vector<16x192xbf16>
    %48 = vector.extract_strided_slice %47 {offsets = [0, 0], sizes = [8, 192], strides = [1, 1]} : vector<16x192xbf16> to vector<8x192xbf16>
    %49 = vector.extract_strided_slice %48 {offsets = [0, 0], sizes = [8, 16], strides = [1, 1]} : vector<8x192xbf16> to vector<8x16xbf16>
    %50 = vector.extract_strided_slice %48 {offsets = [0, 64], sizes = [8, 16], strides = [1, 1]} : vector<8x192xbf16> to vector<8x16xbf16>
    %51 = vector.extract_strided_slice %48 {offsets = [0, 128], sizes = [8, 16], strides = [1, 1]} : vector<8x192xbf16> to vector<8x16xbf16>
    %cst_21 = arith.constant dense<0.000000e+00> : vector<8x8xf32>
    %52 = tpu.matmul %49, %50, %cst_21 {dimension_numbers = #tpu.dot_dimension_numbers<[1], [1], [0], [0], [0, 0, 1, 0], [], []>} : vector<8x16xbf16>, vector<8x16xbf16>, vector<8x8xf32> -> vector<8x8xf32>
    %53 = arith.addf %52, %8 : vector<8x8xf32>
    %cst_22 = arith.constant dense<0xFF800000> : vector<8xf32>
    %54 = vector.multi_reduction <maximumf>, %53, %cst_22 [1] : vector<8x8xf32> to vector<8xf32>
    %55 = vector.shape_cast %54 : vector<8xf32> to vector<8x1xf32>
    %56 = vector.broadcast %55 : vector<8x1xf32> to vector<8x8xf32>
    %57 = arith.subf %53, %56 : vector<8x8xf32>
    %58 = math.exp %57 : vector<8x8xf32>
    %cst_23 = arith.constant dense<0.000000e+00> : vector<8xf32>
    %59 = vector.multi_reduction <add>, %58, %cst_23 [1] : vector<8x8xf32> to vector<8xf32>
    %60 = vector.shape_cast %59 : vector<8xf32> to vector<8x1xf32>
    %61 = tpu.reciprocal %60 {approx = true} : vector<8x1xf32> -> vector<8x1xf32>
    %62 = vector.broadcast %61 : vector<8x1xf32> to vector<8x8xf32>
    %63 = arith.mulf %58, %62 : vector<8x8xf32>
    %64 = arith.truncf %63 : vector<8x8xf32> to vector<8x8xbf16>
    %cst_24 = arith.constant dense<0.000000e+00> : vector<8x16xf32>
    %65 = tpu.matmul %64, %51, %cst_24 {dimension_numbers = #tpu.dot_dimension_numbers<[1], [0], [0], [1], [0, 0, 1, 1], [], []>} : vector<8x8xbf16>, vector<8x16xbf16>, vector<8x16xf32> -> vector<8x16xf32>
    %c0_25 = arith.constant 0 : index
    %c0_26 = arith.constant 0 : index
    %66 = vector.load %arg14[%c0_25, %c0_26] : memref<16x64xf32, #tpu.memory_space<vmem>>, vector<8x16xf32>
    tpu.vector_store %arg14[%c0_25, %c0_26], %65 {strides = array<i32>} : memref<16x64xf32, #tpu.memory_space<vmem>>, vector<8x16xf32>,
    %67 = vector.extract_strided_slice %48 {offsets = [0, 16], sizes = [8, 16], strides = [1, 1]} : vector<8x192xbf16> to vector<8x16xbf16>
    %68 = vector.extract_strided_slice %48 {offsets = [0, 80], sizes = [8, 16], strides = [1, 1]} : vector<8x192xbf16> to vector<8x16xbf16>
    %69 = vector.extract_strided_slice %48 {offsets = [0, 144], sizes = [8, 16], strides = [1, 1]} : vector<8x192xbf16> to vector<8x16xbf16>
    %cst_27 = arith.constant dense<0.000000e+00> : vector<8x8xf32>
    %70 = tpu.matmul %67, %68, %cst_27 {dimension_numbers = #tpu.dot_dimension_numbers<[1], [1], [0], [0], [0, 0, 1, 0], [], []>} : vector<8x16xbf16>, vector<8x16xbf16>, vector<8x8xf32> -> vector<8x8xf32>
    %71 = arith.addf %70, %8 : vector<8x8xf32>
    %cst_28 = arith.constant dense<0xFF800000> : vector<8xf32>
    %72 = vector.multi_reduction <maximumf>, %71, %cst_28 [1] : vector<8x8xf32> to vector<8xf32>
    %73 = vector.shape_cast %72 : vector<8xf32> to vector<8x1xf32>
    %74 = vector.broadcast %73 : vector<8x1xf32> to vector<8x8xf32>
    %75 = arith.subf %71, %74 : vector<8x8xf32>
    %76 = math.exp %75 : vector<8x8xf32>
    %cst_29 = arith.constant dense<0.000000e+00> : vector<8xf32>
    %77 = vector.multi_reduction <add>, %76, %cst_29 [1] : vector<8x8xf32> to vector<8xf32>
    %78 = vector.shape_cast %77 : vector<8xf32> to vector<8x1xf32>
    %79 = tpu.reciprocal %78 {approx = true} : vector<8x1xf32> -> vector<8x1xf32>
    %80 = vector.broadcast %79 : vector<8x1xf32> to vector<8x8xf32>
    %81 = arith.mulf %76, %80 : vector<8x8xf32>
    %82 = arith.truncf %81 : vector<8x8xf32> to vector<8x8xbf16>
    %cst_30 = arith.constant dense<0.000000e+00> : vector<8x16xf32>
    %83 = tpu.matmul %82, %69, %cst_30 {dimension_numbers = #tpu.dot_dimension_numbers<[1], [0], [0], [1], [0, 0, 1, 1], [], []>} : vector<8x8xbf16>, vector<8x16xbf16>, vector<8x16xf32> -> vector<8x16xf32>
    %c0_31 = arith.constant 0 : index
    %c16 = arith.constant 16 : index
    %84 = vector.load %arg14[%c0_31, %c16] : memref<16x64xf32, #tpu.memory_space<vmem>>, vector<8x16xf32>
    tpu.vector_store %arg14[%c0_31, %c16], %83 {strides = array<i32>} : memref<16x64xf32, #tpu.memory_space<vmem>>, vector<8x16xf32>,
    %85 = vector.extract_strided_slice %48 {offsets = [0, 32], sizes = [8, 16], strides = [1, 1]} : vector<8x192xbf16> to vector<8x16xbf16>
    %86 = vector.extract_strided_slice %48 {offsets = [0, 96], sizes = [8, 16], strides = [1, 1]} : vector<8x192xbf16> to vector<8x16xbf16>
    %87 = vector.extract_strided_slice %48 {offsets = [0, 160], sizes = [8, 16], strides = [1, 1]} : vector<8x192xbf16> to vector<8x16xbf16>
    %cst_32 = arith.constant dense<0.000000e+00> : vector<8x8xf32>
    %88 = tpu.matmul %85, %86, %cst_32 {dimension_numbers = #tpu.dot_dimension_numbers<[1], [1], [0], [0], [0, 0, 1, 0], [], []>} : vector<8x16xbf16>, vector<8x16xbf16>, vector<8x8xf32> -> vector<8x8xf32>
    %89 = arith.addf %88, %8 : vector<8x8xf32>
    %cst_33 = arith.constant dense<0xFF800000> : vector<8xf32>
    %90 = vector.multi_reduction <maximumf>, %89, %cst_33 [1] : vector<8x8xf32> to vector<8xf32>
    %91 = vector.shape_cast %90 : vector<8xf32> to vector<8x1xf32>
    %92 = vector.broadcast %91 : vector<8x1xf32> to vector<8x8xf32>
    %93 = arith.subf %89, %92 : vector<8x8xf32>
    %94 = math.exp %93 : vector<8x8xf32>
    %cst_34 = arith.constant dense<0.000000e+00> : vector<8xf32>
    %95 = vector.multi_reduction <add>, %94, %cst_34 [1] : vector<8x8xf32> to vector<8xf32>
    %96 = vector.shape_cast %95 : vector<8xf32> to vector<8x1xf32>
    %97 = tpu.reciprocal %96 {approx = true} : vector<8x1xf32> -> vector<8x1xf32>
    %98 = vector.broadcast %97 : vector<8x1xf32> to vector<8x8xf32>
    %99 = arith.mulf %94, %98 : vector<8x8xf32>
    %100 = arith.truncf %99 : vector<8x8xf32> to vector<8x8xbf16>
    %cst_35 = arith.constant dense<0.000000e+00> : vector<8x16xf32>
    %101 = tpu.matmul %100, %87, %cst_35 {dimension_numbers = #tpu.dot_dimension_numbers<[1], [0], [0], [1], [0, 0, 1, 1], [], []>} : vector<8x8xbf16>, vector<8x16xbf16>, vector<8x16xf32> -> vector<8x16xf32>
    %c0_36 = arith.constant 0 : index
    %c32 = arith.constant 32 : index
    %102 = vector.load %arg14[%c0_36, %c32] : memref<16x64xf32, #tpu.memory_space<vmem>>, vector<8x16xf32>
    tpu.vector_store %arg14[%c0_36, %c32], %101 {strides = array<i32>} : memref<16x64xf32, #tpu.memory_space<vmem>>, vector<8x16xf32>,
    %103 = vector.extract_strided_slice %48 {offsets = [0, 48], sizes = [8, 16], strides = [1, 1]} : vector<8x192xbf16> to vector<8x16xbf16>
    %104 = vector.extract_strided_slice %48 {offsets = [0, 112], sizes = [8, 16], strides = [1, 1]} : vector<8x192xbf16> to vector<8x16xbf16>
    %105 = vector.extract_strided_slice %48 {offsets = [0, 176], sizes = [8, 16], strides = [1, 1]} : vector<8x192xbf16> to vector<8x16xbf16>
    %cst_37 = arith.constant dense<0.000000e+00> : vector<8x8xf32>
    %106 = tpu.matmul %103, %104, %cst_37 {dimension_numbers = #tpu.dot_dimension_numbers<[1], [1], [0], [0], [0, 0, 1, 0], [], []>} : vector<8x16xbf16>, vector<8x16xbf16>, vector<8x8xf32> -> vector<8x8xf32>
    %107 = arith.addf %106, %8 : vector<8x8xf32>
    %cst_38 = arith.constant dense<0xFF800000> : vector<8xf32>
    %108 = vector.multi_reduction <maximumf>, %107, %cst_38 [1] : vector<8x8xf32> to vector<8xf32>
    %109 = vector.shape_cast %108 : vector<8xf32> to vector<8x1xf32>
    %110 = vector.broadcast %109 : vector<8x1xf32> to vector<8x8xf32>
    %111 = arith.subf %107, %110 : vector<8x8xf32>
    %112 = math.exp %111 : vector<8x8xf32>
    %cst_39 = arith.constant dense<0.000000e+00> : vector<8xf32>
    %113 = vector.multi_reduction <add>, %112, %cst_39 [1] : vector<8x8xf32> to vector<8xf32>
    %114 = vector.shape_cast %113 : vector<8xf32> to vector<8x1xf32>
    %115 = tpu.reciprocal %114 {approx = true} : vector<8x1xf32> -> vector<8x1xf32>
    %116 = vector.broadcast %115 : vector<8x1xf32> to vector<8x8xf32>
    %117 = arith.mulf %112, %116 : vector<8x8xf32>
    %118 = arith.truncf %117 : vector<8x8xf32> to vector<8x8xbf16>
    %cst_40 = arith.constant dense<0.000000e+00> : vector<8x16xf32>
    %119 = tpu.matmul %118, %105, %cst_40 {dimension_numbers = #tpu.dot_dimension_numbers<[1], [0], [0], [1], [0, 0, 1, 1], [], []>} : vector<8x8xbf16>, vector<8x16xbf16>, vector<8x16xf32> -> vector<8x16xf32>
    %c0_41 = arith.constant 0 : index
    %c48 = arith.constant 48 : index
    %120 = vector.load %arg14[%c0_41, %c48] : memref<16x64xf32, #tpu.memory_space<vmem>>, vector<8x16xf32>
    tpu.vector_store %arg14[%c0_41, %c48], %119 {strides = array<i32>} : memref<16x64xf32, #tpu.memory_space<vmem>>, vector<8x16xf32>,
    %121 = vector.extract_strided_slice %47 {offsets = [8, 0], sizes = [8, 192], strides = [1, 1]} : vector<16x192xbf16> to vector<8x192xbf16>
    %122 = vector.extract_strided_slice %121 {offsets = [0, 0], sizes = [8, 16], strides = [1, 1]} : vector<8x192xbf16> to vector<8x16xbf16>
    %123 = vector.extract_strided_slice %121 {offsets = [0, 64], sizes = [8, 16], strides = [1, 1]} : vector<8x192xbf16> to vector<8x16xbf16>
    %124 = vector.extract_strided_slice %121 {offsets = [0, 128], sizes = [8, 16], strides = [1, 1]} : vector<8x192xbf16> to vector<8x16xbf16>
    %cst_42 = arith.constant dense<0.000000e+00> : vector<8x8xf32>
    %125 = tpu.matmul %122, %123, %cst_42 {dimension_numbers = #tpu.dot_dimension_numbers<[1], [1], [0], [0], [0, 0, 1, 0], [], []>} : vector<8x16xbf16>, vector<8x16xbf16>, vector<8x8xf32> -> vector<8x8xf32>
    %126 = arith.addf %125, %11 : vector<8x8xf32>
    %cst_43 = arith.constant dense<0xFF800000> : vector<8xf32>
    %127 = vector.multi_reduction <maximumf>, %126, %cst_43 [1] : vector<8x8xf32> to vector<8xf32>
    %128 = vector.shape_cast %127 : vector<8xf32> to vector<8x1xf32>
    %129 = vector.broadcast %128 : vector<8x1xf32> to vector<8x8xf32>
    %130 = arith.subf %126, %129 : vector<8x8xf32>
    %131 = math.exp %130 : vector<8x8xf32>
    %cst_44 = arith.constant dense<0.000000e+00> : vector<8xf32>
    %132 = vector.multi_reduction <add>, %131, %cst_44 [1] : vector<8x8xf32> to vector<8xf32>
    %133 = vector.shape_cast %132 : vector<8xf32> to vector<8x1xf32>
    %134 = tpu.reciprocal %133 {approx = true} : vector<8x1xf32> -> vector<8x1xf32>
    %135 = vector.broadcast %134 : vector<8x1xf32> to vector<8x8xf32>
    %136 = arith.mulf %131, %135 : vector<8x8xf32>
    %137 = arith.truncf %136 : vector<8x8xf32> to vector<8x8xbf16>
    %cst_45 = arith.constant dense<0.000000e+00> : vector<8x16xf32>
    %138 = tpu.matmul %137, %124, %cst_45 {dimension_numbers = #tpu.dot_dimension_numbers<[1], [0], [0], [1], [0, 0, 1, 1], [], []>} : vector<8x8xbf16>, vector<8x16xbf16>, vector<8x16xf32> -> vector<8x16xf32>
    %c8 = arith.constant 8 : index
    %c0_46 = arith.constant 0 : index
    %139 = vector.load %arg14[%c8, %c0_46] : memref<16x64xf32, #tpu.memory_space<vmem>>, vector<8x16xf32>
    tpu.vector_store %arg14[%c8, %c0_46], %138 {strides = array<i32>} : memref<16x64xf32, #tpu.memory_space<vmem>>, vector<8x16xf32>,
    %140 = vector.extract_strided_slice %121 {offsets = [0, 16], sizes = [8, 16], strides = [1, 1]} : vector<8x192xbf16> to vector<8x16xbf16>
    %141 = vector.extract_strided_slice %121 {offsets = [0, 80], sizes = [8, 16], strides = [1, 1]} : vector<8x192xbf16> to vector<8x16xbf16>
    %142 = vector.extract_strided_slice %121 {offsets = [0, 144], sizes = [8, 16], strides = [1, 1]} : vector<8x192xbf16> to vector<8x16xbf16>
    %cst_47 = arith.constant dense<0.000000e+00> : vector<8x8xf32>
    %143 = tpu.matmul %140, %141, %cst_47 {dimension_numbers = #tpu.dot_dimension_numbers<[1], [1], [0], [0], [0, 0, 1, 0], [], []>} : vector<8x16xbf16>, vector<8x16xbf16>, vector<8x8xf32> -> vector<8x8xf32>
    %144 = arith.addf %143, %11 : vector<8x8xf32>
    %cst_48 = arith.constant dense<0xFF800000> : vector<8xf32>
    %145 = vector.multi_reduction <maximumf>, %144, %cst_48 [1] : vector<8x8xf32> to vector<8xf32>
    %146 = vector.shape_cast %145 : vector<8xf32> to vector<8x1xf32>
    %147 = vector.broadcast %146 : vector<8x1xf32> to vector<8x8xf32>
    %148 = arith.subf %144, %147 : vector<8x8xf32>
    %149 = math.exp %148 : vector<8x8xf32>
    %cst_49 = arith.constant dense<0.000000e+00> : vector<8xf32>
    %150 = vector.multi_reduction <add>, %149, %cst_49 [1] : vector<8x8xf32> to vector<8xf32>
    %151 = vector.shape_cast %150 : vector<8xf32> to vector<8x1xf32>
    %152 = tpu.reciprocal %151 {approx = true} : vector<8x1xf32> -> vector<8x1xf32>
    %153 = vector.broadcast %152 : vector<8x1xf32> to vector<8x8xf32>
    %154 = arith.mulf %149, %153 : vector<8x8xf32>
    %155 = arith.truncf %154 : vector<8x8xf32> to vector<8x8xbf16>
    %cst_50 = arith.constant dense<0.000000e+00> : vector<8x16xf32>
    %156 = tpu.matmul %155, %142, %cst_50 {dimension_numbers = #tpu.dot_dimension_numbers<[1], [0], [0], [1], [0, 0, 1, 1], [], []>} : vector<8x8xbf16>, vector<8x16xbf16>, vector<8x16xf32> -> vector<8x16xf32>
    %c8_51 = arith.constant 8 : index
    %c16_52 = arith.constant 16 : index
    %157 = vector.load %arg14[%c8_51, %c16_52] : memref<16x64xf32, #tpu.memory_space<vmem>>, vector<8x16xf32>
    tpu.vector_store %arg14[%c8_51, %c16_52], %156 {strides = array<i32>} : memref<16x64xf32, #tpu.memory_space<vmem>>, vector<8x16xf32>,
    %158 = vector.extract_strided_slice %121 {offsets = [0, 32], sizes = [8, 16], strides = [1, 1]} : vector<8x192xbf16> to vector<8x16xbf16>
    %159 = vector.extract_strided_slice %121 {offsets = [0, 96], sizes = [8, 16], strides = [1, 1]} : vector<8x192xbf16> to vector<8x16xbf16>
    %160 = vector.extract_strided_slice %121 {offsets = [0, 160], sizes = [8, 16], strides = [1, 1]} : vector<8x192xbf16> to vector<8x16xbf16>
    %cst_53 = arith.constant dense<0.000000e+00> : vector<8x8xf32>
    %161 = tpu.matmul %158, %159, %cst_53 {dimension_numbers = #tpu.dot_dimension_numbers<[1], [1], [0], [0], [0, 0, 1, 0], [], []>} : vector<8x16xbf16>, vector<8x16xbf16>, vector<8x8xf32> -> vector<8x8xf32>
    %162 = arith.addf %161, %11 : vector<8x8xf32>
    %cst_54 = arith.constant dense<0xFF800000> : vector<8xf32>
    %163 = vector.multi_reduction <maximumf>, %162, %cst_54 [1] : vector<8x8xf32> to vector<8xf32>
    %164 = vector.shape_cast %163 : vector<8xf32> to vector<8x1xf32>
    %165 = vector.broadcast %164 : vector<8x1xf32> to vector<8x8xf32>
    %166 = arith.subf %162, %165 : vector<8x8xf32>
    %167 = math.exp %166 : vector<8x8xf32>
    %cst_55 = arith.constant dense<0.000000e+00> : vector<8xf32>
    %168 = vector.multi_reduction <add>, %167, %cst_55 [1] : vector<8x8xf32> to vector<8xf32>
    %169 = vector.shape_cast %168 : vector<8xf32> to vector<8x1xf32>
    %170 = tpu.reciprocal %169 {approx = true} : vector<8x1xf32> -> vector<8x1xf32>
    %171 = vector.broadcast %170 : vector<8x1xf32> to vector<8x8xf32>
    %172 = arith.mulf %167, %171 : vector<8x8xf32>
    %173 = arith.truncf %172 : vector<8x8xf32> to vector<8x8xbf16>
    %cst_56 = arith.constant dense<0.000000e+00> : vector<8x16xf32>
    %174 = tpu.matmul %173, %160, %cst_56 {dimension_numbers = #tpu.dot_dimension_numbers<[1], [0], [0], [1], [0, 0, 1, 1], [], []>} : vector<8x8xbf16>, vector<8x16xbf16>, vector<8x16xf32> -> vector<8x16xf32>
    %c8_57 = arith.constant 8 : index
    %c32_58 = arith.constant 32 : index
    %175 = vector.load %arg14[%c8_57, %c32_58] : memref<16x64xf32, #tpu.memory_space<vmem>>, vector<8x16xf32>
    tpu.vector_store %arg14[%c8_57, %c32_58], %174 {strides = array<i32>} : memref<16x64xf32, #tpu.memory_space<vmem>>, vector<8x16xf32>,
    %176 = vector.extract_strided_slice %121 {offsets = [0, 48], sizes = [8, 16], strides = [1, 1]} : vector<8x192xbf16> to vector<8x16xbf16>
    %177 = vector.extract_strided_slice %121 {offsets = [0, 112], sizes = [8, 16], strides = [1, 1]} : vector<8x192xbf16> to vector<8x16xbf16>
    %178 = vector.extract_strided_slice %121 {offsets = [0, 176], sizes = [8, 16], strides = [1, 1]} : vector<8x192xbf16> to vector<8x16xbf16>
    %cst_59 = arith.constant dense<0.000000e+00> : vector<8x8xf32>
    %179 = tpu.matmul %176, %177, %cst_59 {dimension_numbers = #tpu.dot_dimension_numbers<[1], [1], [0], [0], [0, 0, 1, 0], [], []>} : vector<8x16xbf16>, vector<8x16xbf16>, vector<8x8xf32> -> vector<8x8xf32>
    %180 = arith.addf %179, %11 : vector<8x8xf32>
    %cst_60 = arith.constant dense<0xFF800000> : vector<8xf32>
    %181 = vector.multi_reduction <maximumf>, %180, %cst_60 [1] : vector<8x8xf32> to vector<8xf32>
    %182 = vector.shape_cast %181 : vector<8xf32> to vector<8x1xf32>
    %183 = vector.broadcast %182 : vector<8x1xf32> to vector<8x8xf32>
    %184 = arith.subf %180, %183 : vector<8x8xf32>
    %185 = math.exp %184 : vector<8x8xf32>
    %cst_61 = arith.constant dense<0.000000e+00> : vector<8xf32>
    %186 = vector.multi_reduction <add>, %185, %cst_61 [1] : vector<8x8xf32> to vector<8xf32>
    %187 = vector.shape_cast %186 : vector<8xf32> to vector<8x1xf32>
    %188 = tpu.reciprocal %187 {approx = true} : vector<8x1xf32> -> vector<8x1xf32>
    %189 = vector.broadcast %188 : vector<8x1xf32> to vector<8x8xf32>
    %190 = arith.mulf %185, %189 : vector<8x8xf32>
    %191 = arith.truncf %190 : vector<8x8xf32> to vector<8x8xbf16>
    %cst_62 = arith.constant dense<0.000000e+00> : vector<8x16xf32>
    %192 = tpu.matmul %191, %178, %cst_62 {dimension_numbers = #tpu.dot_dimension_numbers<[1], [0], [0], [1], [0, 0, 1, 1], [], []>} : vector<8x8xbf16>, vector<8x16xbf16>, vector<8x16xf32> -> vector<8x16xf32>
    %c8_63 = arith.constant 8 : index
    %c48_64 = arith.constant 48 : index
    %193 = vector.load %arg14[%c8_63, %c48_64] : memref<16x64xf32, #tpu.memory_space<vmem>>, vector<8x16xf32>
    tpu.vector_store %arg14[%c8_63, %c48_64], %192 {strides = array<i32>} : memref<16x64xf32, #tpu.memory_space<vmem>>, vector<8x16xf32>,
    %c0_65 = arith.constant 0 : index
    %c0_66 = arith.constant 0 : index
    %194 = vector.load %arg14[%c0_65, %c0_66] : memref<16x64xf32, #tpu.memory_space<vmem>>, vector<16x64xf32>
    %195 = arith.truncf %194 : vector<16x64xf32> to vector<16x64xbf16>
    %c0_67 = arith.constant 0 : index
    %c0_68 = arith.constant 0 : index
    %c0_69 = arith.constant 0 : index
    %196 = vector.load %arg6[%c0_67, %c0_68, %c0_69] : memref<2x64x64xbf16, #tpu.memory_space<vmem>>, vector<1x64x64xbf16>
    %197 = vector.shape_cast %196 : vector<1x64x64xbf16> to vector<64x64xbf16>
    %cst_70 = arith.constant dense<0.000000e+00> : vector<16x64xf32>
    %198 = tpu.matmul %195, %197, %cst_70 {dimension_numbers = #tpu.dot_dimension_numbers<[1], [0], [0], [1], [0, 0, 1, 1], [], []>} : vector<16x64xbf16>, vector<64x64xbf16>, vector<16x64xf32> -> vector<16x64xf32>
    %199 = vector.extract_strided_slice %38 {offsets = [0, 0], sizes = [1, 64], strides = [1, 1]} : vector<6x64xf32> to vector<1x64xf32>
    %200 = vector.broadcast %199 : vector<1x64xf32> to vector<16x64xf32>
    %201 = arith.addf %198, %200 : vector<16x64xf32>
    %202 = arith.addf %36, %201 : vector<16x64xf32>
    %203 = vector.extract_strided_slice %38 {offsets = [1, 0], sizes = [1, 64], strides = [1, 1]} : vector<6x64xf32> to vector<1x64xf32>
    %204 = vector.extract_strided_slice %38 {offsets = [2, 0], sizes = [1, 64], strides = [1, 1]} : vector<6x64xf32> to vector<1x64xf32>
    %cst_71 = arith.constant dense<0.000000e+00> : vector<16xf32>
    %205 = vector.multi_reduction <add>, %202, %cst_71 [1] : vector<16x64xf32> to vector<16xf32>
    %206 = vector.shape_cast %205 : vector<16xf32> to vector<16x1xf32>
    %cst_72 = arith.constant 6.400000e+01 : f32
    %207 = vector.broadcast %cst_72 : f32 to vector<16x1xf32>
    %208 = arith.divf %206, %207 : vector<16x1xf32>
    %209 = vector.broadcast %208 : vector<16x1xf32> to vector<16x64xf32>
    %210 = arith.subf %202, %209 : vector<16x64xf32>
    %211 = arith.mulf %210, %210 : vector<16x64xf32>
    %cst_73 = arith.constant dense<0.000000e+00> : vector<16xf32>
    %212 = vector.multi_reduction <add>, %211, %cst_73 [1] : vector<16x64xf32> to vector<16xf32>
    %213 = vector.shape_cast %212 : vector<16xf32> to vector<16x1xf32>
    %cst_74 = arith.constant 6.400000e+01 : f32
    %214 = vector.broadcast %cst_74 : f32 to vector<16x1xf32>
    %215 = arith.divf %213, %214 : vector<16x1xf32>
    %216 = vector.broadcast %208 : vector<16x1xf32> to vector<16x64xf32>
    %217 = arith.subf %202, %216 : vector<16x64xf32>
    %cst_75 = arith.constant 9.99999996E-13 : f32
    %218 = vector.broadcast %cst_75 : f32 to vector<16x1xf32>
    %219 = arith.addf %215, %218 : vector<16x1xf32>
    %220 = math.rsqrt %219 : vector<16x1xf32>
    %221 = vector.broadcast %220 : vector<16x1xf32> to vector<16x64xf32>
    %222 = arith.mulf %217, %221 : vector<16x64xf32>
    %223 = vector.broadcast %203 : vector<1x64xf32> to vector<16x64xf32>
    %224 = arith.mulf %222, %223 : vector<16x64xf32>
    %225 = vector.broadcast %204 : vector<1x64xf32> to vector<16x64xf32>
    %226 = arith.addf %224, %225 : vector<16x64xf32>
    %227 = arith.truncf %226 : vector<16x64xf32> to vector<16x64xbf16>
    %c0_76 = arith.constant 0 : index
    %c0_77 = arith.constant 0 : index
    %c0_78 = arith.constant 0 : index
    %228 = vector.load %arg7[%c0_76, %c0_77, %c0_78] : memref<2x64x128xbf16, #tpu.memory_space<vmem>>, vector<1x64x128xbf16>
    %229 = vector.shape_cast %228 : vector<1x64x128xbf16> to vector<64x128xbf16>
    %cst_79 = arith.constant dense<0.000000e+00> : vector<16x128xf32>
    %230 = tpu.matmul %227, %229, %cst_79 {dimension_numbers = #tpu.dot_dimension_numbers<[1], [0], [0], [1], [0, 0, 1, 1], [], []>} : vector<16x64xbf16>, vector<64x128xbf16>, vector<16x128xf32> -> vector<16x128xf32>
    %c0_80 = arith.constant 0 : index
    %c0_81 = arith.constant 0 : index
    %c0_82 = arith.constant 0 : index
    %231 = vector.load %arg8[%c0_80, %c0_81, %c0_82] : memref<2x1x128xf32, #tpu.memory_space<vmem>>, vector<1x1x128xf32>
    %232 = vector.shape_cast %231 : vector<1x1x128xf32> to vector<1x128xf32>
    %233 = vector.broadcast %232 : vector<1x128xf32> to vector<16x128xf32>
    %234 = arith.addf %230, %233 : vector<16x128xf32>
    %235 = arith.mulf %234, %234 : vector<16x128xf32>
    %236 = arith.mulf %234, %235 : vector<16x128xf32>
    %cst_83 = arith.constant 4.471500e-02 : f32
    %237 = vector.broadcast %cst_83 : f32 to vector<16x128xf32>
    %238 = arith.mulf %237, %236 : vector<16x128xf32>
    %239 = arith.addf %234, %238 : vector<16x128xf32>
    %cst_84 = arith.constant 0.797884583 : f32
    %240 = vector.broadcast %cst_84 : f32 to vector<16x128xf32>
    %241 = arith.mulf %240, %239 : vector<16x128xf32>
    %242 = math.tanh %241 : vector<16x128xf32>
    %cst_85 = arith.constant 1.000000e+00 : f32
    %243 = vector.broadcast %cst_85 : f32 to vector<16x128xf32>
    %244 = arith.addf %243, %242 : vector<16x128xf32>
    %cst_86 = arith.constant 5.000000e-01 : f32
    %245 = vector.broadcast %cst_86 : f32 to vector<16x128xf32>
    %246 = arith.mulf %245, %244 : vector<16x128xf32>
    %247 = arith.mulf %234, %246 : vector<16x128xf32>
    %248 = arith.truncf %247 : vector<16x128xf32> to vector<16x128xbf16>
    %c0_87 = arith.constant 0 : index
    %c0_88 = arith.constant 0 : index
    %c0_89 = arith.constant 0 : index
    %249 = vector.load %arg9[%c0_87, %c0_88, %c0_89] : memref<2x128x64xbf16, #tpu.memory_space<vmem>>, vector<1x128x64xbf16>
    %250 = vector.shape_cast %249 : vector<1x128x64xbf16> to vector<128x64xbf16>
    %cst_90 = arith.constant dense<0.000000e+00> : vector<16x64xf32>
    %251 = tpu.matmul %248, %250, %cst_90 {dimension_numbers = #tpu.dot_dimension_numbers<[1], [0], [0], [1], [0, 0, 1, 1], [], []>} : vector<16x128xbf16>, vector<128x64xbf16>, vector<16x64xf32> -> vector<16x64xf32>
    %252 = vector.extract_strided_slice %38 {offsets = [3, 0], sizes = [1, 64], strides = [1, 1]} : vector<6x64xf32> to vector<1x64xf32>
    %253 = vector.broadcast %252 : vector<1x64xf32> to vector<16x64xf32>
    %254 = arith.addf %251, %253 : vector<16x64xf32>
    %255 = arith.addf %226, %254 : vector<16x64xf32>
    %256 = vector.extract_strided_slice %38 {offsets = [4, 0], sizes = [1, 64], strides = [1, 1]} : vector<6x64xf32> to vector<1x64xf32>
    %257 = vector.extract_strided_slice %38 {offsets = [5, 0], sizes = [1, 64], strides = [1, 1]} : vector<6x64xf32> to vector<1x64xf32>
    %cst_91 = arith.constant dense<0.000000e+00> : vector<16xf32>
    %258 = vector.multi_reduction <add>, %255, %cst_91 [1] : vector<16x64xf32> to vector<16xf32>
    %259 = vector.shape_cast %258 : vector<16xf32> to vector<16x1xf32>
    %cst_92 = arith.constant 6.400000e+01 : f32
    %260 = vector.broadcast %cst_92 : f32 to vector<16x1xf32>
    %261 = arith.divf %259, %260 : vector<16x1xf32>
    %262 = vector.broadcast %261 : vector<16x1xf32> to vector<16x64xf32>
    %263 = arith.subf %255, %262 : vector<16x64xf32>
    %264 = arith.mulf %263, %263 : vector<16x64xf32>
    %cst_93 = arith.constant dense<0.000000e+00> : vector<16xf32>
    %265 = vector.multi_reduction <add>, %264, %cst_93 [1] : vector<16x64xf32> to vector<16xf32>
    %266 = vector.shape_cast %265 : vector<16xf32> to vector<16x1xf32>
    %cst_94 = arith.constant 6.400000e+01 : f32
    %267 = vector.broadcast %cst_94 : f32 to vector<16x1xf32>
    %268 = arith.divf %266, %267 : vector<16x1xf32>
    %269 = vector.broadcast %261 : vector<16x1xf32> to vector<16x64xf32>
    %270 = arith.subf %255, %269 : vector<16x64xf32>
    %cst_95 = arith.constant 9.99999996E-13 : f32
    %271 = vector.broadcast %cst_95 : f32 to vector<16x1xf32>
    %272 = arith.addf %268, %271 : vector<16x1xf32>
    %273 = math.rsqrt %272 : vector<16x1xf32>
    %274 = vector.broadcast %273 : vector<16x1xf32> to vector<16x64xf32>
    %275 = arith.mulf %270, %274 : vector<16x64xf32>
    %276 = vector.broadcast %256 : vector<1x64xf32> to vector<16x64xf32>
    %277 = arith.mulf %275, %276 : vector<16x64xf32>
    %278 = vector.broadcast %257 : vector<1x64xf32> to vector<16x64xf32>
    %279 = arith.addf %277, %278 : vector<16x64xf32>
    %c1 = arith.constant 1 : index
    %c0_96 = arith.constant 0 : index
    %c0_97 = arith.constant 0 : index
    %280 = vector.load %arg10[%c1, %c0_96, %c0_97] : memref<2x6x64xf32, #tpu.memory_space<vmem>>, vector<1x6x64xf32>
    %281 = vector.shape_cast %280 : vector<1x6x64xf32> to vector<6x64xf32>
    %282 = arith.truncf %279 : vector<16x64xf32> to vector<16x64xbf16>
    %c1_98 = arith.constant 1 : index
    %c0_99 = arith.constant 0 : index
    %c0_100 = arith.constant 0 : index
    %283 = vector.load %arg4[%c1_98, %c0_99, %c0_100] : memref<2x64x192xbf16, #tpu.memory_space<vmem>>, vector<1x64x192xbf16>
    %284 = vector.shape_cast %283 : vector<1x64x192xbf16> to vector<64x192xbf16>
    %cst_101 = arith.constant dense<0.000000e+00> : vector<16x192xf32>
    %285 = tpu.matmul %282, %284, %cst_101 {dimension_numbers = #tpu.dot_dimension_numbers<[1], [0], [0], [1], [0, 0, 1, 1], [], []>} : vector<16x64xbf16>, vector<64x192xbf16>, vector<16x192xf32> -> vector<16x192xf32>
    %c1_102 = arith.constant 1 : index
    %c0_103 = arith.constant 0 : index
    %c0_104 = arith.constant 0 : index
    %286 = vector.load %arg5[%c1_102, %c0_103, %c0_104] : memref<2x1x192xf32, #tpu.memory_space<vmem>>, vector<1x1x192xf32>
    %287 = vector.shape_cast %286 : vector<1x1x192xf32> to vector<1x192xf32>
    %288 = vector.broadcast %287 : vector<1x192xf32> to vector<16x192xf32>
    %289 = arith.addf %285, %288 : vector<16x192xf32>
    %290 = arith.truncf %289 : vector<16x192xf32> to vector<16x192xbf16>
    %291 = vector.extract_strided_slice %290 {offsets = [0, 0], sizes = [8, 192], strides = [1, 1]} : vector<16x192xbf16> to vector<8x192xbf16>
    %292 = vector.extract_strided_slice %291 {offsets = [0, 0], sizes = [8, 16], strides = [1, 1]} : vector<8x192xbf16> to vector<8x16xbf16>
    %293 = vector.extract_strided_slice %291 {offsets = [0, 64], sizes = [8, 16], strides = [1, 1]} : vector<8x192xbf16> to vector<8x16xbf16>
    %294 = vector.extract_strided_slice %291 {offsets = [0, 128], sizes = [8, 16], strides = [1, 1]} : vector<8x192xbf16> to vector<8x16xbf16>
    %cst_105 = arith.constant dense<0.000000e+00> : vector<8x8xf32>
    %295 = tpu.matmul %292, %293, %cst_105 {dimension_numbers = #tpu.dot_dimension_numbers<[1], [1], [0], [0], [0, 0, 1, 0], [], []>} : vector<8x16xbf16>, vector<8x16xbf16>, vector<8x8xf32> -> vector<8x8xf32>
    %296 = arith.addf %295, %8 : vector<8x8xf32>
    %cst_106 = arith.constant dense<0xFF800000> : vector<8xf32>
    %297 = vector.multi_reduction <maximumf>, %296, %cst_106 [1] : vector<8x8xf32> to vector<8xf32>
    %298 = vector.shape_cast %297 : vector<8xf32> to vector<8x1xf32>
    %299 = vector.broadcast %298 : vector<8x1xf32> to vector<8x8xf32>
    %300 = arith.subf %296, %299 : vector<8x8xf32>
    %301 = math.exp %300 : vector<8x8xf32>
    %cst_107 = arith.constant dense<0.000000e+00> : vector<8xf32>
    %302 = vector.multi_reduction <add>, %301, %cst_107 [1] : vector<8x8xf32> to vector<8xf32>
    %303 = vector.shape_cast %302 : vector<8xf32> to vector<8x1xf32>
    %304 = tpu.reciprocal %303 {approx = true} : vector<8x1xf32> -> vector<8x1xf32>
    %305 = vector.broadcast %304 : vector<8x1xf32> to vector<8x8xf32>
    %306 = arith.mulf %301, %305 : vector<8x8xf32>
    %307 = arith.truncf %306 : vector<8x8xf32> to vector<8x8xbf16>
    %cst_108 = arith.constant dense<0.000000e+00> : vector<8x16xf32>
    %308 = tpu.matmul %307, %294, %cst_108 {dimension_numbers = #tpu.dot_dimension_numbers<[1], [0], [0], [1], [0, 0, 1, 1], [], []>} : vector<8x8xbf16>, vector<8x16xbf16>, vector<8x16xf32> -> vector<8x16xf32>
    %c0_109 = arith.constant 0 : index
    %c0_110 = arith.constant 0 : index
    %309 = vector.load %arg14[%c0_109, %c0_110] : memref<16x64xf32, #tpu.memory_space<vmem>>, vector<8x16xf32>
    tpu.vector_store %arg14[%c0_109, %c0_110], %308 {strides = array<i32>} : memref<16x64xf32, #tpu.memory_space<vmem>>, vector<8x16xf32>,
    %310 = vector.extract_strided_slice %291 {offsets = [0, 16], sizes = [8, 16], strides = [1, 1]} : vector<8x192xbf16> to vector<8x16xbf16>
    %311 = vector.extract_strided_slice %291 {offsets = [0, 80], sizes = [8, 16], strides = [1, 1]} : vector<8x192xbf16> to vector<8x16xbf16>
    %312 = vector.extract_strided_slice %291 {offsets = [0, 144], sizes = [8, 16], strides = [1, 1]} : vector<8x192xbf16> to vector<8x16xbf16>
    %cst_111 = arith.constant dense<0.000000e+00> : vector<8x8xf32>
    %313 = tpu.matmul %310, %311, %cst_111 {dimension_numbers = #tpu.dot_dimension_numbers<[1], [1], [0], [0], [0, 0, 1, 0], [], []>} : vector<8x16xbf16>, vector<8x16xbf16>, vector<8x8xf32> -> vector<8x8xf32>
    %314 = arith.addf %313, %8 : vector<8x8xf32>
    %cst_112 = arith.constant dense<0xFF800000> : vector<8xf32>
    %315 = vector.multi_reduction <maximumf>, %314, %cst_112 [1] : vector<8x8xf32> to vector<8xf32>
    %316 = vector.shape_cast %315 : vector<8xf32> to vector<8x1xf32>
    %317 = vector.broadcast %316 : vector<8x1xf32> to vector<8x8xf32>
    %318 = arith.subf %314, %317 : vector<8x8xf32>
    %319 = math.exp %318 : vector<8x8xf32>
    %cst_113 = arith.constant dense<0.000000e+00> : vector<8xf32>
    %320 = vector.multi_reduction <add>, %319, %cst_113 [1] : vector<8x8xf32> to vector<8xf32>
    %321 = vector.shape_cast %320 : vector<8xf32> to vector<8x1xf32>
    %322 = tpu.reciprocal %321 {approx = true} : vector<8x1xf32> -> vector<8x1xf32>
    %323 = vector.broadcast %322 : vector<8x1xf32> to vector<8x8xf32>
    %324 = arith.mulf %319, %323 : vector<8x8xf32>
    %325 = arith.truncf %324 : vector<8x8xf32> to vector<8x8xbf16>
    %cst_114 = arith.constant dense<0.000000e+00> : vector<8x16xf32>
    %326 = tpu.matmul %325, %312, %cst_114 {dimension_numbers = #tpu.dot_dimension_numbers<[1], [0], [0], [1], [0, 0, 1, 1], [], []>} : vector<8x8xbf16>, vector<8x16xbf16>, vector<8x16xf32> -> vector<8x16xf32>
    %c0_115 = arith.constant 0 : index
    %c16_116 = arith.constant 16 : index
    %327 = vector.load %arg14[%c0_115, %c16_116] : memref<16x64xf32, #tpu.memory_space<vmem>>, vector<8x16xf32>
    tpu.vector_store %arg14[%c0_115, %c16_116], %326 {strides = array<i32>} : memref<16x64xf32, #tpu.memory_space<vmem>>, vector<8x16xf32>,
    %328 = vector.extract_strided_slice %291 {offsets = [0, 32], sizes = [8, 16], strides = [1, 1]} : vector<8x192xbf16> to vector<8x16xbf16>
    %329 = vector.extract_strided_slice %291 {offsets = [0, 96], sizes = [8, 16], strides = [1, 1]} : vector<8x192xbf16> to vector<8x16xbf16>
    %330 = vector.extract_strided_slice %291 {offsets = [0, 160], sizes = [8, 16], strides = [1, 1]} : vector<8x192xbf16> to vector<8x16xbf16>
    %cst_117 = arith.constant dense<0.000000e+00> : vector<8x8xf32>
    %331 = tpu.matmul %328, %329, %cst_117 {dimension_numbers = #tpu.dot_dimension_numbers<[1], [1], [0], [0], [0, 0, 1, 0], [], []>} : vector<8x16xbf16>, vector<8x16xbf16>, vector<8x8xf32> -> vector<8x8xf32>
    %332 = arith.addf %331, %8 : vector<8x8xf32>
    %cst_118 = arith.constant dense<0xFF800000> : vector<8xf32>
    %333 = vector.multi_reduction <maximumf>, %332, %cst_118 [1] : vector<8x8xf32> to vector<8xf32>
    %334 = vector.shape_cast %333 : vector<8xf32> to vector<8x1xf32>
    %335 = vector.broadcast %334 : vector<8x1xf32> to vector<8x8xf32>
    %336 = arith.subf %332, %335 : vector<8x8xf32>
    %337 = math.exp %336 : vector<8x8xf32>
    %cst_119 = arith.constant dense<0.000000e+00> : vector<8xf32>
    %338 = vector.multi_reduction <add>, %337, %cst_119 [1] : vector<8x8xf32> to vector<8xf32>
    %339 = vector.shape_cast %338 : vector<8xf32> to vector<8x1xf32>
    %340 = tpu.reciprocal %339 {approx = true} : vector<8x1xf32> -> vector<8x1xf32>
    %341 = vector.broadcast %340 : vector<8x1xf32> to vector<8x8xf32>
    %342 = arith.mulf %337, %341 : vector<8x8xf32>
    %343 = arith.truncf %342 : vector<8x8xf32> to vector<8x8xbf16>
    %cst_120 = arith.constant dense<0.000000e+00> : vector<8x16xf32>
    %344 = tpu.matmul %343, %330, %cst_120 {dimension_numbers = #tpu.dot_dimension_numbers<[1], [0], [0], [1], [0, 0, 1, 1], [], []>} : vector<8x8xbf16>, vector<8x16xbf16>, vector<8x16xf32> -> vector<8x16xf32>
    %c0_121 = arith.constant 0 : index
    %c32_122 = arith.constant 32 : index
    %345 = vector.load %arg14[%c0_121, %c32_122] : memref<16x64xf32, #tpu.memory_space<vmem>>, vector<8x16xf32>
    tpu.vector_store %arg14[%c0_121, %c32_122], %344 {strides = array<i32>} : memref<16x64xf32, #tpu.memory_space<vmem>>, vector<8x16xf32>,
    %346 = vector.extract_strided_slice %291 {offsets = [0, 48], sizes = [8, 16], strides = [1, 1]} : vector<8x192xbf16> to vector<8x16xbf16>
    %347 = vector.extract_strided_slice %291 {offsets = [0, 112], sizes = [8, 16], strides = [1, 1]} : vector<8x192xbf16> to vector<8x16xbf16>
    %348 = vector.extract_strided_slice %291 {offsets = [0, 176], sizes = [8, 16], strides = [1, 1]} : vector<8x192xbf16> to vector<8x16xbf16>
    %cst_123 = arith.constant dense<0.000000e+00> : vector<8x8xf32>
    %349 = tpu.matmul %346, %347, %cst_123 {dimension_numbers = #tpu.dot_dimension_numbers<[1], [1], [0], [0], [0, 0, 1, 0], [], []>} : vector<8x16xbf16>, vector<8x16xbf16>, vector<8x8xf32> -> vector<8x8xf32>
    %350 = arith.addf %349, %8 : vector<8x8xf32>
    %cst_124 = arith.constant dense<0xFF800000> : vector<8xf32>
    %351 = vector.multi_reduction <maximumf>, %350, %cst_124 [1] : vector<8x8xf32> to vector<8xf32>
    %352 = vector.shape_cast %351 : vector<8xf32> to vector<8x1xf32>
    %353 = vector.broadcast %352 : vector<8x1xf32> to vector<8x8xf32>
    %354 = arith.subf %350, %353 : vector<8x8xf32>
    %355 = math.exp %354 : vector<8x8xf32>
    %cst_125 = arith.constant dense<0.000000e+00> : vector<8xf32>
    %356 = vector.multi_reduction <add>, %355, %cst_125 [1] : vector<8x8xf32> to vector<8xf32>
    %357 = vector.shape_cast %356 : vector<8xf32> to vector<8x1xf32>
    %358 = tpu.reciprocal %357 {approx = true} : vector<8x1xf32> -> vector<8x1xf32>
    %359 = vector.broadcast %358 : vector<8x1xf32> to vector<8x8xf32>
    %360 = arith.mulf %355, %359 : vector<8x8xf32>
    %361 = arith.truncf %360 : vector<8x8xf32> to vector<8x8xbf16>
    %cst_126 = arith.constant dense<0.000000e+00> : vector<8x16xf32>
    %362 = tpu.matmul %361, %348, %cst_126 {dimension_numbers = #tpu.dot_dimension_numbers<[1], [0], [0], [1], [0, 0, 1, 1], [], []>} : vector<8x8xbf16>, vector<8x16xbf16>, vector<8x16xf32> -> vector<8x16xf32>
    %c0_127 = arith.constant 0 : index
    %c48_128 = arith.constant 48 : index
    %363 = vector.load %arg14[%c0_127, %c48_128] : memref<16x64xf32, #tpu.memory_space<vmem>>, vector<8x16xf32>
    tpu.vector_store %arg14[%c0_127, %c48_128], %362 {strides = array<i32>} : memref<16x64xf32, #tpu.memory_space<vmem>>, vector<8x16xf32>,
    %364 = vector.extract_strided_slice %290 {offsets = [8, 0], sizes = [8, 192], strides = [1, 1]} : vector<16x192xbf16> to vector<8x192xbf16>
    %365 = vector.extract_strided_slice %364 {offsets = [0, 0], sizes = [8, 16], strides = [1, 1]} : vector<8x192xbf16> to vector<8x16xbf16>
    %366 = vector.extract_strided_slice %364 {offsets = [0, 64], sizes = [8, 16], strides = [1, 1]} : vector<8x192xbf16> to vector<8x16xbf16>
    %367 = vector.extract_strided_slice %364 {offsets = [0, 128], sizes = [8, 16], strides = [1, 1]} : vector<8x192xbf16> to vector<8x16xbf16>
    %cst_129 = arith.constant dense<0.000000e+00> : vector<8x8xf32>
    %368 = tpu.matmul %365, %366, %cst_129 {dimension_numbers = #tpu.dot_dimension_numbers<[1], [1], [0], [0], [0, 0, 1, 0], [], []>} : vector<8x16xbf16>, vector<8x16xbf16>, vector<8x8xf32> -> vector<8x8xf32>
    %369 = arith.addf %368, %11 : vector<8x8xf32>
    %cst_130 = arith.constant dense<0xFF800000> : vector<8xf32>
    %370 = vector.multi_reduction <maximumf>, %369, %cst_130 [1] : vector<8x8xf32> to vector<8xf32>
    %371 = vector.shape_cast %370 : vector<8xf32> to vector<8x1xf32>
    %372 = vector.broadcast %371 : vector<8x1xf32> to vector<8x8xf32>
    %373 = arith.subf %369, %372 : vector<8x8xf32>
    %374 = math.exp %373 : vector<8x8xf32>
    %cst_131 = arith.constant dense<0.000000e+00> : vector<8xf32>
    %375 = vector.multi_reduction <add>, %374, %cst_131 [1] : vector<8x8xf32> to vector<8xf32>
    %376 = vector.shape_cast %375 : vector<8xf32> to vector<8x1xf32>
    %377 = tpu.reciprocal %376 {approx = true} : vector<8x1xf32> -> vector<8x1xf32>
    %378 = vector.broadcast %377 : vector<8x1xf32> to vector<8x8xf32>
    %379 = arith.mulf %374, %378 : vector<8x8xf32>
    %380 = arith.truncf %379 : vector<8x8xf32> to vector<8x8xbf16>
    %cst_132 = arith.constant dense<0.000000e+00> : vector<8x16xf32>
    %381 = tpu.matmul %380, %367, %cst_132 {dimension_numbers = #tpu.dot_dimension_numbers<[1], [0], [0], [1], [0, 0, 1, 1], [], []>} : vector<8x8xbf16>, vector<8x16xbf16>, vector<8x16xf32> -> vector<8x16xf32>
    %c8_133 = arith.constant 8 : index
    %c0_134 = arith.constant 0 : index
    %382 = vector.load %arg14[%c8_133, %c0_134] : memref<16x64xf32, #tpu.memory_space<vmem>>, vector<8x16xf32>
    tpu.vector_store %arg14[%c8_133, %c0_134], %381 {strides = array<i32>} : memref<16x64xf32, #tpu.memory_space<vmem>>, vector<8x16xf32>,
    %383 = vector.extract_strided_slice %364 {offsets = [0, 16], sizes = [8, 16], strides = [1, 1]} : vector<8x192xbf16> to vector<8x16xbf16>
    %384 = vector.extract_strided_slice %364 {offsets = [0, 80], sizes = [8, 16], strides = [1, 1]} : vector<8x192xbf16> to vector<8x16xbf16>
    %385 = vector.extract_strided_slice %364 {offsets = [0, 144], sizes = [8, 16], strides = [1, 1]} : vector<8x192xbf16> to vector<8x16xbf16>
    %cst_135 = arith.constant dense<0.000000e+00> : vector<8x8xf32>
    %386 = tpu.matmul %383, %384, %cst_135 {dimension_numbers = #tpu.dot_dimension_numbers<[1], [1], [0], [0], [0, 0, 1, 0], [], []>} : vector<8x16xbf16>, vector<8x16xbf16>, vector<8x8xf32> -> vector<8x8xf32>
    %387 = arith.addf %386, %11 : vector<8x8xf32>
    %cst_136 = arith.constant dense<0xFF800000> : vector<8xf32>
    %388 = vector.multi_reduction <maximumf>, %387, %cst_136 [1] : vector<8x8xf32> to vector<8xf32>
    %389 = vector.shape_cast %388 : vector<8xf32> to vector<8x1xf32>
    %390 = vector.broadcast %389 : vector<8x1xf32> to vector<8x8xf32>
    %391 = arith.subf %387, %390 : vector<8x8xf32>
    %392 = math.exp %391 : vector<8x8xf32>
    %cst_137 = arith.constant dense<0.000000e+00> : vector<8xf32>
    %393 = vector.multi_reduction <add>, %392, %cst_137 [1] : vector<8x8xf32> to vector<8xf32>
    %394 = vector.shape_cast %393 : vector<8xf32> to vector<8x1xf32>
    %395 = tpu.reciprocal %394 {approx = true} : vector<8x1xf32> -> vector<8x1xf32>
    %396 = vector.broadcast %395 : vector<8x1xf32> to vector<8x8xf32>
    %397 = arith.mulf %392, %396 : vector<8x8xf32>
    %398 = arith.truncf %397 : vector<8x8xf32> to vector<8x8xbf16>
    %cst_138 = arith.constant dense<0.000000e+00> : vector<8x16xf32>
    %399 = tpu.matmul %398, %385, %cst_138 {dimension_numbers = #tpu.dot_dimension_numbers<[1], [0], [0], [1], [0, 0, 1, 1], [], []>} : vector<8x8xbf16>, vector<8x16xbf16>, vector<8x16xf32> -> vector<8x16xf32>
    %c8_139 = arith.constant 8 : index
    %c16_140 = arith.constant 16 : index
    %400 = vector.load %arg14[%c8_139, %c16_140] : memref<16x64xf32, #tpu.memory_space<vmem>>, vector<8x16xf32>
    tpu.vector_store %arg14[%c8_139, %c16_140], %399 {strides = array<i32>} : memref<16x64xf32, #tpu.memory_space<vmem>>, vector<8x16xf32>,
    %401 = vector.extract_strided_slice %364 {offsets = [0, 32], sizes = [8, 16], strides = [1, 1]} : vector<8x192xbf16> to vector<8x16xbf16>
    %402 = vector.extract_strided_slice %364 {offsets = [0, 96], sizes = [8, 16], strides = [1, 1]} : vector<8x192xbf16> to vector<8x16xbf16>
    %403 = vector.extract_strided_slice %364 {offsets = [0, 160], sizes = [8, 16], strides = [1, 1]} : vector<8x192xbf16> to vector<8x16xbf16>
    %cst_141 = arith.constant dense<0.000000e+00> : vector<8x8xf32>
    %404 = tpu.matmul %401, %402, %cst_141 {dimension_numbers = #tpu.dot_dimension_numbers<[1], [1], [0], [0], [0, 0, 1, 0], [], []>} : vector<8x16xbf16>, vector<8x16xbf16>, vector<8x8xf32> -> vector<8x8xf32>
    %405 = arith.addf %404, %11 : vector<8x8xf32>
    %cst_142 = arith.constant dense<0xFF800000> : vector<8xf32>
    %406 = vector.multi_reduction <maximumf>, %405, %cst_142 [1] : vector<8x8xf32> to vector<8xf32>
    %407 = vector.shape_cast %406 : vector<8xf32> to vector<8x1xf32>
    %408 = vector.broadcast %407 : vector<8x1xf32> to vector<8x8xf32>
    %409 = arith.subf %405, %408 : vector<8x8xf32>
    %410 = math.exp %409 : vector<8x8xf32>
    %cst_143 = arith.constant dense<0.000000e+00> : vector<8xf32>
    %411 = vector.multi_reduction <add>, %410, %cst_143 [1] : vector<8x8xf32> to vector<8xf32>
    %412 = vector.shape_cast %411 : vector<8xf32> to vector<8x1xf32>
    %413 = tpu.reciprocal %412 {approx = true} : vector<8x1xf32> -> vector<8x1xf32>
    %414 = vector.broadcast %413 : vector<8x1xf32> to vector<8x8xf32>
    %415 = arith.mulf %410, %414 : vector<8x8xf32>
    %416 = arith.truncf %415 : vector<8x8xf32> to vector<8x8xbf16>
    %cst_144 = arith.constant dense<0.000000e+00> : vector<8x16xf32>
    %417 = tpu.matmul %416, %403, %cst_144 {dimension_numbers = #tpu.dot_dimension_numbers<[1], [0], [0], [1], [0, 0, 1, 1], [], []>} : vector<8x8xbf16>, vector<8x16xbf16>, vector<8x16xf32> -> vector<8x16xf32>
    %c8_145 = arith.constant 8 : index
    %c32_146 = arith.constant 32 : index
    %418 = vector.load %arg14[%c8_145, %c32_146] : memref<16x64xf32, #tpu.memory_space<vmem>>, vector<8x16xf32>
    tpu.vector_store %arg14[%c8_145, %c32_146], %417 {strides = array<i32>} : memref<16x64xf32, #tpu.memory_space<vmem>>, vector<8x16xf32>,
    %419 = vector.extract_strided_slice %364 {offsets = [0, 48], sizes = [8, 16], strides = [1, 1]} : vector<8x192xbf16> to vector<8x16xbf16>
    %420 = vector.extract_strided_slice %364 {offsets = [0, 112], sizes = [8, 16], strides = [1, 1]} : vector<8x192xbf16> to vector<8x16xbf16>
    %421 = vector.extract_strided_slice %364 {offsets = [0, 176], sizes = [8, 16], strides = [1, 1]} : vector<8x192xbf16> to vector<8x16xbf16>
    %cst_147 = arith.constant dense<0.000000e+00> : vector<8x8xf32>
    %422 = tpu.matmul %419, %420, %cst_147 {dimension_numbers = #tpu.dot_dimension_numbers<[1], [1], [0], [0], [0, 0, 1, 0], [], []>} : vector<8x16xbf16>, vector<8x16xbf16>, vector<8x8xf32> -> vector<8x8xf32>
    %423 = arith.addf %422, %11 : vector<8x8xf32>
    %cst_148 = arith.constant dense<0xFF800000> : vector<8xf32>
    %424 = vector.multi_reduction <maximumf>, %423, %cst_148 [1] : vector<8x8xf32> to vector<8xf32>
    %425 = vector.shape_cast %424 : vector<8xf32> to vector<8x1xf32>
    %426 = vector.broadcast %425 : vector<8x1xf32> to vector<8x8xf32>
    %427 = arith.subf %423, %426 : vector<8x8xf32>
    %428 = math.exp %427 : vector<8x8xf32>
    %cst_149 = arith.constant dense<0.000000e+00> : vector<8xf32>
    %429 = vector.multi_reduction <add>, %428, %cst_149 [1] : vector<8x8xf32> to vector<8xf32>
    %430 = vector.shape_cast %429 : vector<8xf32> to vector<8x1xf32>
    %431 = tpu.reciprocal %430 {approx = true} : vector<8x1xf32> -> vector<8x1xf32>
    %432 = vector.broadcast %431 : vector<8x1xf32> to vector<8x8xf32>
    %433 = arith.mulf %428, %432 : vector<8x8xf32>
    %434 = arith.truncf %433 : vector<8x8xf32> to vector<8x8xbf16>
    %cst_150 = arith.constant dense<0.000000e+00> : vector<8x16xf32>
    %435 = tpu.matmul %434, %421, %cst_150 {dimension_numbers = #tpu.dot_dimension_numbers<[1], [0], [0], [1], [0, 0, 1, 1], [], []>} : vector<8x8xbf16>, vector<8x16xbf16>, vector<8x16xf32> -> vector<8x16xf32>
    %c8_151 = arith.constant 8 : index
    %c48_152 = arith.constant 48 : index
    %436 = vector.load %arg14[%c8_151, %c48_152] : memref<16x64xf32, #tpu.memory_space<vmem>>, vector<8x16xf32>
    tpu.vector_store %arg14[%c8_151, %c48_152], %435 {strides = array<i32>} : memref<16x64xf32, #tpu.memory_space<vmem>>, vector<8x16xf32>,
    %c0_153 = arith.constant 0 : index
    %c0_154 = arith.constant 0 : index
    %437 = vector.load %arg14[%c0_153, %c0_154] : memref<16x64xf32, #tpu.memory_space<vmem>>, vector<16x64xf32>
    %438 = arith.truncf %437 : vector<16x64xf32> to vector<16x64xbf16>
    %c1_155 = arith.constant 1 : index
    %c0_156 = arith.constant 0 : index
    %c0_157 = arith.constant 0 : index
    %439 = vector.load %arg6[%c1_155, %c0_156, %c0_157] : memref<2x64x64xbf16, #tpu.memory_space<vmem>>, vector<1x64x64xbf16>
    %440 = vector.shape_cast %439 : vector<1x64x64xbf16> to vector<64x64xbf16>
    %cst_158 = arith.constant dense<0.000000e+00> : vector<16x64xf32>
    %441 = tpu.matmul %438, %440, %cst_158 {dimension_numbers = #tpu.dot_dimension_numbers<[1], [0], [0], [1], [0, 0, 1, 1], [], []>} : vector<16x64xbf16>, vector<64x64xbf16>, vector<16x64xf32> -> vector<16x64xf32>
    %442 = vector.extract_strided_slice %281 {offsets = [0, 0], sizes = [1, 64], strides = [1, 1]} : vector<6x64xf32> to vector<1x64xf32>
    %443 = vector.broadcast %442 : vector<1x64xf32> to vector<16x64xf32>
    %444 = arith.addf %441, %443 : vector<16x64xf32>
    %445 = arith.addf %279, %444 : vector<16x64xf32>
    %446 = vector.extract_strided_slice %281 {offsets = [1, 0], sizes = [1, 64], strides = [1, 1]} : vector<6x64xf32> to vector<1x64xf32>
    %447 = vector.extract_strided_slice %281 {offsets = [2, 0], sizes = [1, 64], strides = [1, 1]} : vector<6x64xf32> to vector<1x64xf32>
    %cst_159 = arith.constant dense<0.000000e+00> : vector<16xf32>
    %448 = vector.multi_reduction <add>, %445, %cst_159 [1] : vector<16x64xf32> to vector<16xf32>
    %449 = vector.shape_cast %448 : vector<16xf32> to vector<16x1xf32>
    %cst_160 = arith.constant 6.400000e+01 : f32
    %450 = vector.broadcast %cst_160 : f32 to vector<16x1xf32>
    %451 = arith.divf %449, %450 : vector<16x1xf32>
    %452 = vector.broadcast %451 : vector<16x1xf32> to vector<16x64xf32>
    %453 = arith.subf %445, %452 : vector<16x64xf32>
    %454 = arith.mulf %453, %453 : vector<16x64xf32>
    %cst_161 = arith.constant dense<0.000000e+00> : vector<16xf32>
    %455 = vector.multi_reduction <add>, %454, %cst_161 [1] : vector<16x64xf32> to vector<16xf32>
    %456 = vector.shape_cast %455 : vector<16xf32> to vector<16x1xf32>
    %cst_162 = arith.constant 6.400000e+01 : f32
    %457 = vector.broadcast %cst_162 : f32 to vector<16x1xf32>
    %458 = arith.divf %456, %457 : vector<16x1xf32>
    %459 = vector.broadcast %451 : vector<16x1xf32> to vector<16x64xf32>
    %460 = arith.subf %445, %459 : vector<16x64xf32>
    %cst_163 = arith.constant 9.99999996E-13 : f32
    %461 = vector.broadcast %cst_163 : f32 to vector<16x1xf32>
    %462 = arith.addf %458, %461 : vector<16x1xf32>
    %463 = math.rsqrt %462 : vector<16x1xf32>
    %464 = vector.broadcast %463 : vector<16x1xf32> to vector<16x64xf32>
    %465 = arith.mulf %460, %464 : vector<16x64xf32>
    %466 = vector.broadcast %446 : vector<1x64xf32> to vector<16x64xf32>
    %467 = arith.mulf %465, %466 : vector<16x64xf32>
    %468 = vector.broadcast %447 : vector<1x64xf32> to vector<16x64xf32>
    %469 = arith.addf %467, %468 : vector<16x64xf32>
    %470 = arith.truncf %469 : vector<16x64xf32> to vector<16x64xbf16>
    %c1_164 = arith.constant 1 : index
    %c0_165 = arith.constant 0 : index
    %c0_166 = arith.constant 0 : index
    %471 = vector.load %arg7[%c1_164, %c0_165, %c0_166] : memref<2x64x128xbf16, #tpu.memory_space<vmem>>, vector<1x64x128xbf16>
    %472 = vector.shape_cast %471 : vector<1x64x128xbf16> to vector<64x128xbf16>
    %cst_167 = arith.constant dense<0.000000e+00> : vector<16x128xf32>
    %473 = tpu.matmul %470, %472, %cst_167 {dimension_numbers = #tpu.dot_dimension_numbers<[1], [0], [0], [1], [0, 0, 1, 1], [], []>} : vector<16x64xbf16>, vector<64x128xbf16>, vector<16x128xf32> -> vector<16x128xf32>
    %c1_168 = arith.constant 1 : index
    %c0_169 = arith.constant 0 : index
    %c0_170 = arith.constant 0 : index
    %474 = vector.load %arg8[%c1_168, %c0_169, %c0_170] : memref<2x1x128xf32, #tpu.memory_space<vmem>>, vector<1x1x128xf32>
    %475 = vector.shape_cast %474 : vector<1x1x128xf32> to vector<1x128xf32>
    %476 = vector.broadcast %475 : vector<1x128xf32> to vector<16x128xf32>
    %477 = arith.addf %473, %476 : vector<16x128xf32>
    %478 = arith.mulf %477, %477 : vector<16x128xf32>
    %479 = arith.mulf %477, %478 : vector<16x128xf32>
    %cst_171 = arith.constant 4.471500e-02 : f32
    %480 = vector.broadcast %cst_171 : f32 to vector<16x128xf32>
    %481 = arith.mulf %480, %479 : vector<16x128xf32>
    %482 = arith.addf %477, %481 : vector<16x128xf32>
    %cst_172 = arith.constant 0.797884583 : f32
    %483 = vector.broadcast %cst_172 : f32 to vector<16x128xf32>
    %484 = arith.mulf %483, %482 : vector<16x128xf32>
    %485 = math.tanh %484 : vector<16x128xf32>
    %cst_173 = arith.constant 1.000000e+00 : f32
    %486 = vector.broadcast %cst_173 : f32 to vector<16x128xf32>
    %487 = arith.addf %486, %485 : vector<16x128xf32>
    %cst_174 = arith.constant 5.000000e-01 : f32
    %488 = vector.broadcast %cst_174 : f32 to vector<16x128xf32>
    %489 = arith.mulf %488, %487 : vector<16x128xf32>
    %490 = arith.mulf %477, %489 : vector<16x128xf32>
    %491 = arith.truncf %490 : vector<16x128xf32> to vector<16x128xbf16>
    %c1_175 = arith.constant 1 : index
    %c0_176 = arith.constant 0 : index
    %c0_177 = arith.constant 0 : index
    %492 = vector.load %arg9[%c1_175, %c0_176, %c0_177] : memref<2x128x64xbf16, #tpu.memory_space<vmem>>, vector<1x128x64xbf16>
    %493 = vector.shape_cast %492 : vector<1x128x64xbf16> to vector<128x64xbf16>
    %cst_178 = arith.constant dense<0.000000e+00> : vector<16x64xf32>
    %494 = tpu.matmul %491, %493, %cst_178 {dimension_numbers = #tpu.dot_dimension_numbers<[1], [0], [0], [1], [0, 0, 1, 1], [], []>} : vector<16x128xbf16>, vector<128x64xbf16>, vector<16x64xf32> -> vector<16x64xf32>
    %495 = vector.extract_strided_slice %281 {offsets = [3, 0], sizes = [1, 64], strides = [1, 1]} : vector<6x64xf32> to vector<1x64xf32>
    %496 = vector.broadcast %495 : vector<1x64xf32> to vector<16x64xf32>
    %497 = arith.addf %494, %496 : vector<16x64xf32>
    %498 = arith.addf %469, %497 : vector<16x64xf32>
    %499 = vector.extract_strided_slice %281 {offsets = [4, 0], sizes = [1, 64], strides = [1, 1]} : vector<6x64xf32> to vector<1x64xf32>
    %500 = vector.extract_strided_slice %281 {offsets = [5, 0], sizes = [1, 64], strides = [1, 1]} : vector<6x64xf32> to vector<1x64xf32>
    %cst_179 = arith.constant dense<0.000000e+00> : vector<16xf32>
    %501 = vector.multi_reduction <add>, %498, %cst_179 [1] : vector<16x64xf32> to vector<16xf32>
    %502 = vector.shape_cast %501 : vector<16xf32> to vector<16x1xf32>
    %cst_180 = arith.constant 6.400000e+01 : f32
    %503 = vector.broadcast %cst_180 : f32 to vector<16x1xf32>
    %504 = arith.divf %502, %503 : vector<16x1xf32>
    %505 = vector.broadcast %504 : vector<16x1xf32> to vector<16x64xf32>
    %506 = arith.subf %498, %505 : vector<16x64xf32>
    %507 = arith.mulf %506, %506 : vector<16x64xf32>
    %cst_181 = arith.constant dense<0.000000e+00> : vector<16xf32>
    %508 = vector.multi_reduction <add>, %507, %cst_181 [1] : vector<16x64xf32> to vector<16xf32>
    %509 = vector.shape_cast %508 : vector<16xf32> to vector<16x1xf32>
    %cst_182 = arith.constant 6.400000e+01 : f32
    %510 = vector.broadcast %cst_182 : f32 to vector<16x1xf32>
    %511 = arith.divf %509, %510 : vector<16x1xf32>
    %512 = vector.broadcast %504 : vector<16x1xf32> to vector<16x64xf32>
    %513 = arith.subf %498, %512 : vector<16x64xf32>
    %cst_183 = arith.constant 9.99999996E-13 : f32
    %514 = vector.broadcast %cst_183 : f32 to vector<16x1xf32>
    %515 = arith.addf %511, %514 : vector<16x1xf32>
    %516 = math.rsqrt %515 : vector<16x1xf32>
    %517 = vector.broadcast %516 : vector<16x1xf32> to vector<16x64xf32>
    %518 = arith.mulf %513, %517 : vector<16x64xf32>
    %519 = vector.broadcast %499 : vector<1x64xf32> to vector<16x64xf32>
    %520 = arith.mulf %518, %519 : vector<16x64xf32>
    %521 = vector.broadcast %500 : vector<1x64xf32> to vector<16x64xf32>
    %522 = arith.addf %520, %521 : vector<16x64xf32>
    %523 = vector.extract_strided_slice %522 {offsets = [0, 0], sizes = [1, 64], strides = [1, 1]} : vector<16x64xf32> to vector<1x64xf32>
    %524 = vector.extract_strided_slice %522 {offsets = [8, 0], sizes = [1, 64], strides = [1, 1]} : vector<16x64xf32> to vector<1x64xf32>
    %525 = tpu.concatenate %523, %524 in 0 : vector<1x64xf32>, vector<1x64xf32> -> vector<2x64xf32>
    %526 = arith.truncf %525 : vector<2x64xf32> to vector<2x64xbf16>
    %c0_184 = arith.constant 0 : index
    %c0_185 = arith.constant 0 : index
    %527 = vector.load %arg11[%c0_184, %c0_185] : memref<64x128xbf16, #tpu.memory_space<vmem>>, vector<64x128xbf16>
    %cst_186 = arith.constant dense<0.000000e+00> : vector<2x128xf32>
    %528 = tpu.matmul %526, %527, %cst_186 {dimension_numbers = #tpu.dot_dimension_numbers<[1], [0], [0], [1], [0, 0, 1, 1], [], []>} : vector<2x64xbf16>, vector<64x128xbf16>, vector<2x128xf32> -> vector<2x128xf32>
    %c0_187 = arith.constant 0 : index
    %c0_188 = arith.constant 0 : index
    %529 = vector.load %arg12[%c0_187, %c0_188] : memref<1x128xf32, #tpu.memory_space<vmem>>, vector<1x128xf32>
    %530 = vector.broadcast %529 : vector<1x128xf32> to vector<2x128xf32>
    %531 = arith.addf %528, %530 : vector<2x128xf32>
    %c0_189 = arith.constant 0 : index
    %c0_190 = arith.constant 0 : index
    %532 = vector.load %arg13[%c0_189, %c0_190] : memref<2x128xf32, #tpu.memory_space<vmem>>, vector<2x128xf32>
    tpu.vector_store %arg13[%c0_189, %c0_190], %531 {strides = array<i32>} : memref<2x128xf32, #tpu.memory_space<vmem>>, vector<2x128xf32>,
    return
  }
  func.func @transform_0(%arg0: i32) -> (i32, i32) {
    %c0_i32 = arith.constant 0 : i32
    %c0_i32_0 = arith.constant 0 : i32
    %c0_i32_1 = arith.constant 0 : i32
    return %c0_i32, %c0_i32_0 : i32, i32
  }
  func.func @transform_1(%arg0: i32) -> (i32, i32) {
    %c0_i32 = arith.constant 0 : i32
    %c0_i32_0 = arith.constant 0 : i32
    %c0_i32_1 = arith.constant 0 : i32
    return %c0_i32, %c0_i32_0 : i32, i32
  }
  func.func @transform_2(%arg0: i32) -> (i32, i32) {
    %c0_i32 = arith.constant 0 : i32
    %c0_i32_0 = arith.constant 0 : i32
    %c0_i32_1 = arith.constant 0 : i32
    return %c0_i32, %c0_i32_0 : i32, i32
  }
  func.func @transform_3(%arg0: i32) -> (i32, i32, i32) {
    %c0_i32 = arith.constant 0 : i32
    %c0_i32_0 = arith.constant 0 : i32
    %c0_i32_1 = arith.constant 0 : i32
    %c0_i32_2 = arith.constant 0 : i32
    return %c0_i32, %c0_i32_0, %c0_i32_1 : i32, i32, i32
  }
  func.func @transform_4(%arg0: i32) -> (i32, i32, i32) {
    %c0_i32 = arith.constant 0 : i32
    %c0_i32_0 = arith.constant 0 : i32
    %c0_i32_1 = arith.constant 0 : i32
    %c0_i32_2 = arith.constant 0 : i32
    return %c0_i32, %c0_i32_0, %c0_i32_1 : i32, i32, i32
  }
  func.func @transform_5(%arg0: i32) -> (i32, i32, i32) {
    %c0_i32 = arith.constant 0 : i32
    %c0_i32_0 = arith.constant 0 : i32
    %c0_i32_1 = arith.constant 0 : i32
    %c0_i32_2 = arith.constant 0 : i32
    return %c0_i32, %c0_i32_0, %c0_i32_1 : i32, i32, i32
  }
  func.func @transform_6(%arg0: i32) -> (i32, i32, i32) {
    %c0_i32 = arith.constant 0 : i32
    %c0_i32_0 = arith.constant 0 : i32
    %c0_i32_1 = arith.constant 0 : i32
    %c0_i32_2 = arith.constant 0 : i32
    return %c0_i32, %c0_i32_0, %c0_i32_1 : i32, i32, i32
  }
  func.func @transform_7(%arg0: i32) -> (i32, i32, i32) {
    %c0_i32 = arith.constant 0 : i32
    %c0_i32_0 = arith.constant 0 : i32
    %c0_i32_1 = arith.constant 0 : i32
    %c0_i32_2 = arith.constant 0 : i32
    return %c0_i32, %c0_i32_0, %c0_i32_1 : i32, i32, i32
  }
  func.func @transform_8(%arg0: i32) -> (i32, i32, i32) {
    %c0_i32 = arith.constant 0 : i32
    %c0_i32_0 = arith.constant 0 : i32
    %c0_i32_1 = arith.constant 0 : i32
    %c0_i32_2 = arith.constant 0 : i32
    return %c0_i32, %c0_i32_0, %c0_i32_1 : i32, i32, i32
  }
  func.func @transform_9(%arg0: i32) -> (i32, i32, i32) {
    %c0_i32 = arith.constant 0 : i32
    %c0_i32_0 = arith.constant 0 : i32
    %c0_i32_1 = arith.constant 0 : i32
    %c0_i32_2 = arith.constant 0 : i32
    return %c0_i32, %c0_i32_0, %c0_i32_1 : i32, i32, i32
  }
  func.func @transform_10(%arg0: i32) -> (i32, i32) {
    %c0_i32 = arith.constant 0 : i32
    %c0_i32_0 = arith.constant 0 : i32
    %c0_i32_1 = arith.constant 0 : i32
    return %c0_i32, %c0_i32_0 : i32, i32
  }
  func.func @transform_11(%arg0: i32) -> (i32, i32) {
    %c0_i32 = arith.constant 0 : i32
    %c0_i32_0 = arith.constant 0 : i32
    %c0_i32_1 = arith.constant 0 : i32
    return %c0_i32, %c0_i32_0 : i32, i32
  }
  func.func @transform_12(%arg0: i32) -> (i32, i32) {
    %c0_i32 = arith.constant 0 : i32
    %c0_i32_0 = arith.constant 0 : i32
    %c0_i32_1 = arith.constant 0 : i32
    return %c0_i32, %c0_i32_0 : i32, i32
  }
}

</mosaic_0001>

<bundles_post_ra>
// kernel: tpu_custom_call.1
= control target key start
LH: loop header
LB: loop body
LE: loop exit
PB: predicated region body
PF: predicated region fallthrough
CT: control target
= control target key end

     0   :  { %17 = vsyncpa [#allocation4], 0  ;;  %s4659_s0 = inlined_call_operand.hbm [shape: f32[16,64], index: 0, kind: input, shape index: {}]   ;;  %s4660_s1 = inlined_call_operand.vmem [shape: f32[2,8], index: 1, kind: input, shape index: {}]   ;;  %s4661_s2 = inlined_call_operand.hbm [shape: f32[2,64], index: 2, kind: input, shape index: {}]   ;;  %s4662_s3 = inlined_call_operand.vmem [shape: bf16[2,64,192], index: 3, kind: input, shape index: {}]   ;;  %s4663_s4 = inlined_call_operand.vmem [shape: f32[2,1,192], index: 4, kind: input, shape index: {}]   ;;  %s4664_s5 = inlined_call_operand.vmem [shape: bf16[2,64,64], index: 5, kind: input, shape index: {}]   ;;  %s4665_s6 = inlined_call_operand.hbm [shape: bf16[2,64,128], index: 6, kind: input, shape index: {}]   ;;  %s4666_s7 = inlined_call_operand.vmem [shape: f32[2,1,128], index: 7, kind: input, shape index: {}]   ;;  %s4667_s8 = inlined_call_operand.vmem [shape: bf16[2,128,64], index: 8, kind: input, shape index: {}]   ;;  %s4668_s9 = inlined_call_operand.vmem [shape: f32[2,6,64], index: 9, kind: input, shape index: {}]   ;;  %s4669_s10 = inlined_call_operand.vmem [shape: bf16[64,128], index: 10, kind: input, shape index: {}]   ;;  %s4670_s11 = inlined_call_operand.vmem [shape: f32[1,128], index: 11, kind: input, shape index: {}]   ;;  %s4671_s12 = inlined_call_operand.hbm [shape: f32[2,128], index: 12, kind: output, shape index: {}]  }
   0x1   :  { %18 = vsyncpa [#allocation7], 0 }
   0x2   :  { %19 = vsyncpa [#allocation5], 0  ;;  %s3831_s21 = smov [#allocation6]   ;;  %s3832_s23 = smov [#allocation3]  }
   0x3   :  { %s40_s22 = sshll.u32 %s3831_s21, 4  ;;  %s25_s24 = sshll.u32 %s3832_s23, 4  ;;  %s41_s22 = int_to_ptr.vmem [resolvable:$true] %s40_s22  ;;  %s3913_s24 = int_to_ptr.vmem [resolvable:$true] %s25_s24 }
   0x4   :  { %s3737_s27 = scalar_lea.hbm %s4661_s2, 32 }
   0x5   :  { %p3738_p0 = scmp.ne.s32.totalorder %s4661_s2, %s3737_s27  ;;  %p3741_p1 = scmp.lt.u32.totalorder %s3737_s27, %s4661_s2 }
   0x7   :  { %p3743_p2 = pnand %p3741_p1, %p3738_p0 }
   0x9   :  { %3746 = shalt.err (!%p3743_p2)
}
   0xa   :  { %s3747_s14 = scalar_lea.vmem %s41_s22, 32  ;;  %p3752_p4 = scmp.lt.s32.totalorder %s41_s22, %s41_s22 }
   0xb   :  { %p3748_p3 = scmp.ne.s32.totalorder %s41_s22, %s3747_s14  ;;  %p3753_p5 = scmp.lt.s32.totalorder %s3747_s14, %s3747_s14 }
   0xd   :  { %p3754_p6 = por %p3753_p5, %p3752_p4 }
   0xf   :  { %p3755_p7 = pnand %p3754_p6, %p3748_p3 }
  0x11   :  { %3758 = shalt.err (!%p3755_p7)
}
  0x12   :  { %43 = dma.hbm_to_vmem [thread:$0]  %s4661_s2, 32, %s41_s22, [#allocation7]  }
  0x13   :  { %s3759_s19 = scalar_lea.hbm %s4659_s0, 256 }
  0x14   :  { %p3760_p8 = scmp.ne.s32.totalorder %s4659_s0, %s3759_s19  ;;  %p3763_p9 = scmp.lt.u32.totalorder %s3759_s19, %s4659_s0 }
  0x16   :  { %p3765_p10 = pnand %p3763_p9, %p3760_p8 }
  0x18   :  { %3768 = shalt.err (!%p3765_p10)
}
  0x19   :  { %s3769_s26 = scalar_lea.vmem %s3913_s24, 256  ;;  %p3774_p12 = scmp.lt.s32.totalorder %s3913_s24, %s3913_s24 }
  0x1a   :  { %p3770_p11 = scmp.ne.s32.totalorder %s3913_s24, %s3769_s26  ;;  %p3775_p13 = scmp.lt.s32.totalorder %s3769_s26, %s3769_s26 }
  0x1c   :  { %p3776_p0 = por %p3775_p13, %p3774_p12 }
  0x1e   :  { %p3777_p1 = pnand %p3776_p0, %p3770_p11 }
  0x20   :  { %3780 = shalt.err (!%p3777_p1)
}
  0x21   :  { %s3833_s2 = smov 128   ;;  %s3834_s22 = smov 8  }
  0x22   :  { %31 = dma.hbm_to_vmem [thread:$0]  %s4659_s0, 256, %s3913_s24, [#allocation4], %s3833_s2, %s3833_s2, %s3834_s22  }
  0x23   :  { %s3835_s29 = smov [#allocation8]   ;;  %s3781_s15 = scalar_lea.hbm %s4665_s6, 1024 }
  0x24   :  { %s55_s30 = sshll.u32 %s3835_s29, 4  ;;  %p3782_p2 = scmp.ne.s32.totalorder %s4665_s6, %s3781_s15  ;;  %s56_s30 = int_to_ptr.vmem [resolvable:$true] %s55_s30 }
  0x25   :  { %p3785_p3 = scmp.lt.u32.totalorder %s3781_s15, %s4665_s6 }
  0x27   :  { %p3787_p4 = pnand %p3785_p3, %p3782_p2 }
  0x29   :  { %3790 = shalt.err (!%p3787_p4)
}
  0x2a   :  { %s3791_s20 = scalar_lea.vmem %s56_s30, 1024  ;;  %p3796_p6 = scmp.lt.s32.totalorder %s56_s30, %s56_s30 }
  0x2b   :  { %p3792_p5 = scmp.ne.s32.totalorder %s56_s30, %s3791_s20  ;;  %p3797_p7 = scmp.lt.s32.totalorder %s3791_s20, %s3791_s20 }
  0x2d   :  { %p3798_p8 = por %p3797_p7, %p3796_p6 }
  0x2f   :  { %p3799_p9 = pnand %p3798_p8, %p3792_p5 }
  0x31   :  { %3802 = shalt.err (!%p3799_p9)
}
  0x32   :  { %s3836_s0 = smov 64   ;;  %s3837_s24 = smov 4  }
  0x33   :  { %61 = dma.hbm_to_vmem [thread:$0]  %s4665_s6, 1024, %s56_s30, [#allocation7], %s3836_s0, %s3836_s0, %s3837_s24  }
  0x34   :  { %3825 = dma.done.wait [#allocation4], 256  }
  0x35   :  { %3826 = vsyncadd [#allocation4], 4294967040 }
  0x36   :  { %3827 = dma.done.wait [#allocation7], 1056  }
  0x37   :  { %3828 = vsyncadd [#allocation7], 4294966240  ;;  %vm96_vm0 = vcmask 523264   ;;  %v82_v0 = vld [vmem:[#allocation3] sm:$0xff]  ;;  %v83_v1 = vld [vmem:[#allocation3 + $0x8] sm:$0xff]  ;;  %v3838_v18 = vmov 0   ;;  %v87_v27 = vlaneseq }
  0x38   :  { %v97_v2 = vsel %vm96_vm0, %v82_v0, 0.0  ;;  %v100_v3 = vsel %vm96_vm0, %v83_v1, 0.0  ;;  %v3585_v14 = vld [vmem:[%s4662_s3 + $0x4] ss:$8 sps:$4 sm:$0xff]   ;;  %v3587_v15 = vld [vmem:[%s4662_s3] ss:$8 sps:$4 sm:$0xff]   ;;  %233 = vmatprep.mubr.bf16.mxu0 %v3838_v18 }
  0x39   :  { %98 = vadd.xlane.f32.xlu0 %v97_v2  ;;  %v3588_v16 = vld [vmem:[%s4662_s3 + $0x14] ss:$8 sps:$4 sm:$0xff]   ;;  %201 = vmatprep.subr.bf16.mxu0 %v3585_v14  ;;  %v3590_v17 = vld [vmem:[%s4662_s3 + $0x10] ss:$8 sps:$4 sm:$0xff]   ;;  %v3591_v19 = vld [vmem:[%s4662_s3 + $0x24] ss:$8 sps:$4 sm:$0xff]  }
  0x3a   :  { %202 = vmatpush1.bf16.msra.mxu0 %v3587_v15  ;;  %v3593_v20 = vld [vmem:[%s4662_s3 + $0x20] ss:$8 sps:$4 sm:$0xff]   ;;  %v3594_v21 = vld [vmem:[%s4662_s3 + $0x34] ss:$8 sps:$4 sm:$0xff]   ;;  %v3596_v22 = vld [vmem:[%s4662_s3 + $0x30] ss:$8 sps:$4 sm:$0xff]  }
  0x3b   :  { %203 = vmatprep.subr.bf16.mxu0 %v3588_v16  ;;  %v3987_v30 = vshrl.u32 %v87_v27, 7  ;;  %v95_v32 = vld [vmem:[#allocation6] sm:$0x3]  ;;  %v3839_v45 = vmov 0.0   ;;  %vm3840_vm1 = vmmov 0   ;;  %s3841_s21 = smov 112  }
  0x3c   :  { %3276 = vmatprep.subr.bf16.mxu1 %v3839_v45  ;;  %v146_v46 = vld [vmem:[%s4663_s4] sm:$0x3]  ;;  %3278 = vmatprep.mubr.msk.bf16.mxu1 %vm3840_vm1, %v3839_v45  ;;  %s3842_s23 = smov 96   ;;  %s3843_s6 = smov 80   ;;  %vm249_vm2 = vcmask 130048   ;;  %vm312_vm3 = vcmask 1043456  }
  0x3d   :  { %101 = vadd.xlane.f32.xlu0 %v100_v3  ;;  %v3990_v31 = vsub.s32 0, %v3987_v30  ;;  %v3993_v34 = vsub.s32 1, %v3987_v30  ;;  %s3844_s25 = smov 48   ;;  %s3845_s26 = smov 32   ;;  %v84_v63 = vld [vmem:[%s4660_s1] sm:$0x3] }
  0x3e   :  { %204 = vmatpush1.bf16.msra.mxu0 %v3590_v17  ;;  %s3846_s2 = smov 16   ;;  %vm296_vm4 = vcmask 64512   ;;  %vm472_vm5 = vcmask 261248   ;;  %vm588_vm6 = vcmask 392448   ;;  %vm704_vm7 = vcmask 523648  }
  0x3f   :  { %205 = vmatprep.subr.bf16.mxu0 %v3591_v19  ;;  %v127_v36 = vrot.slane %v95_v32, %v3990_v31  ;;  %v133_v40 = vrot.slane %v95_v32, %v3993_v34  ;;  %v151_v47 = vrot.slane %v146_v46, %v3990_v31  ;;  %v155_v49 = vrot.slane %v146_v46, %v3993_v34 }
  0x40   :  { %vm2938_vm8 = vcmask 1040384  }
  0x42   :  { %206 = vmatpush1.bf16.msra.mxu0 %v3593_v20 }
  0x43   :  { %207 = vmatprep.subr.bf16.mxu0 %v3594_v21 }
  0x46   :  { %208 = vmatpush1.bf16.msra.mxu0 %v3596_v22 }
  0x47   :  { %3300 = vmatprep.subr.bf16.mxu0 %v3839_v45 }
  0xc6   :  { %v99_v4 = vpop.xlane.xlu0 %98 }
  0xc7   :  { %v104_v5 = vmul.f32 0.015625, %v99_v4 }
  0xc9   :  { %v106_v6 = vsub.f32 %v82_v0, %v104_v5  ;;  %v85_v0 = vsub.f32 1.0, %v84_v63 }
  0xca   :  { %v102_v7 = vpop.xlane.xlu0 %101 }
  0xcb   :  { %v105_v8 = vmul.f32 0.015625, %v102_v7  ;;  %v108_v9 = vmul.f32 %v106_v6, %v106_v6 }
  0xcd   :  { %v107_v10 = vsub.f32 %v83_v1, %v105_v8  ;;  %v110_v11 = vsel %vm96_vm0, %v108_v9, 0.0  ;;  %v4040_v1 = vmul.f32 -1e+09, %v85_v0 }
  0xce   :  { %111 = vadd.xlane.f32.xlu1 %v110_v11 }
  0xcf   :  { %v109_v12 = vmul.f32 %v107_v10, %v107_v10  ;;  %v4044_v2 = vrot.slane %v4040_v1, %v3990_v31 }
  0xd1   :  { %v113_v13 = vsel %vm96_vm0, %v109_v12, 0.0 }
  0xd2   :  { %114 = vadd.xlane.f32.xlu1 %v113_v13 }
 0x15b   :  { %v112_v23 = vpop.xlane.xlu1 %111 }
 0x15c   :  { %v116_v24 = vmul.f32 0.015625, %v112_v23 }
 0x15e   :  { %v118_v25 = vadd.f32 1e-12, %v116_v24 }
 0x15f   :  { %v115_v26 = vpop.xlane.xlu1 %114 }
 0x160   :  { %3645 = vrsqrt.f32 %v118_v25  ;;  %v117_v28 = vmul.f32 0.015625, %v115_v26 }
 0x162   :  { %v119_v29 = vadd.f32 1e-12, %v117_v28 }
 0x164   :  { %3647 = vrsqrt.f32 %v119_v29 }
 0x16a   :  { %v3646_v33 = vpop.eup %3645 }
 0x16b   :  { %v122_v35 = vmul.f32 %v3646_v33, %v106_v6 }
 0x16d   :  { %v128_v39 = vmul.f32 %v127_v36, %v122_v35 }
 0x16e   :  { %v3648_v37 = vpop.eup %3647 }
 0x16f   :  { %v123_v38 = vmul.f32 %v3648_v37, %v107_v10  ;;  %v3997_v42 = vadd.f32 %v133_v40, %v128_v39 }
 0x171   :  { %v129_v41 = vmul.f32 %v127_v36, %v123_v38 }
 0x173   :  { %v3999_v43 = vadd.f32 %v133_v40, %v129_v41 }
 0x175   :  { %v137_v44 = vpack.c.bf16 %v3999_v43, %v3997_v42 }
 0x177   :  { %3048 = vmatmul.mubr.msk.bf16.vlgmr.msra.gmra.mrb[0].mxu0 %vm96_vm0, %v137_v44 }
 0x178   :  { %3302 = vmatprep.mubr.msk.bf16.mxu0 %vm3840_vm1, %v3839_v45 }
 0x24a   :  { %v235_v48 = vpop.f32.mrb[0].mxu0 }
 0x24b   :  { %v237_v50 = vpop.f32.mrb[1].mxu0  ;;  %v236_v52 = vadd.f32 %v235_v48, %v151_v47 }
 0x24c   :  { %v239_v51 = vpop.f32.mrb[2].mxu0  ;;  %v238_v55 = vadd.f32 %v237_v50, %v155_v49 }
 0x24d   :  { %v240_v53 = vadd.f32 %v239_v51, %v151_v47  ;;  %v241_v54 = vpop.f32.mrb[3].mxu0 }
 0x24e   :  { %v242_v56 = vadd.f32 %v241_v54, %v155_v49 }
 0x24f   :  { %v244_v57 = vpack.c.bf16 %v240_v53, %v236_v52 }
 0x250   :  { %v4015_v58 = vpack.c.bf16 %v242_v56, %v238_v55 }
 0x251   :  { %247 = vrot.lane.b32.xlu0 %v244_v57, %s3836_s0  ;;  %v4021_v59 = vrot.slane %v244_v57, 4 }
 0x252   :  { %v314_v62 = vsel %vm312_vm3, %v4015_v58, 0 }
 0x255   :  { %357 = vrot.lane.b32.xlu0 %v244_v57, %s3841_s21 }
 0x259   :  { %474 = vrot.lane.b32.xlu0 %v244_v57, %s3842_s23 }
 0x25d   :  { %590 = vrot.lane.b32.xlu0 %v244_v57, %s3843_s6 }
 0x261   :  { %817 = vrot.lane.b32.xlu0 %v4021_v59, %s3844_s25 }
 0x265   :  { %932 = vrot.lane.b32.xlu0 %v4021_v59, %s3845_s26 }
 0x269   :  { %1047 = vrot.lane.b32.xlu0 %v4021_v59, %s3846_s2 }
 0x2c3   :  { %v248_v60 = vpop.permute.xlu0 %247 }
 0x2c4   :  { %v254_v61 = vsel %vm249_vm2, %v248_v60, 0 }
 0x2c5   :  { %3277 = vmatpush3.bf16.xpose.msra.mxu1 %v254_v61 }
 0x2c6   :  { %3282 = vmatprep.subr.bf16.mxu1 %v3839_v45 }
 0x2c7   :  { %v358_v19 = vpop.permute.xlu0 %357 }
 0x2cb   :  { %v475_v24 = vpop.permute.xlu0 %474 }
 0x2cc   :  { %3279 = vmatmul.mubr.msk.bf16.vlgmr.msra.gmra.mrb[0].mxu1 %vm249_vm2, %v244_v57 }
 0x2cd   :  { %3283 = vmatpush3.bf16.msra.mxu1 %v314_v62  ;;  %3284 = vmatprep.mubr.msk.bf16.mxu1 %vm3840_vm1, %v3839_v45 }
 0x2ce   :  { %3288 = vmatprep.subr.bf16.mxu1 %v3839_v45 }
 0x2cf   :  { %v591_v28 = vpop.permute.xlu0 %590 }
 0x2d3   :  { %v818_v32 = vpop.permute.xlu0 %817 }
 0x2d4   :  { %v823_v33 = vsel %vm249_vm2, %v818_v32, 0 }
 0x2d7   :  { %v933_v35 = vpop.permute.xlu0 %932 }
 0x2d8   :  { %v938_v37 = vsel %vm249_vm2, %v933_v35, 0 }
 0x2db   :  { %v1048_v38 = vpop.permute.xlu0 %1047 }
 0x2dc   :  { %v1053_v40 = vsel %vm249_vm2, %v1048_v38, 0 }
 0x39f   :  { %v290_v3 = vpop.f32.mrb[0].mxu1 }
 0x3a0   :  { %v291_v4 = vadd.f32 %v290_v3, %v4044_v2  ;;  %v3280_v5 = vpop.f32.mrb[1].mxu1 }
 0x3a1   :  { %v293_v6 = vpop.f32.mrb[2].mxu1  ;;  %v4107_v5 = vrot.slane %v4040_v1, %v3993_v34 }
 0x3a2   :  { %v3281_v7 = vpop.f32.mrb[3].mxu1  ;;  %v297_v8 = vsel %vm296_vm4, %v291_v4, -inf }
 0x3a3   :  { %298 = vmax.xlane.f32.xlu1 %v297_v8 }
 0x430   :  { %v299_v9 = vpop.xlane.xlu1 %298 }
 0x431   :  { %v300_v10 = vsub.f32 %v291_v4, %v299_v9 }
 0x433   :  { %v301_v11 = vmul.f32 1.442695, %v300_v10 }
 0x435   :  { %3649 = vpow2.f32 %v301_v11 }
 0x43f   :  { %v3650_v12 = vpop.eup %3649 }
 0x440   :  { %v303_v13 = vsel %vm296_vm4, %v3650_v12, 0.0 }
 0x441   :  { %304 = vadd.xlane.f32.xlu1 %v303_v13 }
 0x452   :  { %359 = vrot.lane.b32.xlu1 %v244_v57, %s3844_s25 }
 0x456   :  { %476 = vrot.lane.b32.xlu1 %v244_v57, %s3845_s26 }
 0x45a   :  { %592 = vrot.lane.b32.xlu1 %v244_v57, %s3846_s2 }
 0x45e   :  { %707 = vrot.lane.b32.xlu1 %v4021_v59, %s3836_s0 }
 0x462   :  { %815 = vrot.lane.b32.xlu1 %v4021_v59, %s3841_s21 }
 0x466   :  { %930 = vrot.lane.b32.xlu1 %v4021_v59, %s3842_s23 }
 0x46a   :  { %1045 = vrot.lane.b32.xlu1 %v4021_v59, %s3843_s6 }
 0x4ce   :  { %v305_v14 = vpop.xlane.xlu1 %304 }
 0x4cf   :  { %3651 = vrcp.f32 %v305_v14 }
 0x4d2   :  { %v360_v15 = vpop.permute.xlu1 %359 }
 0x4d3   :  { %v365_v25 = vsel %vm249_vm2, %v360_v15, 0 }
 0x4d6   :  { %v477_v16 = vpop.permute.xlu1 %476 }
 0x4d7   :  { %v482_v17 = vsel %vm249_vm2, %v477_v16, 0 }
 0x4d8   :  { %3301 = vmatpush3.bf16.xpose.msra.mxu0 %v482_v17 }
 0x4d9   :  { %v3652_v20 = vpop.eup %3651  ;;  %3312 = vmatprep.subr.bf16.mxu0 %v3839_v45 }
 0x4da   :  { %v307_v21 = vmul.f32 %v3652_v20, %v3650_v12  ;;  %v593_v22 = vpop.permute.xlu1 %592 }
 0x4db   :  { %v598_v26 = vsel %vm249_vm2, %v593_v22, 0 }
 0x4dc   :  { %v308_v23 = vpack.c.bf16 %v307_v21, %v307_v21 }
 0x4de   :  { %3285 = vmatmul.mubr.msk.bf16.vlgmr.msra.gmra.mrb[4].mxu1 %vm296_vm4, %v308_v23  ;;  %v708_v27 = vpop.permute.xlu1 %707 }
 0x4df   :  { %3289 = vmatpush3.bf16.xpose.msra.mxu1 %v365_v25  ;;  %3303 = vmatmul.mubr.msk.bf16.vlgmr.msra.gmra.mrb[4].mxu0 %vm249_vm2, %v475_v24  ;;  %v713_v29 = vsel %vm249_vm2, %v708_v27, 0 }
 0x4e0   :  { %3313 = vmatpush3.bf16.xpose.msra.mxu0 %v598_v26  ;;  %3290 = vmatprep.mubr.msk.bf16.mxu1 %vm3840_vm1, %v3839_v45 }
 0x4e1   :  { %3314 = vmatprep.mubr.msk.bf16.mxu0 %vm3840_vm1, %v3839_v45  ;;  %3324 = vmatprep.subr.bf16.mxu0 %v3839_v45 }
 0x4e2   :  { %3294 = vmatprep.subr.bf16.mxu1 %v3839_v45  ;;  %v816_v36 = vpop.permute.xlu1 %815 }
 0x4e6   :  { %3291 = vmatmul.mubr.msk.bf16.vlgmr.msra.gmra.mrb[8].mxu1 %vm249_vm2, %v358_v19  ;;  %v931_v39 = vpop.permute.xlu1 %930 }
 0x4e7   :  { %3315 = vmatmul.mubr.msk.bf16.vlgmr.msra.gmra.mrb[8].mxu0 %vm249_vm2, %v591_v28  ;;  %3296 = vmatprep.mubr.msk.bf16.mxu1 %vm3840_vm1, %v3839_v45 }
 0x4e8   :  { %3325 = vmatpush3.bf16.xpose.msra.mxu0 %v713_v29  ;;  %3326 = vmatprep.mubr.msk.bf16.mxu0 %vm3840_vm1, %v3839_v45 }
 0x4e9   :  { %3336 = vmatprep.subr.bf16.mxu0 %v3839_v45 }
 0x4ea   :  { %v1046_v41 = vpop.permute.xlu1 %1045 }
 0x4ef   :  { %3327 = vmatmul.mubr.msk.bf16.vlgmr.msra.gmra.mrb[12].mxu0 %vm249_vm2, %v4021_v59 }
 0x4f0   :  { %3337 = vmatpush3.bf16.xpose.msra.mxu0 %v823_v33  ;;  %3338 = vmatprep.mubr.msk.bf16.mxu0 %vm3840_vm1, %v3839_v45 }
 0x4f1   :  { %3348 = vmatprep.subr.bf16.mxu0 %v3839_v45 }
 0x4f7   :  { %3339 = vmatmul.mubr.msk.bf16.vlgmr.msra.gmra.mrb[16].mxu0 %vm249_vm2, %v816_v36 }
 0x4f8   :  { %3349 = vmatpush3.bf16.xpose.msra.mxu0 %v938_v37  ;;  %3350 = vmatprep.mubr.msk.bf16.mxu0 %vm3840_vm1, %v3839_v45 }
 0x4f9   :  { %3360 = vmatprep.subr.bf16.mxu0 %v3839_v45 }
 0x4ff   :  { %3351 = vmatmul.mubr.msk.bf16.vlgmr.msra.gmra.mrb[20].mxu0 %vm249_vm2, %v931_v39 }
 0x500   :  { %3361 = vmatpush3.bf16.xpose.msra.mxu0 %v1053_v40  ;;  %3362 = vmatprep.mubr.msk.bf16.mxu0 %vm3840_vm1, %v3839_v45 }
 0x501   :  { %3372 = vmatprep.subr.bf16.mxu0 %v3839_v45 }
 0x507   :  { %3363 = vmatmul.mubr.msk.bf16.vlgmr.msra.gmra.mrb[24].mxu0 %vm249_vm2, %v1046_v41 }
 0x508   :  { %3380 = vmatprep.mubr.msk.bf16.mxu0 %vm3840_vm1, %v3839_v45 }
 0x5b1   :  { %v350_v44 = vpop.f32.mrb[4].mxu1 }
 0x5b2   :  { %356 = vst.msk [vmem:[#allocation2] sm:$0xff] %vm249_vm2, %v350_v44  ;;  %v3286_v46 = vpop.f32.mrb[5].mxu1  ;;  %v518_v47 = vpop.f32.mrb[4].mxu0 }
 0x5b3   :  { %v519_v48 = vadd.f32 %v518_v47, %v4044_v2  ;;  %v353_v49 = vpop.f32.mrb[6].mxu1  ;;  %v3304_v50 = vpop.f32.mrb[5].mxu0 }
 0x5b4   :  { %v3287_v51 = vpop.f32.mrb[7].mxu1  ;;  %v521_v52 = vpop.f32.mrb[6].mxu0 }
 0x5b5   :  { %v3305_v53 = vpop.f32.mrb[7].mxu0  ;;  %v524_v54 = vsel %vm296_vm4, %v519_v48, -inf }
 0x5b6   :  { %525 = vmax.xlane.f32.xlu1 %v524_v54 }
 0x5b9   :  { %v401_v55 = vpop.f32.mrb[8].mxu1 }
 0x5ba   :  { %v402_v56 = vadd.f32 %v401_v55, %v4044_v2  ;;  %v3292_v57 = vpop.f32.mrb[9].mxu1  ;;  %v634_v59 = vpop.f32.mrb[8].mxu0 }
 0x5bb   :  { %v404_v60 = vpop.f32.mrb[10].mxu1  ;;  %v3316_v61 = vpop.f32.mrb[9].mxu0  ;;  %v635_v62 = vadd.f32 %v634_v59, %v4044_v2 }
 0x5bc   :  { %v3293_v63 = vpop.f32.mrb[11].mxu1  ;;  %v637_v0 = vpop.f32.mrb[10].mxu0  ;;  %v407_v3 = vsel %vm296_vm4, %v402_v56, -inf }
 0x5bd   :  { %v3317_v4 = vpop.f32.mrb[11].mxu0  ;;  %408 = vmax.xlane.f32.xlu0 %v407_v3  ;;  %v640_v6 = vsel %vm296_vm4, %v635_v62, -inf }
 0x5c1   :  { %641 = vmax.xlane.f32.xlu0 %v640_v6 }
 0x5c2   :  { %v749_v7 = vpop.f32.mrb[12].mxu0 }
 0x5c3   :  { %v750_v8 = vadd.f32 %v749_v7, %v4107_v5  ;;  %v3328_v9 = vpop.f32.mrb[13].mxu0 }
 0x5c4   :  { %v752_v10 = vpop.f32.mrb[14].mxu0 }
 0x5c5   :  { %v3329_v11 = vpop.f32.mrb[15].mxu0  ;;  %v755_v12 = vsel %vm296_vm4, %v750_v8, -inf }
 0x5c6   :  { %756 = vmax.xlane.f32.xlu0 %v755_v12  ;;  %v767_v12 = vrot.slane %v4015_v58, 4 }
 0x5ca   :  { %v859_v13 = vpop.f32.mrb[16].mxu0 }
 0x5cb   :  { %v860_v14 = vadd.f32 %v859_v13, %v4107_v5  ;;  %v3340_v15 = vpop.f32.mrb[17].mxu0 }
 0x5cc   :  { %v862_v16 = vpop.f32.mrb[18].mxu0 }
 0x5cd   :  { %v3341_v17 = vpop.f32.mrb[19].mxu0  ;;  %v865_v1 = vsel %vm296_vm4, %v860_v14, -inf }
 0x5ce   :  { %866 = vmax.xlane.f32.xlu0 %v865_v1 }
 0x5d2   :  { %v974_v19 = vpop.f32.mrb[20].mxu0 }
 0x5d3   :  { %v975_v20 = vadd.f32 %v974_v19, %v4107_v5  ;;  %v3352_v21 = vpop.f32.mrb[21].mxu0 }
 0x5d4   :  { %v977_v22 = vpop.f32.mrb[22].mxu0 }
 0x5d5   :  { %v3353_v23 = vpop.f32.mrb[23].mxu0  ;;  %v980_v24 = vsel %vm296_vm4, %v975_v20, -inf }
 0x5d6   :  { %981 = vmax.xlane.f32.xlu1 %v980_v24 }
 0x5da   :  { %v1089_v25 = vpop.f32.mrb[24].mxu0 }
 0x5db   :  { %v1090_v26 = vadd.f32 %v1089_v25, %v4107_v5  ;;  %v3364_v27 = vpop.f32.mrb[25].mxu0 }
 0x5dc   :  { %v1092_v28 = vpop.f32.mrb[26].mxu0 }
 0x5dd   :  { %v3365_v29 = vpop.f32.mrb[27].mxu0  ;;  %v1095_v32 = vsel %vm296_vm4, %v1090_v26, -inf }
 0x5de   :  { %1096 = vmax.xlane.f32.xlu0 %v1095_v32 }
 0x643   :  { %v526_v33 = vpop.xlane.xlu1 %525 }
 0x644   :  { %v527_v35 = vsub.f32 %v519_v48, %v526_v33 }
 0x646   :  { %v528_v36 = vmul.f32 1.442695, %v527_v35 }
 0x648   :  { %3653 = vpow2.f32 %v528_v36  ;;  %v772_v36 = vsel %vm312_vm3, %v767_v12, 0 }
 0x64a   :  { %v409_v37 = vpop.xlane.xlu0 %408 }
 0x64b   :  { %v410_v38 = vsub.f32 %v402_v56, %v409_v37 }
 0x64d   :  { %v411_v41 = vmul.f32 1.442695, %v410_v38 }
 0x64e   :  { %v642_v39 = vpop.xlane.xlu0 %641 }
 0x64f   :  { %v643_v40 = vsub.f32 %v635_v62, %v642_v39 }
 0x651   :  { %v644_v44 = vmul.f32 1.442695, %v643_v40 }
 0x652   :  { %v4118_v46 = vpop.eup %3653 }
 0x653   :  { %3655 = vpow2.f32 %v644_v44  ;;  %v757_v47 = vpop.xlane.xlu0 %756  ;;  %v530_v49 = vsel %vm296_vm4, %v4118_v46, 0.0 }
 0x654   :  { %v758_v50 = vsub.f32 %v750_v8, %v757_v47  ;;  %531 = vadd.xlane.f32.xlu0 %v530_v49  ;;  %3657 = vpow2.f32 %v411_v41 }
 0x656   :  { %v759_v51 = vmul.f32 1.442695, %v758_v50 }
 0x658   :  { %3659 = vpow2.f32 %v759_v51 }
 0x65b   :  { %v867_v48 = vpop.xlane.xlu0 %866 }
 0x65c   :  { %v868_v52 = vsub.f32 %v860_v14, %v867_v48 }
 0x65d   :  { %v4122_v53 = vpop.eup %3655 }
 0x65e   :  { %v869_v54 = vmul.f32 1.442695, %v868_v52  ;;  %v646_v55 = vsel %vm296_vm4, %v4122_v53, 0.0  ;;  %v3658_v56 = vpop.eup %3657 }
 0x65f   :  { %647 = vadd.xlane.f32.xlu1 %v646_v55  ;;  %v413_v59 = vsel %vm296_vm4, %v3658_v56, 0.0 }
 0x660   :  { %3661 = vpow2.f32 %v869_v54 }
 0x662   :  { %v4126_v57 = vpop.eup %3659 }
 0x663   :  { %414 = vadd.xlane.f32.xlu1 %v413_v59  ;;  %v761_v60 = vsel %vm296_vm4, %v4126_v57, 0.0  ;;  %v982_v63 = vpop.xlane.xlu1 %981 }
 0x664   :  { %762 = vadd.xlane.f32.xlu0 %v761_v60  ;;  %v983_v0 = vsub.f32 %v975_v20, %v982_v63 }
 0x666   :  { %v984_v3 = vmul.f32 1.442695, %v983_v0 }
 0x668   :  { %3663 = vpow2.f32 %v984_v3 }
 0x66a   :  { %v4131_v61 = vpop.eup %3661 }
 0x66b   :  { %v871_v62 = vsel %vm296_vm4, %v4131_v61, 0.0  ;;  %v1097_v4 = vpop.xlane.xlu0 %1096 }
 0x66c   :  { %872 = vadd.xlane.f32.xlu0 %v871_v62  ;;  %v1098_v6 = vsub.f32 %v1090_v26, %v1097_v4 }
 0x66e   :  { %v1099_v7 = vmul.f32 1.442695, %v1098_v6 }
 0x670   :  { %3665 = vpow2.f32 %v1099_v7 }
 0x672   :  { %v4141_v8 = vpop.eup %3663 }
 0x673   :  { %v986_v9 = vsel %vm296_vm4, %v4141_v8, 0.0 }
 0x674   :  { %420 = vrot.lane.b32.xlu1 %v4015_v58, %s3841_s21 }
 0x67a   :  { %v4145_v10 = vpop.eup %3665 }
 0x67b   :  { %v1101_v11 = vsel %vm296_vm4, %v4145_v10, 0.0 }
 0x682   :  { %536 = vrot.lane.b32.xlu0 %v4015_v58, %s3842_s23 }
 0x686   :  { %652 = vrot.lane.b32.xlu0 %v4015_v58, %s3843_s6 }
 0x698   :  { %987 = vadd.xlane.f32.xlu1 %v986_v9 }
 0x6a5   :  { %1102 = vadd.xlane.f32.xlu0 %v1101_v11 }
 0x6a9   :  { %877 = vrot.lane.b32.xlu1 %v767_v12, %s3841_s21 }
 0x6ad   :  { %1107 = vrot.lane.b32.xlu1 %v767_v12, %s3843_s6 }
 0x6bb   :  { %992 = vrot.lane.b32.xlu0 %v767_v12, %s3842_s23 }
 0x6e1   :  { %v532_v15 = vpop.xlane.xlu0 %531 }
 0x6ec   :  { %v648_v13 = vpop.xlane.xlu1 %647 }
 0x6f0   :  { %v415_v14 = vpop.xlane.xlu1 %414 }
 0x6f1   :  { %3667 = vrcp.f32 %v415_v14  ;;  %v763_v17 = vpop.xlane.xlu0 %762 }
 0x6f2   :  { %3669 = vrcp.f32 %v532_v15 }
 0x6f3   :  { %3671 = vrcp.f32 %v648_v13 }
 0x6f4   :  { %v421_v16 = vpop.permute.xlu1 %420  ;;  %3673 = vrcp.f32 %v763_v17  ;;  %v3597_v17 = vld [vmem:[%s4664_s5] sm:$0xff]  }
 0x6f5   :  { %v426_v1 = vsel %vm312_vm3, %v421_v16, 0  ;;  %3373 = vmatpush3.bf16.msra.mxu0 %v3597_v17 }
 0x6f6   :  { %3295 = vmatpush3.bf16.msra.mxu1 %v426_v1  ;;  %3374 = vmatprep.subr.bf16.mxu0 %v3839_v45 }
 0x6f7   :  { %3306 = vmatprep.subr.bf16.mxu1 %v3839_v45 }
 0x6f9   :  { %v873_v19 = vpop.xlane.xlu0 %872 }
 0x6fa   :  { %3675 = vrcp.f32 %v873_v19 }
 0x6fb   :  { %v3668_v58 = vpop.eup %3667 }
 0x6fc   :  { %v417_v20 = vmul.f32 %v3668_v58, %v3658_v56  ;;  %v3670_v24 = vpop.eup %3669  ;;  %v3598_v58 = vld [vmem:[%s4664_s5 + $0x8] sm:$0xff]  }
 0x6fd   :  { %v537_v21 = vpop.permute.xlu0 %536  ;;  %v534_v25 = vmul.f32 %v3670_v24, %v4118_v46  ;;  %v3672_v28 = vpop.eup %3671  ;;  %3375 = vmatpush3.bf16.msra.mxu0 %v3598_v58 }
 0x6fe   :  { %v542_v22 = vsel %vm312_vm3, %v537_v21, 0  ;;  %v418_v23 = vpack.c.bf16 %v417_v20, %v417_v20  ;;  %v650_v32 = vmul.f32 %v3672_v28, %v4122_v53  ;;  %v3674_v35 = vpop.eup %3673  ;;  %3376 = vmatprep.subr.bf16.mxu0 %v3839_v45  ;;  %v3599_v20 = vld [vmem:[%s4664_s5 + $0x10] sm:$0xff]   ;;  %v3600_v21 = vld [vmem:[%s4664_s5 + $0x18] sm:$0xff]  }
 0x6ff   :  { %v535_v27 = vpack.c.bf16 %v534_v25, %v534_v25  ;;  %v765_v37 = vmul.f32 %v3674_v35, %v4126_v57 }
 0x700   :  { %3297 = vmatmul.mubr.msk.bf16.vlgmr.msra.gmra.mrb[12].mxu1 %vm296_vm4, %v418_v23  ;;  %v651_v33 = vpack.c.bf16 %v650_v32, %v650_v32 }
 0x701   :  { %3307 = vmatpush3.bf16.msra.mxu1 %v542_v22  ;;  %3308 = vmatprep.mubr.msk.bf16.mxu1 %vm3840_vm1, %v3839_v45  ;;  %v653_v26 = vpop.permute.xlu0 %652  ;;  %v766_v38 = vpack.c.bf16 %v765_v37, %v765_v37 }
 0x702   :  { %3318 = vmatprep.subr.bf16.mxu1 %v3839_v45  ;;  %v658_v29 = vsel %vm312_vm3, %v653_v26, 0  ;;  %3377 = vmatpush3.bf16.msra.mxu0 %v3599_v20 }
 0x703   :  { %3378 = vmatprep.subr.bf16.mxu0 %v3839_v45 }
 0x704   :  { %v3676_v39 = vpop.eup %3675 }
 0x705   :  { %v875_v41 = vmul.f32 %v3676_v39, %v4131_v61 }
 0x706   :  { %3379 = vmatpush3.bf16.msra.mxu0 %v3600_v21 }
 0x707   :  { %v876_v47 = vpack.c.bf16 %v875_v41, %v875_v41  ;;  %3396 = vmatprep.subr.bf16.mxu0 %v3839_v45 }
 0x708   :  { %3309 = vmatmul.mubr.msk.bf16.vlgmr.msra.gmra.mrb[16].mxu1 %vm296_vm4, %v535_v27 }
 0x709   :  { %3319 = vmatpush3.bf16.msra.mxu1 %v658_v29  ;;  %3320 = vmatprep.mubr.msk.bf16.mxu1 %vm3840_vm1, %v3839_v45 }
 0x70a   :  { %3330 = vmatprep.subr.bf16.mxu1 %v3839_v45 }
 0x710   :  { %3321 = vmatmul.mubr.msk.bf16.vlgmr.msra.gmra.mrb[20].mxu1 %vm296_vm4, %v651_v33 }
 0x711   :  { %3331 = vmatpush3.bf16.msra.mxu1 %v772_v36  ;;  %3332 = vmatprep.mubr.msk.bf16.mxu1 %vm3840_vm1, %v3839_v45 }
 0x712   :  { %3342 = vmatprep.subr.bf16.mxu1 %v3839_v45 }
 0x718   :  { %3333 = vmatmul.mubr.msk.bf16.vlgmr.msra.gmra.mrb[24].mxu1 %vm296_vm4, %v766_v38 }
 0x719   :  { %3344 = vmatprep.mubr.msk.bf16.mxu1 %vm3840_vm1, %v3839_v45 }
 0x725   :  { %v988_v40 = vpop.xlane.xlu1 %987 }
 0x726   :  { %3677 = vrcp.f32 %v988_v40 }
 0x729   :  { %v878_v44 = vpop.permute.xlu1 %877 }
 0x72a   :  { %v883_v46 = vsel %vm312_vm3, %v878_v44, 0  ;;  %v4229_v44 = vld [vmem:[%s4668_s9] sm:$0x3f] }
 0x72b   :  { %3343 = vmatpush3.bf16.msra.mxu1 %v883_v46  ;;  %v1174_v46 = vrot.slane %v4229_v44, %v3990_v31 }
 0x72c   :  { %3354 = vmatprep.subr.bf16.mxu1 %v3839_v45 }
 0x72d   :  { %v1108_v53 = vpop.permute.xlu1 %1107 }
 0x72e   :  { %3345 = vmatmul.mubr.msk.bf16.vlgmr.msra.gmra.mrb[28].mxu1 %vm296_vm4, %v876_v47  ;;  %v1113_v55 = vsel %vm312_vm3, %v1108_v53, 0 }
 0x72f   :  { %3356 = vmatprep.mubr.msk.bf16.mxu1 %vm3840_vm1, %v3839_v45 }
 0x730   :  { %v3678_v49 = vpop.eup %3677 }
 0x731   :  { %v990_v51 = vmul.f32 %v3678_v49, %v4141_v8 }
 0x732   :  { %v1103_v50 = vpop.xlane.xlu0 %1102 }
 0x733   :  { %3679 = vrcp.f32 %v1103_v50  ;;  %v991_v54 = vpack.c.bf16 %v990_v51, %v990_v51 }
 0x736   :  { %v993_v48 = vpop.permute.xlu0 %992 }
 0x737   :  { %v998_v52 = vsel %vm312_vm3, %v993_v48, 0 }
 0x738   :  { %3355 = vmatpush3.bf16.msra.mxu1 %v998_v52 }
 0x739   :  { %3366 = vmatprep.subr.bf16.mxu1 %v3839_v45 }
 0x73b   :  { %3357 = vmatmul.mubr.msk.bf16.vlgmr.msra.gmra.mrb[32].mxu1 %vm296_vm4, %v991_v54 }
 0x73c   :  { %3367 = vmatpush3.bf16.msra.mxu1 %v1113_v55  ;;  %3368 = vmatprep.mubr.msk.bf16.mxu1 %vm3840_vm1, %v3839_v45 }
 0x73d   :  { %v3680_v56 = vpop.eup %3679  ;;  %3384 = vmatprep.subr.bf16.mxu1 %v3839_v45 }
 0x73e   :  { %v1105_v57 = vmul.f32 %v3680_v56, %v4145_v10 }
 0x740   :  { %v1106_v59 = vpack.c.bf16 %v1105_v57, %v1105_v57 }
 0x743   :  { %3369 = vmatmul.mubr.msk.bf16.vlgmr.msra.gmra.mrb[36].mxu1 %vm296_vm4, %v1106_v59 }
 0x744   :  { %3392 = vmatprep.mubr.msk.bf16.mxu1 %vm3840_vm1, %v3839_v45 }
 0x7d3   :  { %v462_v60 = vpop.f32.mrb[12].mxu1 }
 0x7d4   :  { %469 = vrot.lane.b32.xlu1 %v462_v60, %s3846_s2  ;;  %v3298_v61 = vpop.f32.mrb[13].mxu1 }
 0x7d5   :  { %v465_v62 = vpop.f32.mrb[14].mxu1 }
 0x7d6   :  { %v3299_v63 = vpop.f32.mrb[15].mxu1 }
 0x7db   :  { %v578_v0 = vpop.f32.mrb[16].mxu1 }
 0x7dc   :  { %585 = vrot.lane.b32.xlu1 %v578_v0, %s3845_s26  ;;  %v3310_v3 = vpop.f32.mrb[17].mxu1 }
 0x7dd   :  { %v581_v4 = vpop.f32.mrb[18].mxu1 }
 0x7de   :  { %v3311_v6 = vpop.f32.mrb[19].mxu1 }
 0x7df   :  { %v3601_v6 = vld [vmem:[#allocation8] sm:$0xff]  }
 0x7e0   :  { %3385 = vmatpush3.bf16.msra.mxu1 %v3601_v6 }
 0x7e1   :  { %3386 = vmatprep.subr.bf16.mxu1 %v3839_v45 }
 0x7e3   :  { %v694_v7 = vpop.f32.mrb[20].mxu1 }
 0x7e4   :  { %701 = vrot.lane.b32.xlu0 %v694_v7, %s3844_s25  ;;  %v3322_v8 = vpop.f32.mrb[21].mxu1  ;;  %v3603_v7 = vld [vmem:[#allocation8 + $0x10] sm:$0xff]  }
 0x7e5   :  { %v697_v9 = vpop.f32.mrb[22].mxu1  ;;  %v3604_v8 = vld [vmem:[#allocation8 + $0x18] sm:$0xff]  }
 0x7e6   :  { %v3323_v10 = vpop.f32.mrb[23].mxu1 }
 0x7eb   :  { %v808_v11 = vpop.f32.mrb[24].mxu1 }
 0x7ec   :  { %814 = vst.msk [vmem:[#allocation2 + $0x8] sm:$0xff] %vm249_vm2, %v808_v11  ;;  %v3334_v12 = vpop.f32.mrb[25].mxu1 }
 0x7ed   :  { %v811_v13 = vpop.f32.mrb[26].mxu1 }
 0x7ee   :  { %v3335_v14 = vpop.f32.mrb[27].mxu1 }
 0x801   :  { %v919_v15 = vpop.f32.mrb[28].mxu1 }
 0x802   :  { %926 = vrot.lane.b32.xlu1 %v919_v15, %s3846_s2  ;;  %v3346_v16 = vpop.f32.mrb[29].mxu1 }
 0x803   :  { %v922_v1 = vpop.f32.mrb[30].mxu1  ;;  %v1274_v16 = vrot.slane %v4229_v44, %v3993_v34 }
 0x804   :  { %v3347_v19 = vpop.f32.mrb[31].mxu1  ;;  %v1279_v1 = vsub.s32 2, %v3987_v30 }
 0x806   :  { %v1280_v21 = vrot.slane %v4229_v44, %v1279_v1 }
 0x80e   :  { %v1034_v22 = vpop.f32.mrb[32].mxu1 }
 0x80f   :  { %1041 = vrot.lane.b32.xlu1 %v1034_v22, %s3845_s26  ;;  %v3358_v23 = vpop.f32.mrb[33].mxu1 }
 0x810   :  { %v1037_v24 = vpop.f32.mrb[34].mxu1 }
 0x811   :  { %v3359_v25 = vpop.f32.mrb[35].mxu1 }
 0x816   :  { %v1149_v26 = vpop.f32.mrb[36].mxu1 }
 0x817   :  { %1156 = vrot.lane.b32.xlu1 %v1149_v26, %s3844_s25  ;;  %v3370_v27 = vpop.f32.mrb[37].mxu1  ;;  %v3605_v26 = vld [vmem:[%s4667_s8] sm:$0xff]  }
 0x818   :  { %v1152_v28 = vpop.f32.mrb[38].mxu1  ;;  %v3606_v27 = vld [vmem:[%s4667_s8 + $0x8] sm:$0xff]  }
 0x819   :  { %v3371_v29 = vpop.f32.mrb[39].mxu1  ;;  %v3607_v28 = vld [vmem:[%s4667_s8 + $0x10] sm:$0xff]  }
 0x81a   :  { %v3609_v29 = vld [vmem:[%s4667_s8 + $0x20] sm:$0xff]  }
 0x846   :  { %v470_v32 = vpop.permute.xlu1 %469 }
 0x847   :  { %473 = vst.msk [vmem:[#allocation2] sm:$0xff] %vm472_vm5, %v470_v32  ;;  %v3610_v32 = vld [vmem:[%s4667_s8 + $0x28] sm:$0xff]  }
 0x84e   :  { %v586_v33 = vpop.permute.xlu1 %585 }
 0x84f   :  { %589 = vst.msk [vmem:[#allocation2] sm:$0xff] %vm588_vm6, %v586_v33  ;;  %v3611_v33 = vld [vmem:[%s4667_s8 + $0x30] sm:$0xff]  }
 0x856   :  { %v702_v35 = vpop.permute.xlu0 %701 }
 0x857   :  { %705 = vst.msk [vmem:[#allocation2] sm:$0xff] %vm704_vm7, %v702_v35  ;;  %v3612_v35 = vld [vmem:[%s4667_s8 + $0x38] sm:$0xff]  }
 0x85e   :  { %v1160_v39 = vld [vmem:[#allocation2] sm:$0xff] }
 0x874   :  { %v927_v36 = vpop.permute.xlu1 %926 }
 0x875   :  { %929 = vst.msk [vmem:[#allocation2 + $0x8] sm:$0xff] %vm472_vm5, %v927_v36  ;;  %v3070_v36 = vld [vmem:[%s4666_s7] ss:$0 sm:$0xff] }
 0x881   :  { %v1042_v37 = vpop.permute.xlu1 %1041 }
 0x882   :  { %1044 = vst.msk [vmem:[#allocation2 + $0x8] sm:$0xff] %vm588_vm6, %v1042_v37 }
 0x889   :  { %v1157_v38 = vpop.permute.xlu1 %1156 }
 0x88a   :  { %1159 = vst.msk [vmem:[#allocation2 + $0x8] sm:$0xff] %vm704_vm7, %v1157_v38 }
 0x891   :  { %v1161_v40 = vld [vmem:[#allocation2 + $0x8] sm:$0xff] }
 0x892   :  { %v1162_v41 = vpack.c.bf16 %v1161_v40, %v1160_v39 }
 0x894   :  { %3381 = vmatmul.mubr.msk.bf16.vlgmr.msra.gmra.mrb[28].mxu0 %vm96_vm0, %v1162_v41 }
 0x895   :  { %3412 = vmatprep.mubr.msk.bf16.mxu0 %vm3840_vm1, %v3839_v45  ;;  %3397 = vmatpush3.bf16.msra.mxu0 %v3605_v26 }
 0x896   :  { %3398 = vmatprep.subr.bf16.mxu0 %v3839_v45 }
 0x899   :  { %3399 = vmatpush3.bf16.msra.mxu0 %v3606_v27  ;;  %v3613_v27 = vld [vmem:[%s4662_s3 + $0x40] ss:$8 sps:$4 sm:$0xff]  }
 0x89a   :  { %3400 = vmatprep.subr.bf16.mxu0 %v3839_v45 }
 0x89d   :  { %3401 = vmatpush3.bf16.msra.mxu0 %v3607_v28  ;;  %v3618_v28 = vld [vmem:[%s4662_s3 + $0x54] ss:$8 sps:$4 sm:$0xff]  }
 0x89e   :  { %3402 = vmatprep.subr.bf16.mxu0 %v3839_v45 }
 0x967   :  { %v1236_v47 = vpop.f32.mrb[28].mxu0 }
 0x968   :  { %v1237_v49 = vadd.f32 %v1236_v47, %v1174_v46  ;;  %v3382_v50 = vpop.f32.mrb[29].mxu0 }
 0x969   :  { %v1239_v51 = vpop.f32.mrb[30].mxu0 }
 0x96a   :  { %v1240_v48 = vadd.f32 %v1239_v51, %v1174_v46  ;;  %v3383_v52 = vpop.f32.mrb[31].mxu0  ;;  %v1243_v53 = vadd.f32 %v1237_v49, %v3997_v42 }
 0x96c   :  { %v1245_v54 = vsel %vm96_vm0, %v1243_v53, 0.0  ;;  %v1244_v55 = vadd.f32 %v1240_v48, %v3999_v43  ;;  %v3602_v43 = vld [vmem:[#allocation8 + $0x8] sm:$0xff]  }
 0x96d   :  { %1246 = vadd.xlane.f32.xlu0 %v1245_v54  ;;  %3387 = vmatpush3.bf16.msra.mxu1 %v3602_v43 }
 0x96e   :  { %v1248_v56 = vsel %vm96_vm0, %v1244_v55, 0.0  ;;  %3388 = vmatprep.subr.bf16.mxu1 %v3839_v45 }
 0x96f   :  { %1249 = vadd.xlane.f32.xlu1 %v1248_v56 }
 0x971   :  { %3389 = vmatpush3.bf16.msra.mxu1 %v3603_v7 }
 0x972   :  { %3390 = vmatprep.subr.bf16.mxu1 %v3839_v45 }
 0x975   :  { %3391 = vmatpush3.bf16.msra.mxu1 %v3604_v8 }
 0x9fa   :  { %v1247_v57 = vpop.xlane.xlu0 %1246 }
 0x9fb   :  { %v1251_v59 = vmul.f32 0.015625, %v1247_v57 }
 0x9fc   :  { %v1250_v60 = vpop.xlane.xlu1 %1249 }
 0x9fd   :  { %v1253_v61 = vsub.f32 %v1243_v53, %v1251_v59  ;;  %v1252_v62 = vmul.f32 0.015625, %v1250_v60 }
 0x9ff   :  { %v1254_v63 = vsub.f32 %v1244_v55, %v1252_v62  ;;  %v1255_v0 = vmul.f32 %v1253_v61, %v1253_v61 }
 0xa01   :  { %v1257_v3 = vsel %vm96_vm0, %v1255_v0, 0.0  ;;  %v1256_v4 = vmul.f32 %v1254_v63, %v1254_v63 }
 0xa02   :  { %1258 = vadd.xlane.f32.xlu0 %v1257_v3 }
 0xa03   :  { %v1260_v42 = vsel %vm96_vm0, %v1256_v4, 0.0 }
 0xa06   :  { %1261 = vadd.xlane.f32.xlu0 %v1260_v42  ;;  %v1404_v42 = vsub.s32 3, %v3987_v30 }
 0xa08   :  { %v1405_v6 = vrot.slane %v4229_v44, %v1404_v42 }
 0xa8f   :  { %v1259_v9 = vpop.xlane.xlu0 %1258 }
 0xa90   :  { %v1263_v10 = vmul.f32 0.015625, %v1259_v9 }
 0xa92   :  { %v1265_v11 = vadd.f32 1e-12, %v1263_v10 }
 0xa93   :  { %v1262_v12 = vpop.xlane.xlu0 %1261 }
 0xa94   :  { %3681 = vrsqrt.f32 %v1265_v11  ;;  %v1264_v13 = vmul.f32 0.015625, %v1262_v12 }
 0xa96   :  { %v1266_v14 = vadd.f32 1e-12, %v1264_v13 }
 0xa98   :  { %3683 = vrsqrt.f32 %v1266_v14 }
 0xa9e   :  { %v3682_v15 = vpop.eup %3681 }
 0xa9f   :  { %v1269_v17 = vmul.f32 %v3682_v15, %v1253_v61 }
 0xaa1   :  { %v1275_v58 = vmul.f32 %v1274_v16, %v1269_v17 }
 0xaa2   :  { %v3684_v19 = vpop.eup %3683 }
 0xaa3   :  { %v1270_v20 = vmul.f32 %v3684_v19, %v1254_v63  ;;  %v4248_v23 = vadd.f32 %v1280_v21, %v1275_v58 }
 0xaa5   :  { %v1276_v22 = vmul.f32 %v1274_v16, %v1270_v20 }
 0xaa7   :  { %v4250_v24 = vadd.f32 %v1280_v21, %v1276_v22 }
 0xaa9   :  { %v1283_v25 = vpack.c.bf16 %v4250_v24, %v4248_v23 }
 0xaab   :  { %3393 = vmatmul.mubr.msk.bf16.vlgmr.msra.gmra.mrb[40].mxu1 %vm96_vm0, %v1283_v25 }
 0xaac   :  { %1635 = vmatprep.mubr.bf16.mxu1 %v3838_v18  ;;  %v3608_v18 = vld [vmem:[%s4667_s8 + $0x18] sm:$0xff]  }
 0xaad   :  { %3403 = vmatpush3.bf16.msra.mxu0 %v3608_v18  ;;  %v3616_v18 = vld [vmem:[%s4662_s3 + $0x50] ss:$8 sps:$4 sm:$0xff]  }
 0xaae   :  { %3404 = vmatprep.subr.bf16.mxu0 %v3839_v45 }
 0xab1   :  { %3405 = vmatpush3.bf16.msra.mxu0 %v3609_v29  ;;  %v3621_v29 = vld [vmem:[%s4662_s3 + $0x64] ss:$8 sps:$4 sm:$0xff]  }
 0xab2   :  { %3406 = vmatprep.subr.bf16.mxu0 %v3839_v45 }
 0xab5   :  { %3407 = vmatpush3.bf16.msra.mxu0 %v3610_v32  ;;  %v3619_v32 = vld [vmem:[%s4662_s3 + $0x60] ss:$8 sps:$4 sm:$0xff]  }
 0xab6   :  { %3408 = vmatprep.subr.bf16.mxu0 %v3839_v45 }
 0xab9   :  { %3409 = vmatpush3.bf16.msra.mxu0 %v3611_v33  ;;  %v3622_v33 = vld [vmem:[%s4662_s3 + $0x70] ss:$8 sps:$4 sm:$0xff]  }
 0xaba   :  { %3410 = vmatprep.subr.bf16.mxu0 %v3839_v45 }
 0xabd   :  { %3411 = vmatpush3.bf16.msra.mxu0 %v3612_v35  ;;  %v3624_v35 = vld [vmem:[%s4662_s3 + $0x74] ss:$8 sps:$4 sm:$0xff]  }
 0xabe   :  { %3428 = vmatprep.subr.bf16.mxu0 %v3839_v45 }
 0xb7e   :  { %v1360_v37 = vpop.f32.mrb[40].mxu1 }
 0xb7f   :  { %v1361_v38 = vadd.f32 %v3070_v36, %v1360_v37  ;;  %v3394_v39 = vpop.f32.mrb[41].mxu1 }
 0xb80   :  { %v1363_v40 = vpop.f32.mrb[42].mxu1 }
 0xb81   :  { %v1367_v41 = vmul.f32 %v1361_v38, %v1361_v38  ;;  %v1364_v46 = vadd.f32 %v3070_v36, %v1363_v40  ;;  %v3395_v47 = vpop.f32.mrb[43].mxu1 }
 0xb83   :  { %v1369_v49 = vmul.f32 %v1367_v41, %v1361_v38  ;;  %v1368_v50 = vmul.f32 %v1364_v46, %v1364_v46 }
 0xb85   :  { %v1371_v51 = vmul.f32 0.044715, %v1369_v49  ;;  %v1370_v48 = vmul.f32 %v1368_v50, %v1364_v46  ;;  %v1531_v49 = vsub.s32 5, %v3987_v30 }
 0xb87   :  { %v1373_v52 = vadd.f32 %v1371_v51, %v1361_v38  ;;  %v1372_v53 = vmul.f32 0.044715, %v1370_v48 }
 0xb89   :  { %v1375_v54 = vmul.f32 0.7978846, %v1373_v52  ;;  %v1374_v55 = vadd.f32 %v1372_v53, %v1364_v46 }
 0xb8b   :  { %3685 = vtanh.f32 %v1375_v54  ;;  %v1376_v56 = vmul.f32 0.7978846, %v1374_v55  ;;  %v1532_v54 = vrot.slane %v4229_v44, %v1531_v49 }
 0xb8d   :  { %3687 = vtanh.f32 %v1376_v56 }
 0xb95   :  { %v3686_v57 = vpop.eup %3685 }
 0xb96   :  { %v1379_v59 = vadd.f32 1.0, %v3686_v57 }
 0xb97   :  { %v3688_v60 = vpop.eup %3687 }
 0xb98   :  { %v1381_v61 = vmul.f32 0.5, %v1379_v59  ;;  %v1380_v62 = vadd.f32 1.0, %v3688_v60  ;;  %v3093_v60 = vld [vmem:[%s4663_s4 + $0x2] sm:$0x3] }
 0xb9a   :  { %v1382_v63 = vmul.f32 0.5, %v1380_v62  ;;  %v1383_v0 = vmul.f32 %v1381_v61, %v1361_v38  ;;  %v1553_v61 = vrot.slane %v3093_v60, %v3990_v31  ;;  %v1557_v62 = vrot.slane %v3093_v60, %v3993_v34 }
 0xb9c   :  { %v1384_v3 = vmul.f32 %v1382_v63, %v1364_v46  ;;  %v1525_v46 = vsub.s32 4, %v3987_v30 }
 0xb9e   :  { %v1385_v4 = vpack.c.bf16 %v1384_v3, %v1383_v0  ;;  %v1526_v47 = vrot.slane %v4229_v44, %v1525_v46 }
 0xba0   :  { %3413 = vmatmul.mubr.bf16.vlgmr.msra.gmra.mrb[32].mxu0 %v1385_v4 }
 0xba1   :  { %3430 = vmatprep.mubr.msk.bf16.mxu0 %vm3840_vm1, %v3839_v45 }
 0xc73   :  { %v1488_v43 = vpop.f32.mrb[32].mxu0 }
 0xc74   :  { %v1489_v7 = vadd.f32 %v1488_v43, %v1405_v6  ;;  %v3414_v8 = vpop.f32.mrb[33].mxu0 }
 0xc75   :  { %v1491_v9 = vpop.f32.mrb[34].mxu0 }
 0xc76   :  { %v1492_v10 = vadd.f32 %v1491_v9, %v1405_v6  ;;  %v3415_v11 = vpop.f32.mrb[35].mxu0  ;;  %v1495_v12 = vadd.f32 %v1489_v7, %v4248_v23 }
 0xc78   :  { %v1497_v13 = vsel %vm96_vm0, %v1495_v12, 0.0  ;;  %v1496_v14 = vadd.f32 %v1492_v10, %v4250_v24  ;;  %v3615_v24 = vld [vmem:[%s4662_s3 + $0x44] ss:$8 sps:$4 sm:$0xff]  }
 0xc79   :  { %1498 = vadd.xlane.f32.xlu0 %v1497_v13  ;;  %1603 = vmatprep.subr.bf16.mxu1 %v3615_v24 }
 0xc7a   :  { %v1500_v15 = vsel %vm96_vm0, %v1496_v14, 0.0  ;;  %1604 = vmatpush1.bf16.msra.mxu1 %v3613_v27 }
 0xc7b   :  { %1501 = vadd.xlane.f32.xlu1 %v1500_v15  ;;  %1605 = vmatprep.subr.bf16.mxu1 %v3618_v28 }
 0xc7e   :  { %1606 = vmatpush1.bf16.msra.mxu1 %v3616_v18 }
 0xc7f   :  { %1607 = vmatprep.subr.bf16.mxu1 %v3621_v29 }
 0xc82   :  { %1608 = vmatpush1.bf16.msra.mxu1 %v3619_v32 }
 0xc83   :  { %1609 = vmatprep.subr.bf16.mxu1 %v3624_v35 }
 0xc86   :  { %1610 = vmatpush1.bf16.msra.mxu1 %v3622_v33 }
 0xc87   :  { %3416 = vmatprep.subr.bf16.mxu1 %v3839_v45 }
 0xd06   :  { %v1499_v16 = vpop.xlane.xlu0 %1498 }
 0xd07   :  { %v1503_v17 = vmul.f32 0.015625, %v1499_v16 }
 0xd08   :  { %v1502_v19 = vpop.xlane.xlu1 %1501 }
 0xd09   :  { %v1505_v58 = vsub.f32 %v1495_v12, %v1503_v17  ;;  %v1504_v20 = vmul.f32 0.015625, %v1502_v19 }
 0xd0b   :  { %v1506_v21 = vsub.f32 %v1496_v14, %v1504_v20  ;;  %v1507_v22 = vmul.f32 %v1505_v58, %v1505_v58 }
 0xd0d   :  { %v1509_v25 = vsel %vm96_vm0, %v1507_v22, 0.0  ;;  %v1508_v26 = vmul.f32 %v1506_v21, %v1506_v21 }
 0xd0e   :  { %1510 = vadd.xlane.f32.xlu0 %v1509_v25 }
 0xd0f   :  { %v1512_v23 = vsel %vm96_vm0, %v1508_v26, 0.0 }
 0xd10   :  { %1513 = vadd.xlane.f32.xlu1 %v1512_v23 }
 0xd9b   :  { %v1511_v36 = vpop.xlane.xlu0 %1510 }
 0xd9c   :  { %v1515_v37 = vmul.f32 0.015625, %v1511_v36 }
 0xd9d   :  { %v1514_v38 = vpop.xlane.xlu1 %1513 }
 0xd9e   :  { %v1517_v39 = vadd.f32 1e-12, %v1515_v37  ;;  %v1516_v40 = vmul.f32 0.015625, %v1514_v38 }
 0xda0   :  { %3689 = vrsqrt.f32 %v1517_v39  ;;  %v1518_v41 = vadd.f32 1e-12, %v1516_v40 }
 0xda2   :  { %3691 = vrsqrt.f32 %v1518_v41 }
 0xdaa   :  { %v3690_v50 = vpop.eup %3689 }
 0xdab   :  { %v1521_v51 = vmul.f32 %v3690_v50, %v1505_v58 }
 0xdac   :  { %v3692_v48 = vpop.eup %3691 }
 0xdad   :  { %v1527_v52 = vmul.f32 %v1526_v47, %v1521_v51  ;;  %v1522_v53 = vmul.f32 %v3692_v48, %v1506_v21 }
 0xdaf   :  { %v1528_v55 = vmul.f32 %v1526_v47, %v1522_v53  ;;  %v4336_v56 = vadd.f32 %v1532_v54, %v1527_v52 }
 0xdb1   :  { %v4338_v57 = vadd.f32 %v1532_v54, %v1528_v55 }
 0xdb3   :  { %v1537_v59 = vpack.c.bf16 %v4338_v57, %v4336_v56 }
 0xdb5   :  { %3102 = vmatmul.mubr.msk.bf16.vlgmr.msra.gmra.mrb[44].mxu1 %vm96_vm0, %v1537_v59 }
 0xdb6   :  { %3418 = vmatprep.mubr.msk.bf16.mxu1 %vm3840_vm1, %v3839_v45 }
 0xe88   :  { %v1637_v44 = vpop.f32.mrb[44].mxu1 }
 0xe89   :  { %v1639_v63 = vpop.f32.mrb[45].mxu1  ;;  %v1638_v3 = vadd.f32 %v1637_v44, %v1553_v61 }
 0xe8a   :  { %v1641_v0 = vpop.f32.mrb[46].mxu1  ;;  %v1640_v43 = vadd.f32 %v1639_v63, %v1557_v62 }
 0xe8b   :  { %v1642_v4 = vadd.f32 %v1641_v0, %v1553_v61  ;;  %v1643_v6 = vpop.f32.mrb[47].mxu1 }
 0xe8c   :  { %v1644_v7 = vadd.f32 %v1643_v6, %v1557_v62 }
 0xe8d   :  { %v1646_v8 = vpack.c.bf16 %v1642_v4, %v1638_v3 }
 0xe8e   :  { %v4350_v9 = vpack.c.bf16 %v1644_v7, %v1640_v43 }
 0xe8f   :  { %1758 = vrot.lane.b32.xlu1 %v1646_v8, %s3844_s25  ;;  %1649 = vrot.lane.b32.xlu0 %v1646_v8, %s3836_s0  ;;  %v2102_v10 = vrot.slane %v1646_v8, 4 }
 0xe90   :  { %v1713_v19 = vsel %vm312_vm3, %v4350_v9, 0 }
 0xe93   :  { %1756 = vrot.lane.b32.xlu1 %v1646_v8, %s3841_s21  ;;  %1872 = vrot.lane.b32.xlu0 %v1646_v8, %s3842_s23 }
 0xe97   :  { %1874 = vrot.lane.b32.xlu1 %v1646_v8, %s3845_s26  ;;  %1987 = vrot.lane.b32.xlu0 %v1646_v8, %s3843_s6 }
 0xe9b   :  { %1989 = vrot.lane.b32.xlu1 %v1646_v8, %s3846_s2  ;;  %2213 = vrot.lane.b32.xlu0 %v2102_v10, %s3844_s25 }
 0xe9f   :  { %2328 = vrot.lane.b32.xlu0 %v2102_v10, %s3845_s26  ;;  %2103 = vrot.lane.b32.xlu1 %v2102_v10, %s3836_s0 }
 0xea3   :  { %2443 = vrot.lane.b32.xlu0 %v2102_v10, %s3846_s2  ;;  %2211 = vrot.lane.b32.xlu1 %v2102_v10, %s3841_s21 }
 0xea7   :  { %2326 = vrot.lane.b32.xlu1 %v2102_v10, %s3842_s23 }
 0xeab   :  { %2441 = vrot.lane.b32.xlu1 %v2102_v10, %s3843_s6 }
 0xf01   :  { %v1759_v11 = vpop.permute.xlu1 %1758  ;;  %v1650_v12 = vpop.permute.xlu0 %1649 }
 0xf02   :  { %v1764_v13 = vsel %vm249_vm2, %v1759_v11, 0  ;;  %v1655_v14 = vsel %vm249_vm2, %v1650_v12, 0 }
 0xf03   :  { %3417 = vmatpush3.bf16.xpose.msra.mxu1 %v1655_v14  ;;  %3429 = vmatpush3.bf16.xpose.msra.mxu0 %v1764_v13 }
 0xf04   :  { %3422 = vmatprep.subr.bf16.mxu1 %v3839_v45  ;;  %3440 = vmatprep.subr.bf16.mxu0 %v3839_v45 }
 0xf05   :  { %v1757_v15 = vpop.permute.xlu1 %1756  ;;  %v1873_v20 = vpop.permute.xlu0 %1872 }
 0xf09   :  { %v1875_v16 = vpop.permute.xlu1 %1874  ;;  %v1988_v25 = vpop.permute.xlu0 %1987 }
 0xf0a   :  { %v1880_v17 = vsel %vm249_vm2, %v1875_v16, 0  ;;  %3419 = vmatmul.mubr.msk.bf16.vlgmr.msra.gmra.mrb[48].mxu1 %vm249_vm2, %v1646_v8  ;;  %3431 = vmatmul.mubr.msk.bf16.vlgmr.msra.gmra.mrb[36].mxu0 %vm249_vm2, %v1757_v15 }
 0xf0b   :  { %3423 = vmatpush3.bf16.msra.mxu1 %v1713_v19  ;;  %3441 = vmatpush3.bf16.xpose.msra.mxu0 %v1880_v17 }
 0xf0c   :  { %3442 = vmatprep.mubr.msk.bf16.mxu0 %vm3840_vm1, %v3839_v45  ;;  %3452 = vmatprep.subr.bf16.mxu0 %v3839_v45 }
 0xf0d   :  { %3424 = vmatprep.mubr.msk.bf16.mxu1 %vm3840_vm1, %v3839_v45  ;;  %3434 = vmatprep.subr.bf16.mxu1 %v3839_v45  ;;  %v1990_v58 = vpop.permute.xlu1 %1989  ;;  %v2214_v23 = vpop.permute.xlu0 %2213 }
 0xf0e   :  { %v1995_v21 = vsel %vm249_vm2, %v1990_v58, 0  ;;  %v2219_v24 = vsel %vm249_vm2, %v2214_v23, 0 }
 0xf11   :  { %v2104_v22 = vpop.permute.xlu1 %2103  ;;  %v2329_v27 = vpop.permute.xlu0 %2328 }
 0xf12   :  { %3443 = vmatmul.mubr.msk.bf16.vlgmr.msra.gmra.mrb[40].mxu0 %vm249_vm2, %v1873_v20  ;;  %v2109_v26 = vsel %vm249_vm2, %v2104_v22, 0  ;;  %v2334_v18 = vsel %vm249_vm2, %v2329_v27, 0 }
 0xf13   :  { %3453 = vmatpush3.bf16.xpose.msra.mxu0 %v1995_v21  ;;  %3454 = vmatprep.mubr.msk.bf16.mxu0 %vm3840_vm1, %v3839_v45 }
 0xf14   :  { %3464 = vmatprep.subr.bf16.mxu0 %v3839_v45 }
 0xf15   :  { %v2212_v28 = vpop.permute.xlu1 %2211  ;;  %v2444_v29 = vpop.permute.xlu0 %2443 }
 0xf16   :  { %v2449_v33 = vsel %vm249_vm2, %v2444_v29, 0 }
 0xf19   :  { %v2327_v32 = vpop.permute.xlu1 %2326 }
 0xf1a   :  { %3455 = vmatmul.mubr.msk.bf16.vlgmr.msra.gmra.mrb[44].mxu0 %vm249_vm2, %v1988_v25 }
 0xf1b   :  { %3465 = vmatpush3.bf16.xpose.msra.mxu0 %v2109_v26  ;;  %3466 = vmatprep.mubr.msk.bf16.mxu0 %vm3840_vm1, %v3839_v45 }
 0xf1c   :  { %3476 = vmatprep.subr.bf16.mxu0 %v3839_v45 }
 0xf1d   :  { %v2442_v35 = vpop.permute.xlu1 %2441 }
 0xf22   :  { %3467 = vmatmul.mubr.msk.bf16.vlgmr.msra.gmra.mrb[48].mxu0 %vm249_vm2, %v2102_v10 }
 0xf23   :  { %3477 = vmatpush3.bf16.xpose.msra.mxu0 %v2219_v24  ;;  %3478 = vmatprep.mubr.msk.bf16.mxu0 %vm3840_vm1, %v3839_v45 }
 0xf24   :  { %3488 = vmatprep.subr.bf16.mxu0 %v3839_v45 }
 0xf2a   :  { %3479 = vmatmul.mubr.msk.bf16.vlgmr.msra.gmra.mrb[52].mxu0 %vm249_vm2, %v2212_v28 }
 0xf2b   :  { %3489 = vmatpush3.bf16.xpose.msra.mxu0 %v2334_v18  ;;  %3490 = vmatprep.mubr.msk.bf16.mxu0 %vm3840_vm1, %v3839_v45 }
 0xf2c   :  { %3500 = vmatprep.subr.bf16.mxu0 %v3839_v45 }
 0xf32   :  { %3491 = vmatmul.mubr.msk.bf16.vlgmr.msra.gmra.mrb[56].mxu0 %vm249_vm2, %v2327_v32 }
 0xf33   :  { %3501 = vmatpush3.bf16.xpose.msra.mxu0 %v2449_v33  ;;  %3502 = vmatprep.mubr.msk.bf16.mxu0 %vm3840_vm1, %v3839_v45 }
 0xf34   :  { %3512 = vmatprep.subr.bf16.mxu0 %v3839_v45 }
 0xf3a   :  { %3503 = vmatmul.mubr.msk.bf16.vlgmr.msra.gmra.mrb[60].mxu0 %vm249_vm2, %v2442_v35 }
 0xf3b   :  { %3520 = vmatprep.mubr.msk.bf16.mxu0 %vm3840_vm1, %v3839_v45 }
 0xfdd   :  { %v1691_v36 = vpop.f32.mrb[48].mxu1  ;;  %v1800_v37 = vpop.f32.mrb[36].mxu0 }
 0xfde   :  { %v1692_v38 = vadd.f32 %v1691_v36, %v4044_v2  ;;  %v1801_v39 = vadd.f32 %v1800_v37, %v4044_v2  ;;  %v3420_v40 = vpop.f32.mrb[49].mxu1  ;;  %v3432_v41 = vpop.f32.mrb[37].mxu0 }
 0xfdf   :  { %v1694_v47 = vpop.f32.mrb[50].mxu1  ;;  %v1803_v50 = vpop.f32.mrb[38].mxu0 }
 0xfe0   :  { %v3421_v51 = vpop.f32.mrb[51].mxu1  ;;  %v3433_v48 = vpop.f32.mrb[39].mxu0  ;;  %v1697_v52 = vsel %vm296_vm4, %v1692_v38, -inf  ;;  %v1806_v53 = vsel %vm296_vm4, %v1801_v39, -inf }
 0xfe1   :  { %1698 = vmax.xlane.f32.xlu0 %v1697_v52  ;;  %1807 = vmax.xlane.f32.xlu1 %v1806_v53 }
 0xfe5   :  { %v1916_v54 = vpop.f32.mrb[40].mxu0 }
 0xfe6   :  { %v1917_v55 = vadd.f32 %v1916_v54, %v4044_v2  ;;  %v3444_v59 = vpop.f32.mrb[41].mxu0 }
 0xfe7   :  { %v1919_v60 = vpop.f32.mrb[42].mxu0 }
 0xfe8   :  { %v3445_v61 = vpop.f32.mrb[43].mxu0  ;;  %v1922_v44 = vsel %vm296_vm4, %v1917_v55, -inf }
 0xfe9   :  { %1923 = vmax.xlane.f32.xlu0 %v1922_v44 }
 0xfed   :  { %v2031_v62 = vpop.f32.mrb[44].mxu0 }
 0xfee   :  { %v2032_v63 = vadd.f32 %v2031_v62, %v4044_v2  ;;  %v3456_v0 = vpop.f32.mrb[45].mxu0 }
 0xfef   :  { %v2034_v3 = vpop.f32.mrb[46].mxu0  ;;  %v4450_v0 = vrot.slane %v4350_v9, 4 }
 0xff0   :  { %v3457_v4 = vpop.f32.mrb[47].mxu0  ;;  %v2037_v6 = vsel %vm296_vm4, %v2032_v63, -inf }
 0xff1   :  { %2038 = vmax.xlane.f32.xlu0 %v2037_v6 }
 0xff5   :  { %v2145_v43 = vpop.f32.mrb[48].mxu0 }
 0xff6   :  { %v2146_v7 = vadd.f32 %v2145_v43, %v4107_v5  ;;  %v3468_v8 = vpop.f32.mrb[49].mxu0 }
 0xff7   :  { %v2148_v10 = vpop.f32.mrb[50].mxu0 }
 0xff8   :  { %v3469_v11 = vpop.f32.mrb[51].mxu0  ;;  %v2151_v12 = vsel %vm296_vm4, %v2146_v7, -inf }
 0xff9   :  { %2152 = vmax.xlane.f32.xlu0 %v2151_v12 }
 0xffd   :  { %v2255_v13 = vpop.f32.mrb[52].mxu0 }
 0xffe   :  { %v4420_v14 = vadd.f32 %v2255_v13, %v4107_v5  ;;  %v3480_v2 = vpop.f32.mrb[53].mxu0 }
 0xfff   :  { %v2258_v15 = vpop.f32.mrb[54].mxu0 }
0x1000   :  { %v3481_v16 = vpop.f32.mrb[55].mxu0  ;;  %v2261_v17 = vsel %vm296_vm4, %v4420_v14, -inf }
0x1001   :  { %2262 = vmax.xlane.f32.xlu1 %v2261_v17 }
0x1005   :  { %v2370_v19 = vpop.f32.mrb[56].mxu0 }
0x1006   :  { %v2371_v58 = vadd.f32 %v2370_v19, %v4107_v5  ;;  %v3492_v20 = vpop.f32.mrb[57].mxu0 }
0x1007   :  { %v2373_v21 = vpop.f32.mrb[58].mxu0 }
0x1008   :  { %v3493_v22 = vpop.f32.mrb[59].mxu0  ;;  %v2376_v25 = vsel %vm296_vm4, %v2371_v58, -inf }
0x1009   :  { %2377 = vmax.xlane.f32.xlu0 %v2376_v25 }
0x100d   :  { %v2485_v26 = vpop.f32.mrb[60].mxu0 }
0x100e   :  { %v2486_v23 = vadd.f32 %v2485_v26, %v4107_v5  ;;  %v3504_v24 = vpop.f32.mrb[61].mxu0 }
0x100f   :  { %v2488_v27 = vpop.f32.mrb[62].mxu0 }
0x1010   :  { %v3505_v28 = vpop.f32.mrb[63].mxu0  ;;  %v2491_v18 = vsel %vm296_vm4, %v2486_v23, -inf }
0x1011   :  { %2492 = vmax.xlane.f32.xlu1 %v2491_v18 }
0x101f   :  { %1934 = vrot.lane.b32.xlu0 %v4350_v9, %s3842_s23 }
0x1022   :  { %1819 = vrot.lane.b32.xlu1 %v4350_v9, %s3841_s21 }
0x106e   :  { %v1699_v29 = vpop.xlane.xlu0 %1698  ;;  %v1808_v32 = vpop.xlane.xlu1 %1807 }
0x106f   :  { %v1700_v33 = vsub.f32 %v1692_v38, %v1699_v29  ;;  %v1809_v35 = vsub.f32 %v1801_v39, %v1808_v32 }
0x1071   :  { %v1701_v36 = vmul.f32 1.442695, %v1700_v33  ;;  %v1810_v37 = vmul.f32 1.442695, %v1809_v35 }
0x1073   :  { %3693 = vpow2.f32 %v1701_v36 }
0x1074   :  { %3695 = vpow2.f32 %v1810_v37 }
0x1076   :  { %v1924_v5 = vpop.xlane.xlu0 %1923 }
0x1077   :  { %v1925_v40 = vsub.f32 %v1917_v55, %v1924_v5 }
0x1079   :  { %v1926_v41 = vmul.f32 1.442695, %v1925_v40 }
0x107b   :  { %3697 = vpow2.f32 %v1926_v41 }
0x107d   :  { %v3694_v47 = vpop.eup %3693 }
0x107e   :  { %v4432_v50 = vpop.eup %3695  ;;  %v2039_v51 = vpop.xlane.xlu0 %2038  ;;  %v1703_v48 = vsel %vm296_vm4, %v3694_v47, 0.0 }
0x107f   :  { %v2040_v52 = vsub.f32 %v2032_v63, %v2039_v51  ;;  %1704 = vadd.xlane.f32.xlu0 %v1703_v48  ;;  %v1812_v38 = vsel %vm296_vm4, %v4432_v50, 0.0  ;;  %v2168_v51 = vsel %vm312_vm3, %v4450_v0, 0 }
0x1080   :  { %1813 = vadd.xlane.f32.xlu1 %v1812_v38 }
0x1081   :  { %v2041_v39 = vmul.f32 1.442695, %v2040_v52 }
0x1083   :  { %3699 = vpow2.f32 %v2041_v39 }
0x1085   :  { %v4437_v53 = vpop.eup %3697 }
0x1086   :  { %v2153_v54 = vpop.xlane.xlu0 %2152  ;;  %v1928_v55 = vsel %vm296_vm4, %v4437_v53, 0.0 }
0x1087   :  { %v2154_v59 = vsub.f32 %v2146_v7, %v2153_v54  ;;  %1929 = vadd.xlane.f32.xlu0 %v1928_v55 }
0x1089   :  { %v2155_v60 = vmul.f32 1.442695, %v2154_v59 }
0x108b   :  { %3701 = vpow2.f32 %v2155_v60 }
0x108d   :  { %v4441_v61 = vpop.eup %3699 }
0x108e   :  { %v2043_v44 = vsel %vm296_vm4, %v4441_v61, 0.0  ;;  %v2263_v43 = vpop.xlane.xlu1 %2262 }
0x108f   :  { %2044 = vadd.xlane.f32.xlu1 %v2043_v44  ;;  %v2264_v7 = vsub.f32 %v4420_v14, %v2263_v43 }
0x1091   :  { %v2265_v10 = vmul.f32 1.442695, %v2264_v7 }
0x1095   :  { %v4445_v62 = vpop.eup %3701 }
0x1096   :  { %v2157_v63 = vsel %vm296_vm4, %v4445_v62, 0.0  ;;  %v2378_v3 = vpop.xlane.xlu0 %2377 }
0x1097   :  { %2158 = vadd.xlane.f32.xlu0 %v2157_v63  ;;  %v2379_v4 = vsub.f32 %v2371_v58, %v2378_v3 }
0x1099   :  { %v2380_v6 = vmul.f32 1.442695, %v2379_v4 }
0x109a   :  { %v1935_v17 = vpop.permute.xlu0 %1934 }
0x109b   :  { %3703 = vpow2.f32 %v2380_v6  ;;  %v1940_v32 = vsel %vm312_vm3, %v1935_v17, 0 }
0x109c   :  { %3705 = vpow2.f32 %v2265_v10 }
0x109e   :  { %v2493_v8 = vpop.xlane.xlu1 %2492 }
0x109f   :  { %v2494_v11 = vsub.f32 %v2486_v23, %v2493_v8 }
0x10a0   :  { %2273 = vrot.lane.b32.xlu1 %v4450_v0, %s3841_s21 }
0x10a1   :  { %v2495_v12 = vmul.f32 1.442695, %v2494_v11 }
0x10a2   :  { %v1820_v19 = vpop.permute.xlu1 %1819 }
0x10a3   :  { %3707 = vpow2.f32 %v2495_v12  ;;  %v1825_v24 = vsel %vm312_vm3, %v1820_v19, 0 }
0x10a5   :  { %v4457_v13 = vpop.eup %3703 }
0x10a6   :  { %v2382_v2 = vsel %vm296_vm4, %v4457_v13, 0.0  ;;  %v4461_v15 = vpop.eup %3705 }
0x10ad   :  { %2049 = vrot.lane.b32.xlu0 %v4350_v9, %s3843_s6  ;;  %v2267_v9 = vsel %vm296_vm4, %v4461_v15, 0.0  ;;  %v4465_v16 = vpop.eup %3707 }
0x10ae   :  { %v2497_v14 = vsel %vm296_vm4, %v4465_v16, 0.0 }
0x10c4   :  { %2383 = vadd.xlane.f32.xlu1 %v2382_v2 }
0x10cc   :  { %2268 = vadd.xlane.f32.xlu0 %v2267_v9 }
0x10d0   :  { %2498 = vadd.xlane.f32.xlu0 %v2497_v14 }
0x10d5   :  { %2503 = vrot.lane.b32.xlu1 %v4450_v0, %s3843_s6 }
0x10e6   :  { %2388 = vrot.lane.b32.xlu0 %v4450_v0, %s3842_s23 }
0x110c   :  { %v1705_v58 = vpop.xlane.xlu0 %1704 }
0x110d   :  { %3709 = vrcp.f32 %v1705_v58  ;;  %v1814_v20 = vpop.xlane.xlu1 %1813 }
0x110e   :  { %3711 = vrcp.f32 %v1814_v20 }
0x1114   :  { %v1930_v21 = vpop.xlane.xlu0 %1929 }
0x1115   :  { %3713 = vrcp.f32 %v1930_v21 }
0x1117   :  { %v3710_v22 = vpop.eup %3709 }
0x1118   :  { %v1707_v25 = vmul.f32 %v3710_v22, %v3694_v47  ;;  %v3712_v23 = vpop.eup %3711 }
0x1119   :  { %v1816_v27 = vmul.f32 %v3712_v23, %v4432_v50 }
0x111a   :  { %v1708_v26 = vpack.c.bf16 %v1707_v25, %v1707_v25 }
0x111b   :  { %v1817_v18 = vpack.c.bf16 %v1816_v27, %v1816_v27 }
0x111c   :  { %3425 = vmatmul.mubr.msk.bf16.vlgmr.msra.gmra.mrb[52].mxu1 %vm296_vm4, %v1708_v26  ;;  %v2045_v28 = vpop.xlane.xlu1 %2044 }
0x111d   :  { %3435 = vmatpush3.bf16.msra.mxu1 %v1825_v24  ;;  %3436 = vmatprep.mubr.msk.bf16.mxu1 %vm3840_vm1, %v3839_v45  ;;  %3715 = vrcp.f32 %v2045_v28  ;;  %v3625_v28 = vld [vmem:[%s4664_s5 + $0x20] sm:$0xff]  }
0x111e   :  { %3446 = vmatprep.subr.bf16.mxu1 %v3839_v45  ;;  %3513 = vmatpush3.bf16.msra.mxu0 %v3625_v28 }
0x111f   :  { %v3714_v29 = vpop.eup %3713  ;;  %3514 = vmatprep.subr.bf16.mxu0 %v3839_v45 }
0x1120   :  { %v1932_v35 = vmul.f32 %v3714_v29, %v4437_v53  ;;  %v2274_v52 = vpop.permute.xlu1 %2273 }
0x1121   :  { %v2279_v39 = vsel %vm312_vm3, %v2274_v52, 0 }
0x1122   :  { %v1933_v37 = vpack.c.bf16 %v1932_v35, %v1932_v35 }
0x1124   :  { %v2159_v33 = vpop.xlane.xlu0 %2158  ;;  %3437 = vmatmul.mubr.msk.bf16.vlgmr.msra.gmra.mrb[56].mxu1 %vm296_vm4, %v1817_v18  ;;  %v3626_v18 = vld [vmem:[%s4664_s5 + $0x28] sm:$0xff]  }
0x1125   :  { %3447 = vmatpush3.bf16.msra.mxu1 %v1940_v32  ;;  %3448 = vmatprep.mubr.msk.bf16.mxu1 %vm3840_vm1, %v3839_v45  ;;  %3717 = vrcp.f32 %v2159_v33 }
0x1126   :  { %3458 = vmatprep.subr.bf16.mxu1 %v3839_v45  ;;  %3515 = vmatpush3.bf16.msra.mxu0 %v3626_v18 }
0x1127   :  { %v3716_v5 = vpop.eup %3715  ;;  %3516 = vmatprep.subr.bf16.mxu0 %v3839_v45 }
0x1128   :  { %v2050_v36 = vpop.permute.xlu0 %2049  ;;  %v2047_v41 = vmul.f32 %v3716_v5, %v4441_v61 }
0x1129   :  { %v2055_v40 = vsel %vm312_vm3, %v2050_v36, 0  ;;  %v3627_v36 = vld [vmem:[%s4664_s5 + $0x30] sm:$0xff]  }
0x112a   :  { %v2048_v47 = vpack.c.bf16 %v2047_v41, %v2047_v41  ;;  %3517 = vmatpush3.bf16.msra.mxu0 %v3627_v36 }
0x112b   :  { %3518 = vmatprep.subr.bf16.mxu0 %v3839_v45 }
0x112c   :  { %3449 = vmatmul.mubr.msk.bf16.vlgmr.msra.gmra.mrb[60].mxu1 %vm296_vm4, %v1933_v37  ;;  %v3628_v37 = vld [vmem:[%s4664_s5 + $0x38] sm:$0xff]  }
0x112d   :  { %3459 = vmatpush3.bf16.msra.mxu1 %v2055_v40  ;;  %3460 = vmatprep.mubr.msk.bf16.mxu1 %vm3840_vm1, %v3839_v45 }
0x112e   :  { %3470 = vmatprep.subr.bf16.mxu1 %v3839_v45  ;;  %3519 = vmatpush3.bf16.msra.mxu0 %v3628_v37 }
0x112f   :  { %v3718_v50 = vpop.eup %3717  ;;  %3536 = vmatprep.subr.bf16.mxu0 %v3839_v45 }
0x1130   :  { %v2161_v48 = vmul.f32 %v3718_v50, %v4445_v62 }
0x1132   :  { %v2162_v38 = vpack.c.bf16 %v2161_v48, %v2161_v48 }
0x1134   :  { %3461 = vmatmul.mubr.msk.bf16.vlgmr.msra.gmra.mrb[64].mxu1 %vm296_vm4, %v2048_v47 }
0x1135   :  { %3471 = vmatpush3.bf16.msra.mxu1 %v2168_v51  ;;  %3472 = vmatprep.mubr.msk.bf16.mxu1 %vm3840_vm1, %v3839_v45 }
0x1136   :  { %3482 = vmatprep.subr.bf16.mxu1 %v3839_v45 }
0x113c   :  { %3473 = vmatmul.mubr.msk.bf16.vlgmr.msra.gmra.mrb[68].mxu1 %vm296_vm4, %v2162_v38 }
0x113d   :  { %3483 = vmatpush3.bf16.msra.mxu1 %v2279_v39  ;;  %3484 = vmatprep.mubr.msk.bf16.mxu1 %vm3840_vm1, %v3839_v45 }
0x113e   :  { %3494 = vmatprep.subr.bf16.mxu1 %v3839_v45 }
0x1151   :  { %v2384_v54 = vpop.xlane.xlu1 %2383 }
0x1155   :  { %v2504_v3 = vpop.permute.xlu1 %2503 }
0x1156   :  { %v2509_v43 = vsel %vm312_vm3, %v2504_v3, 0 }
0x1159   :  { %v2269_v53 = vpop.xlane.xlu0 %2268 }
0x115a   :  { %3719 = vrcp.f32 %v2269_v53 }
0x115b   :  { %3721 = vrcp.f32 %v2384_v54 }
0x115d   :  { %v2499_v55 = vpop.xlane.xlu0 %2498 }
0x115e   :  { %3723 = vrcp.f32 %v2499_v55 }
0x1161   :  { %v2389_v61 = vpop.permute.xlu0 %2388 }
0x1162   :  { %v2394_v63 = vsel %vm312_vm3, %v2389_v61, 0 }
0x1164   :  { %v3720_v59 = vpop.eup %3719 }
0x1165   :  { %v2271_v60 = vmul.f32 %v3720_v59, %v4461_v15  ;;  %v3722_v62 = vpop.eup %3721 }
0x1166   :  { %v2386_v0 = vmul.f32 %v3722_v62, %v4457_v13  ;;  %v4555_v62 = vld [vmem:[%s4668_s9 + $0x8] sm:$0x3f] }
0x1167   :  { %v2272_v44 = vpack.c.bf16 %v2271_v60, %v2271_v60  ;;  %v2671_v18 = vrot.slane %v4555_v62, %v3993_v34  ;;  %v2677_v36 = vrot.slane %v4555_v62, %v1279_v1  ;;  %v3633_v34 = vld [vmem:[%s4667_s8 + $0x40] sm:$0xff]   ;;  %v3634_v1 = vld [vmem:[%s4667_s8 + $0x48] sm:$0xff]  }
0x1168   :  { %v2387_v4 = vpack.c.bf16 %v2386_v0, %v2386_v0  ;;  %v3724_v6 = vpop.eup %3723 }
0x1169   :  { %3485 = vmatmul.mubr.msk.bf16.vlgmr.msra.gmra.mrb[72].mxu1 %vm296_vm4, %v2272_v44  ;;  %v2501_v7 = vmul.f32 %v3724_v6, %v4465_v16 }
0x116a   :  { %3495 = vmatpush3.bf16.msra.mxu1 %v2394_v63  ;;  %3496 = vmatprep.mubr.msk.bf16.mxu1 %vm3840_vm1, %v3839_v45  ;;  %v2571_v63 = vrot.slane %v4555_v62, %v3990_v31 }
0x116b   :  { %3506 = vmatprep.subr.bf16.mxu1 %v3839_v45  ;;  %v2502_v8 = vpack.c.bf16 %v2501_v7, %v2501_v7 }
0x1171   :  { %3497 = vmatmul.mubr.msk.bf16.vlgmr.msra.gmra.mrb[76].mxu1 %vm296_vm4, %v2387_v4 }
0x1172   :  { %3507 = vmatpush3.bf16.msra.mxu1 %v2509_v43  ;;  %3508 = vmatprep.mubr.msk.bf16.mxu1 %vm3840_vm1, %v3839_v45 }
0x1173   :  { %3524 = vmatprep.subr.bf16.mxu1 %v3839_v45 }
0x1179   :  { %3509 = vmatmul.mubr.msk.bf16.vlgmr.msra.gmra.mrb[80].mxu1 %vm296_vm4, %v2502_v8 }
0x117a   :  { %3532 = vmatprep.mubr.msk.bf16.mxu1 %vm3840_vm1, %v3839_v45 }
0x11ef   :  { %v1749_v10 = vpop.f32.mrb[52].mxu1 }
0x11f0   :  { %1755 = vst.msk [vmem:[#allocation2] sm:$0xff] %vm249_vm2, %v1749_v10  ;;  %v3426_v11 = vpop.f32.mrb[53].mxu1 }
0x11f1   :  { %v1752_v12 = vpop.f32.mrb[54].mxu1 }
0x11f2   :  { %v3427_v13 = vpop.f32.mrb[55].mxu1 }
0x11f7   :  { %v1861_v2 = vpop.f32.mrb[56].mxu1 }
0x11f8   :  { %1868 = vrot.lane.b32.xlu1 %v1861_v2, %s3846_s2  ;;  %v3438_v15 = vpop.f32.mrb[57].mxu1 }
0x11f9   :  { %v1864_v9 = vpop.f32.mrb[58].mxu1 }
0x11fa   :  { %v3439_v16 = vpop.f32.mrb[59].mxu1 }
0x11ff   :  { %v1976_v14 = vpop.f32.mrb[60].mxu1 }
0x1200   :  { %1983 = vrot.lane.b32.xlu1 %v1976_v14, %s3845_s26  ;;  %v3450_v17 = vpop.f32.mrb[61].mxu1 }
0x1201   :  { %v1979_v19 = vpop.f32.mrb[62].mxu1 }
0x1202   :  { %v3451_v58 = vpop.f32.mrb[63].mxu1 }
0x1203   :  { %v3630_v58 = vld [vmem:[#allocation8 + $0x28] sm:$0xff]  }
0x1207   :  { %v2091_v20 = vpop.f32.mrb[64].mxu1 }
0x1208   :  { %2098 = vrot.lane.b32.xlu0 %v2091_v20, %s3844_s25  ;;  %v3462_v21 = vpop.f32.mrb[65].mxu1  ;;  %v3631_v20 = vld [vmem:[#allocation8 + $0x30] sm:$0xff]  }
0x1209   :  { %v2094_v22 = vpop.f32.mrb[66].mxu1  ;;  %v3632_v21 = vld [vmem:[#allocation8 + $0x38] sm:$0xff]  }
0x120a   :  { %v3463_v25 = vpop.f32.mrb[67].mxu1 }
0x120f   :  { %v2204_v26 = vpop.f32.mrb[68].mxu1 }
0x1210   :  { %2210 = vst.msk [vmem:[#allocation2 + $0x8] sm:$0xff] %vm249_vm2, %v2204_v26  ;;  %v3474_v23 = vpop.f32.mrb[69].mxu1 }
0x1211   :  { %v2207_v24 = vpop.f32.mrb[70].mxu1 }
0x1212   :  { %v3475_v27 = vpop.f32.mrb[71].mxu1 }
0x123c   :  { %v2315_v29 = vpop.f32.mrb[72].mxu1 }
0x123d   :  { %2322 = vrot.lane.b32.xlu1 %v2315_v29, %s3846_s2  ;;  %v3486_v32 = vpop.f32.mrb[73].mxu1 }
0x123e   :  { %v2318_v33 = vpop.f32.mrb[74].mxu1 }
0x123f   :  { %v3487_v35 = vpop.f32.mrb[75].mxu1 }
0x1244   :  { %v2430_v5 = vpop.f32.mrb[76].mxu1 }
0x1245   :  { %2437 = vrot.lane.b32.xlu1 %v2430_v5, %s3845_s26  ;;  %v3498_v40 = vpop.f32.mrb[77].mxu1 }
0x1246   :  { %v2433_v41 = vpop.f32.mrb[78].mxu1 }
0x1247   :  { %v3499_v47 = vpop.f32.mrb[79].mxu1 }
0x1248   :  { %v3635_v47 = vld [vmem:[%s4667_s8 + $0x50] sm:$0xff]  }
0x124c   :  { %v2545_v50 = vpop.f32.mrb[80].mxu1 }
0x124d   :  { %2552 = vrot.lane.b32.xlu1 %v2545_v50, %s3844_s25  ;;  %v3510_v51 = vpop.f32.mrb[81].mxu1  ;;  %v3636_v50 = vld [vmem:[%s4667_s8 + $0x58] sm:$0xff]   ;;  %s3847_s25 = smov [#allocation9]  }
0x124e   :  { %v2548_v48 = vpop.f32.mrb[82].mxu1  ;;  %v3637_v51 = vld [vmem:[%s4667_s8 + $0x60] sm:$0xff]   ;;  %s3030_s9 = sshll.u32 %s3847_s25, 4  ;;  %s3031_s9 = int_to_ptr.vmem [resolvable:$true] %s3030_s9 }
0x124f   :  { %v3511_v52 = vpop.f32.mrb[83].mxu1  ;;  %v3638_v48 = vld [vmem:[%s4667_s8 + $0x68] sm:$0xff]   ;;  %s3803_s26 = scalar_lea.vmem %s3031_s9, 32  ;;  %p3808_p11 = scmp.lt.s32.totalorder %s3031_s9, %s3031_s9 }
0x1250   :  { %v3639_v52 = vld [vmem:[%s4667_s8 + $0x70] sm:$0xff]   ;;  %p3804_p10 = scmp.ne.s32.totalorder %s3031_s9, %s3803_s26  ;;  %p3809_p12 = scmp.lt.s32.totalorder %s3803_s26, %s3803_s26 }
0x1252   :  { %p3810_p13 = por %p3809_p12, %p3808_p11 }
0x1254   :  { %p3811_p0 = pnand %p3810_p13, %p3804_p10 }
0x126a   :  { %v1869_v38 = vpop.permute.xlu1 %1868 }
0x126b   :  { %1871 = vst.msk [vmem:[#allocation2] sm:$0xff] %vm472_vm5, %v1869_v38  ;;  %v3640_v38 = vld [vmem:[%s4667_s8 + $0x78] sm:$0xff]  }
0x1272   :  { %v1984_v39 = vpop.permute.xlu1 %1983 }
0x1273   :  { %1986 = vst.msk [vmem:[#allocation2] sm:$0xff] %vm588_vm6, %v1984_v39  ;;  %v3133_v39 = vld [vmem:[%s4666_s7 + $0x1] ss:$0 sm:$0xff] }
0x127a   :  { %v2099_v53 = vpop.permute.xlu0 %2098 }
0x127b   :  { %2101 = vst.msk [vmem:[#allocation2] sm:$0xff] %vm704_vm7, %v2099_v53 }
0x1282   :  { %v2556_v60 = vld [vmem:[#allocation2] sm:$0xff] }
0x12af   :  { %v2323_v54 = vpop.permute.xlu1 %2322 }
0x12b0   :  { %2325 = vst.msk [vmem:[#allocation2 + $0x8] sm:$0xff] %vm472_vm5, %v2323_v54 }
0x12b7   :  { %v2438_v55 = vpop.permute.xlu1 %2437 }
0x12b8   :  { %2440 = vst.msk [vmem:[#allocation2 + $0x8] sm:$0xff] %vm588_vm6, %v2438_v55 }
0x12bf   :  { %v2553_v59 = vpop.permute.xlu1 %2552 }
0x12c0   :  { %2555 = vst.msk [vmem:[#allocation2 + $0x8] sm:$0xff] %vm704_vm7, %v2553_v59 }
0x12c7   :  { %v2557_v61 = vld [vmem:[#allocation2 + $0x8] sm:$0xff] }
0x12c8   :  { %v2558_v44 = vpack.c.bf16 %v2557_v61, %v2556_v60 }
0x12ca   :  { %3521 = vmatmul.mubr.msk.bf16.vlgmr.msra.gmra.mrb[64].mxu0 %vm96_vm0, %v2558_v44 }
0x12cb   :  { %3552 = vmatprep.mubr.msk.bf16.mxu0 %vm3840_vm1, %v3839_v45  ;;  %3537 = vmatpush3.bf16.msra.mxu0 %v3633_v34 }
0x12cc   :  { %3538 = vmatprep.subr.bf16.mxu0 %v3839_v45 }
0x12cf   :  { %3539 = vmatpush3.bf16.msra.mxu0 %v3634_v1 }
0x12d0   :  { %3540 = vmatprep.subr.bf16.mxu0 %v3839_v45 }
0x12d3   :  { %3541 = vmatpush3.bf16.msra.mxu0 %v3635_v47 }
0x12d4   :  { %3542 = vmatprep.subr.bf16.mxu0 %v3839_v45 }
0x12d7   :  { %3543 = vmatpush3.bf16.msra.mxu0 %v3636_v50 }
0x12d8   :  { %3544 = vmatprep.subr.bf16.mxu0 %v3839_v45 }
0x12db   :  { %3545 = vmatpush3.bf16.msra.mxu0 %v3637_v51 }
0x12dc   :  { %3546 = vmatprep.subr.bf16.mxu0 %v3839_v45 }
0x12df   :  { %3547 = vmatpush3.bf16.msra.mxu0 %v3638_v48 }
0x12e0   :  { %3548 = vmatprep.subr.bf16.mxu0 %v3839_v45 }
0x12e3   :  { %3549 = vmatpush3.bf16.msra.mxu0 %v3639_v52 }
0x12e4   :  { %3550 = vmatprep.subr.bf16.mxu0 %v3839_v45 }
0x12e7   :  { %3551 = vmatpush3.bf16.msra.mxu0 %v3640_v38  ;;  %v2926_v38 = vrot.slane %v4555_v62, %v1525_v46  ;;  %v3163_v46 = vld [vmem:[%s4670_s11] ss:$0 sm:$0xff] }
0x139d   :  { %v2633_v0 = vpop.f32.mrb[64].mxu0 }
0x139e   :  { %v2634_v3 = vadd.f32 %v2633_v0, %v2571_v63  ;;  %v3522_v4 = vpop.f32.mrb[65].mxu0 }
0x139f   :  { %v2636_v6 = vpop.f32.mrb[66].mxu0 }
0x13a0   :  { %v2637_v43 = vadd.f32 %v2636_v6, %v2571_v63  ;;  %v3523_v7 = vpop.f32.mrb[67].mxu0  ;;  %v2640_v8 = vadd.f32 %v2634_v3, %v4336_v56 }
0x13a2   :  { %v2641_v10 = vadd.f32 %v2637_v43, %v4338_v57  ;;  %v2642_v11 = vsel %vm96_vm0, %v2640_v8, 0.0  ;;  %v3629_v57 = vld [vmem:[#allocation8 + $0x20] sm:$0xff]  }
0x13a3   :  { %2643 = vadd.xlane.f32.xlu0 %v2642_v11  ;;  %3525 = vmatpush3.bf16.msra.mxu1 %v3629_v57 }
0x13a4   :  { %v2645_v12 = vsel %vm96_vm0, %v2641_v10, 0.0  ;;  %3526 = vmatprep.subr.bf16.mxu1 %v3839_v45 }
0x13a5   :  { %2646 = vadd.xlane.f32.xlu1 %v2645_v12 }
0x13a7   :  { %3527 = vmatpush3.bf16.msra.mxu1 %v3630_v58 }
0x13a8   :  { %3528 = vmatprep.subr.bf16.mxu1 %v3839_v45 }
0x13ab   :  { %3529 = vmatpush3.bf16.msra.mxu1 %v3631_v20 }
0x13ac   :  { %3530 = vmatprep.subr.bf16.mxu1 %v3839_v45 }
0x13af   :  { %3531 = vmatpush3.bf16.msra.mxu1 %v3632_v21 }
0x13b0   :  { %3556 = vmatprep.subr.bf16.mxu1 %v3839_v45 }
0x1430   :  { %v2644_v13 = vpop.xlane.xlu0 %2643 }
0x1431   :  { %v2648_v2 = vmul.f32 0.015625, %v2644_v13 }
0x1432   :  { %v2647_v15 = vpop.xlane.xlu1 %2646 }
0x1433   :  { %v2650_v31 = vsub.f32 %v2640_v8, %v2648_v2  ;;  %v2649_v9 = vmul.f32 0.015625, %v2647_v15 }
0x1435   :  { %v2651_v16 = vsub.f32 %v2641_v10, %v2649_v9  ;;  %v2652_v14 = vmul.f32 %v2650_v31, %v2650_v31 }
0x1437   :  { %v2654_v17 = vsel %vm96_vm0, %v2652_v14, 0.0  ;;  %v2653_v19 = vmul.f32 %v2651_v16, %v2651_v16 }
0x1438   :  { %2655 = vadd.xlane.f32.xlu0 %v2654_v17  ;;  %v2805_v17 = vrot.slane %v4555_v62, %v1404_v42 }
0x1439   :  { %v2657_v56 = vsel %vm96_vm0, %v2653_v19, 0.0 }
0x143c   :  { %2658 = vadd.xlane.f32.xlu0 %v2657_v56 }
0x14c5   :  { %v2656_v22 = vpop.xlane.xlu0 %2655 }
0x14c6   :  { %v2660_v25 = vmul.f32 0.015625, %v2656_v22 }
0x14c8   :  { %v2662_v26 = vadd.f32 1e-12, %v2660_v25 }
0x14c9   :  { %v2659_v23 = vpop.xlane.xlu0 %2658 }
0x14ca   :  { %3725 = vrsqrt.f32 %v2662_v26  ;;  %v2661_v24 = vmul.f32 0.015625, %v2659_v23 }
0x14cc   :  { %v2663_v27 = vadd.f32 1e-12, %v2661_v24 }
0x14ce   :  { %3727 = vrsqrt.f32 %v2663_v27 }
0x14d4   :  { %v3726_v28 = vpop.eup %3725 }
0x14d5   :  { %v2666_v29 = vmul.f32 %v3726_v28, %v2650_v31 }
0x14d7   :  { %v2672_v33 = vmul.f32 %v2671_v18, %v2666_v29 }
0x14d8   :  { %v3728_v32 = vpop.eup %3727 }
0x14d9   :  { %v2667_v35 = vmul.f32 %v3728_v32, %v2651_v16  ;;  %v2678_v5 = vadd.f32 %v2677_v36, %v2672_v33 }
0x14db   :  { %v2673_v37 = vmul.f32 %v2671_v18, %v2667_v35 }
0x14dd   :  { %v4574_v40 = vadd.f32 %v2677_v36, %v2673_v37  ;;  %v3641_v37 = vld [vmem:[%s4669_s10] sm:$0xff]  }
0x14df   :  { %v2680_v41 = vpack.c.bf16 %v4574_v40, %v2678_v5 }
0x14e1   :  { %3533 = vmatmul.mubr.msk.bf16.vlgmr.msra.gmra.mrb[84].mxu1 %vm96_vm0, %v2680_v41  ;;  %v3644_v41 = vld [vmem:[%s4669_s10 + $0x18] sm:$0xff]  }
0x14e2   :  { %3564 = vmatprep.mubr.msk.bf16.mxu1 %vm3840_vm1, %v3839_v45  ;;  %3557 = vmatpush3.bf16.msra.mxu1 %v3641_v37 }
0x14e3   :  { %3558 = vmatprep.subr.bf16.mxu1 %v3839_v45 }
0x15b4   :  { %v2759_v53 = vpop.f32.mrb[84].mxu1 }
0x15b5   :  { %v2760_v54 = vadd.f32 %v3133_v39, %v2759_v53  ;;  %v3534_v55 = vpop.f32.mrb[85].mxu1 }
0x15b6   :  { %v2762_v59 = vpop.f32.mrb[86].mxu1 }
0x15b7   :  { %v2766_v60 = vmul.f32 %v2760_v54, %v2760_v54  ;;  %v2763_v61 = vadd.f32 %v3133_v39, %v2762_v59  ;;  %v3535_v44 = vpop.f32.mrb[87].mxu1 }
0x15b9   :  { %v2768_v63 = vmul.f32 %v2766_v60, %v2760_v54  ;;  %v2767_v0 = vmul.f32 %v2763_v61, %v2763_v61 }
0x15bb   :  { %v2770_v3 = vmul.f32 0.044715, %v2768_v63  ;;  %v2769_v4 = vmul.f32 %v2767_v0, %v2763_v61 }
0x15bd   :  { %v2772_v6 = vadd.f32 %v2770_v3, %v2760_v54  ;;  %v2771_v43 = vmul.f32 0.044715, %v2769_v4 }
0x15bf   :  { %v2774_v7 = vmul.f32 0.7978846, %v2772_v6  ;;  %v2773_v8 = vadd.f32 %v2771_v43, %v2763_v61 }
0x15c1   :  { %3729 = vtanh.f32 %v2774_v7  ;;  %v2775_v10 = vmul.f32 0.7978846, %v2773_v8 }
0x15c3   :  { %3731 = vtanh.f32 %v2775_v10 }
0x15cb   :  { %v3730_v11 = vpop.eup %3729 }
0x15cc   :  { %v2778_v12 = vadd.f32 1.0, %v3730_v11 }
0x15cd   :  { %v3732_v13 = vpop.eup %3731 }
0x15ce   :  { %v2780_v2 = vmul.f32 0.5, %v2778_v12  ;;  %v2779_v15 = vadd.f32 1.0, %v3732_v13 }
0x15d0   :  { %v2781_v31 = vmul.f32 0.5, %v2779_v15  ;;  %v2782_v9 = vmul.f32 %v2780_v2, %v2760_v54  ;;  %v2932_v54 = vrot.slane %v4555_v62, %v1531_v49 }
0x15d2   :  { %v2783_v16 = vmul.f32 %v2781_v31, %v2763_v61 }
0x15d4   :  { %v2784_v14 = vpack.c.bf16 %v2783_v16, %v2782_v9 }
0x15d6   :  { %3553 = vmatmul.mubr.bf16.vlgmr.msra.gmra.mrb[68].mxu0 %v2784_v14 }
0x16a9   :  { %v2888_v19 = vpop.f32.mrb[68].mxu0 }
0x16aa   :  { %v2889_v56 = vadd.f32 %v2888_v19, %v2805_v17  ;;  %v3554_v57 = vpop.f32.mrb[69].mxu0 }
0x16ab   :  { %v2891_v58 = vpop.f32.mrb[70].mxu0 }
0x16ac   :  { %v2895_v20 = vadd.f32 %v2889_v56, %v2678_v5  ;;  %v2892_v21 = vadd.f32 %v2891_v58, %v2805_v17  ;;  %v3555_v22 = vpop.f32.mrb[71].mxu0  ;;  %v3642_v5 = vld [vmem:[%s4669_s10 + $0x8] sm:$0xff]  }
0x16ad   :  { %3559 = vmatpush3.bf16.msra.mxu1 %v3642_v5 }
0x16ae   :  { %v2896_v25 = vadd.f32 %v2892_v21, %v4574_v40  ;;  %v2897_v26 = vsel %vm96_vm0, %v2895_v20, 0.0  ;;  %3560 = vmatprep.subr.bf16.mxu1 %v3839_v45  ;;  %v3643_v40 = vld [vmem:[%s4669_s10 + $0x10] sm:$0xff]  }
0x16af   :  { %2898 = vadd.xlane.f32.xlu1 %v2897_v26 }
0x16b0   :  { %v2900_v23 = vsel %vm96_vm0, %v2896_v25, 0.0 }
0x16b1   :  { %2901 = vadd.xlane.f32.xlu0 %v2900_v23  ;;  %3561 = vmatpush3.bf16.msra.mxu1 %v3643_v40 }
0x16b2   :  { %3562 = vmatprep.subr.bf16.mxu1 %v3839_v45 }
0x16b5   :  { %3563 = vmatpush3.bf16.msra.mxu1 %v3644_v41 }
0x173c   :  { %v2899_v24 = vpop.xlane.xlu1 %2898 }
0x173d   :  { %v2903_v27 = vmul.f32 0.015625, %v2899_v24 }
0x173e   :  { %v2902_v28 = vpop.xlane.xlu0 %2901 }
0x173f   :  { %v2905_v18 = vsub.f32 %v2895_v20, %v2903_v27  ;;  %v2904_v42 = vmul.f32 0.015625, %v2902_v28 }
0x1741   :  { %v2906_v29 = vsub.f32 %v2896_v25, %v2904_v42  ;;  %v2907_v32 = vmul.f32 %v2905_v18, %v2905_v18 }
0x1743   :  { %v2909_v33 = vsel %vm96_vm0, %v2907_v32, 0.0  ;;  %v2908_v35 = vmul.f32 %v2906_v29, %v2906_v29 }
0x1744   :  { %2910 = vadd.xlane.f32.xlu1 %v2909_v33 }
0x1745   :  { %v2912_v36 = vsel %vm96_vm0, %v2908_v35, 0.0 }
0x1746   :  { %2913 = vadd.xlane.f32.xlu0 %v2912_v36 }
0x17d1   :  { %v2911_v34 = vpop.xlane.xlu1 %2910 }
0x17d2   :  { %v2915_v1 = vmul.f32 0.015625, %v2911_v34 }
0x17d3   :  { %v2914_v47 = vpop.xlane.xlu0 %2913 }
0x17d4   :  { %v2917_v50 = vadd.f32 1e-12, %v2915_v1  ;;  %v2916_v51 = vmul.f32 0.015625, %v2914_v47 }
0x17d6   :  { %3733 = vrsqrt.f32 %v2917_v50  ;;  %v2918_v48 = vadd.f32 1e-12, %v2916_v51 }
0x17d8   :  { %3735 = vrsqrt.f32 %v2918_v48 }
0x17e0   :  { %v3734_v52 = vpop.eup %3733 }
0x17e1   :  { %v2921_v39 = vmul.f32 %v3734_v52, %v2905_v18 }
0x17e2   :  { %v3736_v45 = vpop.eup %3735 }
0x17e3   :  { %v2922_v53 = vmul.f32 %v3736_v45, %v2906_v29  ;;  %v2927_v55 = vmul.f32 %v2926_v38, %v2921_v39 }
0x17e5   :  { %v2928_v59 = vmul.f32 %v2926_v38, %v2922_v53  ;;  %v2933_v61 = vadd.f32 %v2932_v54, %v2927_v55 }
0x17e7   :  { %v2934_v60 = vadd.f32 %v2932_v54, %v2928_v59 }
0x17e9   :  { %v2936_v44 = vrot.slane %v2934_v60, 7 }
0x17eb   :  { %v2939_v63 = vsel %vm2938_vm8, %v2933_v61, %v2936_v44 }
0x17ec   :  { %v2940_v0 = vpack.c.bf16 %v2939_v63, %v2939_v63 }
0x17ee   :  { %3565 = vmatmul.mubr.msk.bf16.vlgmr.msra.gmra.mrb[88].mxu1 %vm96_vm0, %v2940_v0 }
0x18c1   :  { %v3017_v3 = vpop.f32.mrb[88].mxu1 }
0x18c2   :  { %v3018_v30 = vadd.f32 %v3163_v46, %v3017_v3  ;;  %v3566_v4 = vpop.f32.mrb[89].mxu1 }
0x18c3   :  { %v3020_v49 = vpop.f32.mrb[90].mxu1 }
0x18c4   :  { %3023 = vst [vmem:[#allocation9] sm:$0x3] %v3018_v30  ;;  %v3567_v62 = vpop.f32.mrb[91].mxu1 }
0x18c5   :  { %3814 = shalt.err (!%p3811_p0)
}
0x18c6   :  { %s3815_s11 = scalar_lea.hbm %s4671_s12, 32 }
0x18c7   :  { %p3816_p1 = scmp.ne.s32.totalorder %s4671_s12, %s3815_s11  ;;  %p3819_p2 = scmp.lt.u32.totalorder %s3815_s11, %s4671_s12 }
0x18c9   :  { %p3821_p3 = pnand %p3819_p2, %p3816_p1 }
0x18cb   :  { %3824 = shalt.err (!%p3821_p3)
}
0x18cc   :  { %3033 = dma.vmem_to_hbm [thread:$0]  %s3031_s9, 32, %s4671_s12, [#allocation5]  }
0x18cd   :  { %3829 = dma.done.wait [#allocation5], 32  }
0x18ce   :  { %3830 = vsyncadd [#allocation5], 4294967264 }
0x18cf   :  { %3037 = vsyncpa [#allocation4], 1 }
0x18d0   :  { %3038 = vsyncpa [#allocation7], 1 }
0x18d1   :  { %3039 = vsyncpa [#allocation5], 1 }

</bundles_post_ra>
